<compile_context>
chip_gen: v7x
topology: tpu7x:2x2x1
jax: 0.10.0
libtpu: 0.0.40
codegen_flags: <defaults>
</compile_context>

<pallas_src>
import functools

import jax
import jax.numpy as jnp
from jax import lax
from jax.experimental import pallas as pl
from jax.experimental.pallas import tpu as pltpu  # noqa: F401  (kept for per-chip tuning)

EPS = 1e-5  # nn.LayerNorm default

# Kernel-side parameter order.  Matrix weights are (in_features, out_features)
# (lane-dense RHS for the MXU); 1-D params (biases / LayerNorm affine) are (1, N).
KERNEL_PARAM_ORDER = [
    "emb_w", "emb_b",
    "enc_in_w", "enc_in_b", "enc_out_w", "enc_out_b",
    "enc_ln1_w", "enc_ln1_b", "enc_ln2_w", "enc_ln2_b",
    "enc_l1_w", "enc_l1_b", "enc_l2_w", "enc_l2_b",
    "enc_fn_w", "enc_fn_b",
    "dec_sa_in_w", "dec_sa_in_b", "dec_sa_out_w", "dec_sa_out_b",
    "dec_mha_q_w", "dec_mha_q_b", "dec_mha_kv_w", "dec_mha_kv_b",
    "dec_mha_out_w", "dec_mha_out_b",
    "dec_ln1_w", "dec_ln1_b", "dec_ln2_w", "dec_ln2_b", "dec_ln3_w", "dec_ln3_b",
    "dec_l1_w", "dec_l1_b", "dec_l2_w", "dec_l2_b",
    "dec_fn_w", "dec_fn_b",
    "fc_w", "fc_b",
]

# External / PyTorch-convention parameter names (Linear weights are (out, in),
# packed MHA in_proj is (3H, H)).  init_params() produces this layout and
# reference() consumes it; transformer_classifier() re-lays it out for the kernel.
TORCH_PARAM_ORDER = [
    "emb_w", "emb_b",
    "enc_in_w", "enc_in_b", "enc_out_w", "enc_out_b",
    "enc_ln1_w", "enc_ln1_b", "enc_ln2_w", "enc_ln2_b",
    "enc_l1_w", "enc_l1_b", "enc_l2_w", "enc_l2_b",
    "enc_fn_w", "enc_fn_b",
    "dec_sa_in_w", "dec_sa_in_b", "dec_sa_out_w", "dec_sa_out_b",
    "dec_mha_in_w", "dec_mha_in_b", "dec_mha_out_w", "dec_mha_out_b",
    "dec_ln1_w", "dec_ln1_b", "dec_ln2_w", "dec_ln2_b", "dec_ln3_w", "dec_ln3_b",
    "dec_l1_w", "dec_l1_b", "dec_l2_w", "dec_l2_b",
    "dec_fn_w", "dec_fn_b",
    "fc_w", "fc_b",
]


# ----------------------------- in-kernel math (Refs loaded at use site) ------
def _linear(x, w_ref, b_ref):
    # x: (M, K) value; w_ref: (K, N) Ref; b_ref: (1, N) Ref.  Weight is loaded
    # right next to its matmul to keep live ranges short (no spills).
    y = jnp.dot(x, w_ref[...], preferred_element_type=jnp.float32)
    return y + b_ref[...]


def _layer_norm(x, w_ref, b_ref):
    mu = jnp.mean(x, axis=-1, keepdims=True)
    var = jnp.mean(jnp.square(x - mu), axis=-1, keepdims=True)
    return (x - mu) * lax.rsqrt(var + EPS) * w_ref[...] + b_ref[...]


def _softmax_attend(q, k, v, h):
    # q, k, v: (B, S, H) values; single head, no mask (nn.Transformer applies
    # no tgt/src mask unless the caller passes one — TransformerClassifier doesn't).
    s = jnp.einsum("bqh,bkh->bqk", q, k, preferred_element_type=jnp.float32)
    s = s * (1.0 / jnp.sqrt(jnp.float32(h)))          # scale scores (B*S*S < B*S*H)
    s = s - jnp.max(s, axis=-1, keepdims=True)        # numerical stability
    p = jnp.exp(s)                                    # EUP
    inv = pl.reciprocal(jnp.sum(p, axis=-1, keepdims=True), approx=True)  # EUP, ~free
    p = p * inv
    return jnp.einsum("bqk,bkh->bqh", p, v, preferred_element_type=jnp.float32)


def _self_attention(x2d, in_w_ref, in_b_ref, out_w_ref, out_b_ref, b, s, h):
    # Fused QKV: one (B*S, H) @ (H, 3H) matmul instead of three (·, H) ones.
    qkv = _linear(x2d, in_w_ref, in_b_ref).reshape(b, s, 3 * h)
    q = qkv[:, :, 0:h]
    k = qkv[:, :, h:2 * h]
    v = qkv[:, :, 2 * h:3 * h]
    ctx = _softmax_attend(q, k, v, h).reshape(b * s, h)
    return _linear(ctx, out_w_ref, out_b_ref)


def _cross_attention(tgt2d, mem2d, q_w_ref, q_b_ref, kv_w_ref, kv_b_ref,
                     out_w_ref, out_b_ref, b, s, h):
    q = _linear(tgt2d, q_w_ref, q_b_ref).reshape(b, s, h)
    kv = _linear(mem2d, kv_w_ref, kv_b_ref).reshape(b, s, 2 * h)   # fused K|V
    k = kv[:, :, 0:h]
    v = kv[:, :, h:2 * h]
    ctx = _softmax_attend(q, k, v, h).reshape(b * s, h)
    return _linear(ctx, out_w_ref, out_b_ref)


def _ffn(x2d, w1_ref, b1_ref, w2_ref, b2_ref):
    hact = jnp.maximum(_linear(x2d, w1_ref, b1_ref), 0.0)   # ReLU (default)
    return _linear(hact, w2_ref, b2_ref)


# ----------------------------- Pallas kernel --------------------------------
def _transformer_kernel(x_ref, *refs, B, S, H):
    o_ref = refs[-1]
    r = dict(zip(KERNEL_PARAM_ORDER, refs[:-1]))   # dict of Refs (no eager loads)

    x2d = x_ref[...]                               # (B*S, input_size)
    emb = _linear(x2d, r["emb_w"], r["emb_b"])     # (B*S, H)

    # ---- encoder layer (post-norm) ----
    src = emb
    sa = _self_attention(src, r["enc_in_w"], r["enc_in_b"],
                         r["enc_out_w"], r["enc_out_b"], B, S, H)
    src = _layer_norm(src + sa, r["enc_ln1_w"], r["enc_ln1_b"])
    ff = _ffn(src, r["enc_l1_w"], r["enc_l1_b"], r["enc_l2_w"], r["enc_l2_b"])
    src = _layer_norm(src + ff, r["enc_ln2_w"], r["enc_ln2_b"])
    memory = _layer_norm(src, r["enc_fn_w"], r["enc_fn_b"])       # encoder final norm

    # ---- decoder layer (post-norm); no causal mask (none is passed in PyTorch) ----
    tgt = emb
    sa = _self_attention(tgt, r["dec_sa_in_w"], r["dec_sa_in_b"],
                         r["dec_sa_out_w"], r["dec_sa_out_b"], B, S, H)
    tgt = _layer_norm(tgt + sa, r["dec_ln1_w"], r["dec_ln1_b"])
    ca = _cross_attention(tgt, memory,
                          r["dec_mha_q_w"], r["dec_mha_q_b"],
                          r["dec_mha_kv_w"], r["dec_mha_kv_b"],
                          r["dec_mha_out_w"], r["dec_mha_out_b"], B, S, H)
    tgt = _layer_norm(tgt + ca, r["dec_ln2_w"], r["dec_ln2_b"])
    ff = _ffn(tgt, r["dec_l1_w"], r["dec_l1_b"], r["dec_l2_w"], r["dec_l2_b"])
    tgt = _layer_norm(tgt + ff, r["dec_ln3_w"], r["dec_ln3_b"])
    out = _layer_norm(tgt, r["dec_fn_w"], r["dec_fn_b"])          # decoder final norm

    pooled = jnp.mean(out.reshape(B, S, H), axis=1)               # (B, H) mean over seq
    o_ref[...] = _linear(pooled, r["fc_w"], r["fc_b"])            # (B, num_classes)


# ----------------------------- wrapper ---------------------------------------
def _to_kernel_params(params):
    """PyTorch-layout params -> kernel layout: (in, out) weights, fused/split MHA."""
    H = params["emb_w"].shape[0]
    kp = {}
    for name in ["emb_w", "enc_in_w", "enc_out_w", "enc_l1_w", "enc_l2_w",
                 "dec_sa_in_w", "dec_sa_out_w", "dec_mha_out_w",
                 "dec_l1_w", "dec_l2_w", "fc_w"]:
        kp[name] = params[name].T                                  # (out,in) -> (in,out)
    # cross-attention packed in_proj -> separate Q projection + fused K|V projection
    kp["dec_mha_q_w"] = params["dec_mha_in_w"][0:H, :].T           # (H, H)
    kp["dec_mha_q_b"] = params["dec_mha_in_b"][:, 0:H]             # (1, H)
    kp["dec_mha_kv_w"] = params["dec_mha_in_w"][H:3 * H, :].T      # (H, 2H)
    kp["dec_mha_kv_b"] = params["dec_mha_in_b"][:, H:3 * H]        # (1, 2H)
    for name in KERNEL_PARAM_ORDER:
        if name not in kp:
            kp[name] = params[name]                                # biases / LN affine
    return kp


def transformer_classifier(x, params):
    """x: (B, S, input_size) f32, params in PyTorch layout -> (B, num_classes) f32."""
    B, S, I = x.shape
    H = params["emb_w"].shape[0]
    C = params["fc_w"].shape[0]
    kp = _to_kernel_params(params)
    param_list = [kp[k] for k in KERNEL_PARAM_ORDER]

    kernel = functools.partial(_transformer_kernel, B=B, S=S, H=H)
    # Gridless call: whole batch in one step; params (~1.3 MiB f32) + the
    # (B*S, 2048) FFN activations fit VMEM with large headroom on all chips.
    out = pl.pallas_call(
        kernel,
        out_shape=jax.ShapeDtypeStruct((B, C), jnp.float32),
    )(x.reshape(B * S, I), *param_list)
    return out


# ----------------------------- params / reference ---------------------------
def init_params(key, input_size, hidden, ff, num_classes):
    shapes = {
        "emb_w": (hidden, input_size), "emb_b": (1, hidden),
        "enc_in_w": (3 * hidden, hidden), "enc_in_b": (1, 3 * hidden),
        "enc_out_w": (hidden, hidden), "enc_out_b": (1, hidden),
        "enc_ln1_w": (1, hidden), "enc_ln1_b": (1, hidden),
        "enc_ln2_w": (1, hidden), "enc_ln2_b": (1, hidden),
        "enc_l1_w": (ff, hidden), "enc_l1_b": (1, ff),
        "enc_l2_w": (hidden, ff), "enc_l2_b": (1, hidden),
        "enc_fn_w": (1, hidden), "enc_fn_b": (1, hidden),
        "dec_sa_in_w": (3 * hidden, hidden), "dec_sa_in_b": (1, 3 * hidden),
        "dec_sa_out_w": (hidden, hidden), "dec_sa_out_b": (1, hidden),
        "dec_mha_in_w": (3 * hidden, hidden), "dec_mha_in_b": (1, 3 * hidden),
        "dec_mha_out_w": (hidden, hidden), "dec_mha_out_b": (1, hidden),
        "dec_ln1_w": (1, hidden), "dec_ln1_b": (1, hidden),
        "dec_ln2_w": (1, hidden), "dec_ln2_b": (1, hidden),
        "dec_ln3_w": (1, hidden), "dec_ln3_b": (1, hidden),
        "dec_l1_w": (ff, hidden), "dec_l1_b": (1, ff),
        "dec_l2_w": (hidden, ff), "dec_l2_b": (1, hidden),
        "dec_fn_w": (1, hidden), "dec_fn_b": (1, hidden),
        "fc_w": (num_classes, hidden), "fc_b": (1, num_classes),
    }
    params = {}
    keys = jax.random.split(key, len(TORCH_PARAM_ORDER))
    for k, name in zip(keys, TORCH_PARAM_ORDER):
        shape = shapes[name]
        if name.endswith(("ln1_w", "ln2_w", "ln3_w", "fn_w")):
            params[name] = jnp.ones(shape, jnp.float32) + \
                0.05 * jax.random.normal(k, shape, jnp.float32)
        elif name.endswith("_b"):
            params[name] = 0.01 * jax.random.normal(k, shape, jnp.float32)
        else:
            params[name] = 0.05 * jax.random.normal(k, shape, jnp.float32)
    return params


def reference(x, params):
    """Pure-JAX reference mirroring the PyTorch module (eval mode), f32 math."""
    H = params["emb_w"].shape[0]
    p = params

    def lin(v, w, b):                      # torch Linear: v @ W.T + b
        return jnp.einsum("...k,nk->...n", v, w) + b

    def ln(v, w, b):
        mu = v.mean(-1, keepdims=True)
        var = jnp.square(v - mu).mean(-1, keepdims=True)
        return (v - mu) / jnp.sqrt(var + EPS) * w + b

    def mha(q_in, k_in, v_in, in_w, in_b, out_w, out_b):
        q = lin(q_in, in_w[0:H], in_b[:, 0:H])
        k = lin(k_in, in_w[H:2 * H], in_b[:, H:2 * H])
        v = lin(v_in, in_w[2 * H:], in_b[:, 2 * H:])
        s = jnp.einsum("bqh,bkh->bqk", q, k) / jnp.sqrt(jnp.float32(H))
        pr = jax.nn.softmax(s, axis=-1)
        return lin(jnp.einsum("bqk,bkh->bqh", pr, v), out_w, out_b)

    def ffn(v, w1, b1, w2, b2):
        return lin(jnp.maximum(lin(v, w1, b1), 0.0), w2, b2)

    emb = lin(x, p["emb_w"], p["emb_b"])
    src = emb
    src = ln(src + mha(src, src, src, p["enc_in_w"], p["enc_in_b"],
                       p["enc_out_w"], p["enc_out_b"]),
             p["enc_ln1_w"], p["enc_ln1_b"])
    src = ln(src + ffn(src, p["enc_l1_w"], p["enc_l1_b"],
                       p["enc_l2_w"], p["enc_l2_b"]),
             p["enc_ln2_w"], p["enc_ln2_b"])
    memory = ln(src, p["enc_fn_w"], p["enc_fn_b"])

    tgt = emb
    tgt = ln(tgt + mha(tgt, tgt, tgt, p["dec_sa_in_w"], p["dec_sa_in_b"],
                       p["dec_sa_out_w"], p["dec_sa_out_b"]),
             p["dec_ln1_w"], p["dec_ln1_b"])
    tgt = ln(tgt + mha(tgt, memory, memory, p["dec_mha_in_w"], p["dec_mha_in_b"],
                       p["dec_mha_out_w"], p["dec_mha_out_b"]),
             p["dec_ln2_w"], p["dec_ln2_b"])
    tgt = ln(tgt + ffn(tgt, p["dec_l1_w"], p["dec_l1_b"],
                       p["dec_l2_w"], p["dec_l2_b"]),
             p["dec_ln3_w"], p["dec_ln3_b"])
    out = ln(tgt, p["dec_fn_w"], p["dec_fn_b"])

    pooled = out.mean(axis=1)
    return lin(pooled, p["fc_w"], p["fc_b"])


# ----------------------------- main ------------------------------------------
if __name__ == "__main__":
    INPUT_SIZE = 16
    HIDDEN = 32
    NUM_CLASSES = 4
    DIM_FF = 2048            # nn.Transformer default dim_feedforward
    BATCH = 2
    SEQ = 8

    key = jax.random.PRNGKey(0)
    kx, kp = jax.random.split(key)
    x = jax.random.normal(kx, (BATCH, SEQ, INPUT_SIZE), jnp.float32)
    params = init_params(kp, INPUT_SIZE, HIDDEN, DIM_FF, NUM_CLASSES)

    logits = jax.block_until_ready(transformer_classifier(x, params))
    ref = jax.block_until_ready(reference(x, params))

    assert logits.shape == (BATCH, NUM_CLASSES)
    # Slightly looser tolerance than pure-f32 because the kernel uses the
    # approximate (EUP) reciprocal for the softmax normalisation.
    assert jnp.allclose(logits, ref, rtol=2e-3, atol=2e-3), (logits, ref)
    print("KERNEL_OK")
</pallas_src>

<mosaic_0001>
module attributes {stable_mosaic.version = 11 : i64} {
  func.func @_transformer_kernel(%arg0: memref<16x16xf32, #tpu.memory_space<vmem>>, %arg1: memref<16x32xf32, #tpu.memory_space<vmem>>, %arg2: memref<1x32xf32, #tpu.memory_space<vmem>>, %arg3: memref<32x96xf32, #tpu.memory_space<vmem>>, %arg4: memref<1x96xf32, #tpu.memory_space<vmem>>, %arg5: memref<32x32xf32, #tpu.memory_space<vmem>>, %arg6: memref<1x32xf32, #tpu.memory_space<vmem>>, %arg7: memref<1x32xf32, #tpu.memory_space<vmem>>, %arg8: memref<1x32xf32, #tpu.memory_space<vmem>>, %arg9: memref<1x32xf32, #tpu.memory_space<vmem>>, %arg10: memref<1x32xf32, #tpu.memory_space<vmem>>, %arg11: memref<32x2048xf32, #tpu.memory_space<vmem>>, %arg12: memref<1x2048xf32, #tpu.memory_space<vmem>>, %arg13: memref<2048x32xf32, #tpu.memory_space<vmem>>, %arg14: memref<1x32xf32, #tpu.memory_space<vmem>>, %arg15: memref<1x32xf32, #tpu.memory_space<vmem>>, %arg16: memref<1x32xf32, #tpu.memory_space<vmem>>, %arg17: memref<32x96xf32, #tpu.memory_space<vmem>>, %arg18: memref<1x96xf32, #tpu.memory_space<vmem>>, %arg19: memref<32x32xf32, #tpu.memory_space<vmem>>, %arg20: memref<1x32xf32, #tpu.memory_space<vmem>>, %arg21: memref<32x32xf32, #tpu.memory_space<vmem>>, %arg22: memref<1x32xf32, #tpu.memory_space<vmem>>, %arg23: memref<32x64xf32, #tpu.memory_space<vmem>>, %arg24: memref<1x64xf32, #tpu.memory_space<vmem>>, %arg25: memref<32x32xf32, #tpu.memory_space<vmem>>, %arg26: memref<1x32xf32, #tpu.memory_space<vmem>>, %arg27: memref<1x32xf32, #tpu.memory_space<vmem>>, %arg28: memref<1x32xf32, #tpu.memory_space<vmem>>, %arg29: memref<1x32xf32, #tpu.memory_space<vmem>>, %arg30: memref<1x32xf32, #tpu.memory_space<vmem>>, %arg31: memref<1x32xf32, #tpu.memory_space<vmem>>, %arg32: memref<1x32xf32, #tpu.memory_space<vmem>>, %arg33: memref<32x2048xf32, #tpu.memory_space<vmem>>, %arg34: memref<1x2048xf32, #tpu.memory_space<vmem>>, %arg35: memref<2048x32xf32, #tpu.memory_space<vmem>>, %arg36: memref<1x32xf32, #tpu.memory_space<vmem>>, %arg37: memref<1x32xf32, #tpu.memory_space<vmem>>, %arg38: memref<1x32xf32, #tpu.memory_space<vmem>>, %arg39: memref<32x4xf32, #tpu.memory_space<vmem>>, %arg40: memref<1x4xf32, #tpu.memory_space<vmem>>, %arg41: memref<2x4xf32, #tpu.memory_space<vmem>>) attributes {dimension_semantics = [], scalar_prefetch = 0 : i64, scratch_operands = 0 : i64, tpu.core_type = #tpu.core_type<tc>} {
    %c0 = arith.constant 0 : index
    %c0_0 = arith.constant 0 : index
    %0 = vector.load %arg0[%c0, %c0_0] : memref<16x16xf32, #tpu.memory_space<vmem>>, vector<16x16xf32>
    %c0_1 = arith.constant 0 : index
    %c0_2 = arith.constant 0 : index
    %1 = vector.load %arg1[%c0_1, %c0_2] : memref<16x32xf32, #tpu.memory_space<vmem>>, vector<16x32xf32>
    %cst = arith.constant dense<0.000000e+00> : vector<16x32xf32>
    %2 = tpu.matmul %0, %1, %cst {dimension_numbers = #tpu.dot_dimension_numbers<[1], [0], [0], [1], [0, 0, 1, 1], [], []>} : vector<16x16xf32>, vector<16x32xf32>, vector<16x32xf32> -> vector<16x32xf32>
    %c0_3 = arith.constant 0 : index
    %c0_4 = arith.constant 0 : index
    %3 = vector.load %arg2[%c0_3, %c0_4] : memref<1x32xf32, #tpu.memory_space<vmem>>, vector<1x32xf32>
    %4 = vector.broadcast %3 : vector<1x32xf32> to vector<16x32xf32>
    %5 = arith.addf %2, %4 : vector<16x32xf32>
    %c0_5 = arith.constant 0 : index
    %c0_6 = arith.constant 0 : index
    %6 = vector.load %arg3[%c0_5, %c0_6] : memref<32x96xf32, #tpu.memory_space<vmem>>, vector<32x96xf32>
    %cst_7 = arith.constant dense<0.000000e+00> : vector<16x96xf32>
    %7 = tpu.matmul %5, %6, %cst_7 {dimension_numbers = #tpu.dot_dimension_numbers<[1], [0], [0], [1], [0, 0, 1, 1], [], []>} : vector<16x32xf32>, vector<32x96xf32>, vector<16x96xf32> -> vector<16x96xf32>
    %c0_8 = arith.constant 0 : index
    %c0_9 = arith.constant 0 : index
    %8 = vector.load %arg4[%c0_8, %c0_9] : memref<1x96xf32, #tpu.memory_space<vmem>>, vector<1x96xf32>
    %9 = vector.broadcast %8 : vector<1x96xf32> to vector<16x96xf32>
    %10 = arith.addf %7, %9 : vector<16x96xf32>
    %11 = vector.shape_cast %10 : vector<16x96xf32> to vector<2x8x96xf32>
    %12 = vector.extract_strided_slice %11 {offsets = [0, 0, 0], sizes = [2, 8, 32], strides = [1, 1, 1]} : vector<2x8x96xf32> to vector<2x8x32xf32>
    %13 = vector.extract_strided_slice %11 {offsets = [0, 0, 32], sizes = [2, 8, 32], strides = [1, 1, 1]} : vector<2x8x96xf32> to vector<2x8x32xf32>
    %14 = vector.extract_strided_slice %11 {offsets = [0, 0, 64], sizes = [2, 8, 32], strides = [1, 1, 1]} : vector<2x8x96xf32> to vector<2x8x32xf32>
    "tpu.trace_start"() <{level = 10 : i32, message = "bqh,bkh->bqk"}> : () -> ()
    %cst_10 = arith.constant dense<0.000000e+00> : vector<2x8x8xf32>
    %15 = tpu.matmul %12, %13, %cst_10 {dimension_numbers = #tpu.dot_dimension_numbers<[2], [2], [1], [1], [0, 0, 0, 1, 1, 1], [0], [0]>} : vector<2x8x32xf32>, vector<2x8x32xf32>, vector<2x8x8xf32> -> vector<2x8x8xf32>
    %cst_11 = arith.constant 3.200000e+01 : f32
    "tpu.trace_stop"() : () -> ()
    %16 = math.sqrt %cst_11 : f32
    %cst_12 = arith.constant 1.000000e+00 : f32
    %17 = arith.divf %cst_12, %16 : f32
    %18 = vector.broadcast %17 : f32 to vector<2x8x8xf32>
    %19 = arith.mulf %15, %18 : vector<2x8x8xf32>
    %cst_13 = arith.constant dense<0xFF800000> : vector<2x8xf32>
    %20 = vector.multi_reduction <maximumf>, %19, %cst_13 [2] : vector<2x8x8xf32> to vector<2x8xf32>
    %21 = vector.shape_cast %20 : vector<2x8xf32> to vector<2x8x1xf32>
    %22 = vector.broadcast %21 : vector<2x8x1xf32> to vector<2x8x8xf32>
    %23 = arith.subf %19, %22 : vector<2x8x8xf32>
    %24 = math.exp %23 : vector<2x8x8xf32>
    %cst_14 = arith.constant dense<0.000000e+00> : vector<2x8xf32>
    %25 = vector.multi_reduction <add>, %24, %cst_14 [2] : vector<2x8x8xf32> to vector<2x8xf32>
    %26 = vector.shape_cast %25 : vector<2x8xf32> to vector<2x8x1xf32>
    %27 = tpu.reciprocal %26 {approx = true} : vector<2x8x1xf32> -> vector<2x8x1xf32>
    %28 = vector.broadcast %27 : vector<2x8x1xf32> to vector<2x8x8xf32>
    %29 = arith.mulf %24, %28 : vector<2x8x8xf32>
    "tpu.trace_start"() <{level = 10 : i32, message = "bqk,bkh->bqh"}> : () -> ()
    %cst_15 = arith.constant dense<0.000000e+00> : vector<2x8x32xf32>
    %30 = tpu.matmul %29, %14, %cst_15 {dimension_numbers = #tpu.dot_dimension_numbers<[2], [1], [1], [2], [0, 0, 0, 1, 1, 2], [0], [0]>} : vector<2x8x8xf32>, vector<2x8x32xf32>, vector<2x8x32xf32> -> vector<2x8x32xf32>
    "tpu.trace_stop"() : () -> ()
    %31 = vector.shape_cast %30 : vector<2x8x32xf32> to vector<16x32xf32>
    %c0_16 = arith.constant 0 : index
    %c0_17 = arith.constant 0 : index
    %32 = vector.load %arg5[%c0_16, %c0_17] : memref<32x32xf32, #tpu.memory_space<vmem>>, vector<32x32xf32>
    %cst_18 = arith.constant dense<0.000000e+00> : vector<16x32xf32>
    %33 = tpu.matmul %31, %32, %cst_18 {dimension_numbers = #tpu.dot_dimension_numbers<[1], [0], [0], [1], [0, 0, 1, 1], [], []>} : vector<16x32xf32>, vector<32x32xf32>, vector<16x32xf32> -> vector<16x32xf32>
    %c0_19 = arith.constant 0 : index
    %c0_20 = arith.constant 0 : index
    %34 = vector.load %arg6[%c0_19, %c0_20] : memref<1x32xf32, #tpu.memory_space<vmem>>, vector<1x32xf32>
    %35 = vector.broadcast %34 : vector<1x32xf32> to vector<16x32xf32>
    %36 = arith.addf %33, %35 : vector<16x32xf32>
    %37 = arith.addf %5, %36 : vector<16x32xf32>
    %cst_21 = arith.constant dense<0.000000e+00> : vector<16xf32>
    %38 = vector.multi_reduction <add>, %37, %cst_21 [1] : vector<16x32xf32> to vector<16xf32>
    %39 = vector.shape_cast %38 : vector<16xf32> to vector<16x1xf32>
    %cst_22 = arith.constant 3.200000e+01 : f32
    %40 = vector.broadcast %cst_22 : f32 to vector<16x1xf32>
    %41 = arith.divf %39, %40 : vector<16x1xf32>
    %42 = vector.broadcast %41 : vector<16x1xf32> to vector<16x32xf32>
    %43 = arith.subf %37, %42 : vector<16x32xf32>
    %44 = arith.mulf %43, %43 : vector<16x32xf32>
    %cst_23 = arith.constant dense<0.000000e+00> : vector<16xf32>
    %45 = vector.multi_reduction <add>, %44, %cst_23 [1] : vector<16x32xf32> to vector<16xf32>
    %46 = vector.shape_cast %45 : vector<16xf32> to vector<16x1xf32>
    %cst_24 = arith.constant 3.200000e+01 : f32
    %47 = vector.broadcast %cst_24 : f32 to vector<16x1xf32>
    %48 = arith.divf %46, %47 : vector<16x1xf32>
    %49 = vector.broadcast %41 : vector<16x1xf32> to vector<16x32xf32>
    %50 = arith.subf %37, %49 : vector<16x32xf32>
    %cst_25 = arith.constant 9.99999974E-6 : f32
    %51 = vector.broadcast %cst_25 : f32 to vector<16x1xf32>
    %52 = arith.addf %48, %51 : vector<16x1xf32>
    %53 = math.rsqrt %52 : vector<16x1xf32>
    %54 = vector.broadcast %53 : vector<16x1xf32> to vector<16x32xf32>
    %55 = arith.mulf %50, %54 : vector<16x32xf32>
    %c0_26 = arith.constant 0 : index
    %c0_27 = arith.constant 0 : index
    %56 = vector.load %arg7[%c0_26, %c0_27] : memref<1x32xf32, #tpu.memory_space<vmem>>, vector<1x32xf32>
    %57 = vector.broadcast %56 : vector<1x32xf32> to vector<16x32xf32>
    %58 = arith.mulf %55, %57 : vector<16x32xf32>
    %c0_28 = arith.constant 0 : index
    %c0_29 = arith.constant 0 : index
    %59 = vector.load %arg8[%c0_28, %c0_29] : memref<1x32xf32, #tpu.memory_space<vmem>>, vector<1x32xf32>
    %60 = vector.broadcast %59 : vector<1x32xf32> to vector<16x32xf32>
    %61 = arith.addf %58, %60 : vector<16x32xf32>
    %c0_30 = arith.constant 0 : index
    %c0_31 = arith.constant 0 : index
    %62 = vector.load %arg11[%c0_30, %c0_31] : memref<32x2048xf32, #tpu.memory_space<vmem>>, vector<32x2048xf32>
    %cst_32 = arith.constant dense<0.000000e+00> : vector<16x2048xf32>
    %63 = tpu.matmul %61, %62, %cst_32 {dimension_numbers = #tpu.dot_dimension_numbers<[1], [0], [0], [1], [0, 0, 1, 1], [], []>} : vector<16x32xf32>, vector<32x2048xf32>, vector<16x2048xf32> -> vector<16x2048xf32>
    %c0_33 = arith.constant 0 : index
    %c0_34 = arith.constant 0 : index
    %64 = vector.load %arg12[%c0_33, %c0_34] : memref<1x2048xf32, #tpu.memory_space<vmem>>, vector<1x2048xf32>
    %65 = vector.broadcast %64 : vector<1x2048xf32> to vector<16x2048xf32>
    %66 = arith.addf %63, %65 : vector<16x2048xf32>
    %cst_35 = arith.constant 0.000000e+00 : f32
    %67 = vector.broadcast %cst_35 : f32 to vector<16x2048xf32>
    %68 = arith.maximumf %66, %67 : vector<16x2048xf32>
    %c0_36 = arith.constant 0 : index
    %c0_37 = arith.constant 0 : index
    %69 = vector.load %arg13[%c0_36, %c0_37] : memref<2048x32xf32, #tpu.memory_space<vmem>>, vector<2048x32xf32>
    %cst_38 = arith.constant dense<0.000000e+00> : vector<16x32xf32>
    %70 = tpu.matmul %68, %69, %cst_38 {dimension_numbers = #tpu.dot_dimension_numbers<[1], [0], [0], [1], [0, 0, 1, 1], [], []>} : vector<16x2048xf32>, vector<2048x32xf32>, vector<16x32xf32> -> vector<16x32xf32>
    %c0_39 = arith.constant 0 : index
    %c0_40 = arith.constant 0 : index
    %71 = vector.load %arg14[%c0_39, %c0_40] : memref<1x32xf32, #tpu.memory_space<vmem>>, vector<1x32xf32>
    %72 = vector.broadcast %71 : vector<1x32xf32> to vector<16x32xf32>
    %73 = arith.addf %70, %72 : vector<16x32xf32>
    %74 = arith.addf %61, %73 : vector<16x32xf32>
    %cst_41 = arith.constant dense<0.000000e+00> : vector<16xf32>
    %75 = vector.multi_reduction <add>, %74, %cst_41 [1] : vector<16x32xf32> to vector<16xf32>
    %76 = vector.shape_cast %75 : vector<16xf32> to vector<16x1xf32>
    %cst_42 = arith.constant 3.200000e+01 : f32
    %77 = vector.broadcast %cst_42 : f32 to vector<16x1xf32>
    %78 = arith.divf %76, %77 : vector<16x1xf32>
    %79 = vector.broadcast %78 : vector<16x1xf32> to vector<16x32xf32>
    %80 = arith.subf %74, %79 : vector<16x32xf32>
    %81 = arith.mulf %80, %80 : vector<16x32xf32>
    %cst_43 = arith.constant dense<0.000000e+00> : vector<16xf32>
    %82 = vector.multi_reduction <add>, %81, %cst_43 [1] : vector<16x32xf32> to vector<16xf32>
    %83 = vector.shape_cast %82 : vector<16xf32> to vector<16x1xf32>
    %cst_44 = arith.constant 3.200000e+01 : f32
    %84 = vector.broadcast %cst_44 : f32 to vector<16x1xf32>
    %85 = arith.divf %83, %84 : vector<16x1xf32>
    %86 = vector.broadcast %78 : vector<16x1xf32> to vector<16x32xf32>
    %87 = arith.subf %74, %86 : vector<16x32xf32>
    %cst_45 = arith.constant 9.99999974E-6 : f32
    %88 = vector.broadcast %cst_45 : f32 to vector<16x1xf32>
    %89 = arith.addf %85, %88 : vector<16x1xf32>
    %90 = math.rsqrt %89 : vector<16x1xf32>
    %91 = vector.broadcast %90 : vector<16x1xf32> to vector<16x32xf32>
    %92 = arith.mulf %87, %91 : vector<16x32xf32>
    %c0_46 = arith.constant 0 : index
    %c0_47 = arith.constant 0 : index
    %93 = vector.load %arg9[%c0_46, %c0_47] : memref<1x32xf32, #tpu.memory_space<vmem>>, vector<1x32xf32>
    %94 = vector.broadcast %93 : vector<1x32xf32> to vector<16x32xf32>
    %95 = arith.mulf %92, %94 : vector<16x32xf32>
    %c0_48 = arith.constant 0 : index
    %c0_49 = arith.constant 0 : index
    %96 = vector.load %arg10[%c0_48, %c0_49] : memref<1x32xf32, #tpu.memory_space<vmem>>, vector<1x32xf32>
    %97 = vector.broadcast %96 : vector<1x32xf32> to vector<16x32xf32>
    %98 = arith.addf %95, %97 : vector<16x32xf32>
    %cst_50 = arith.constant dense<0.000000e+00> : vector<16xf32>
    %99 = vector.multi_reduction <add>, %98, %cst_50 [1] : vector<16x32xf32> to vector<16xf32>
    %100 = vector.shape_cast %99 : vector<16xf32> to vector<16x1xf32>
    %cst_51 = arith.constant 3.200000e+01 : f32
    %101 = vector.broadcast %cst_51 : f32 to vector<16x1xf32>
    %102 = arith.divf %100, %101 : vector<16x1xf32>
    %103 = vector.broadcast %102 : vector<16x1xf32> to vector<16x32xf32>
    %104 = arith.subf %98, %103 : vector<16x32xf32>
    %105 = arith.mulf %104, %104 : vector<16x32xf32>
    %cst_52 = arith.constant dense<0.000000e+00> : vector<16xf32>
    %106 = vector.multi_reduction <add>, %105, %cst_52 [1] : vector<16x32xf32> to vector<16xf32>
    %107 = vector.shape_cast %106 : vector<16xf32> to vector<16x1xf32>
    %cst_53 = arith.constant 3.200000e+01 : f32
    %108 = vector.broadcast %cst_53 : f32 to vector<16x1xf32>
    %109 = arith.divf %107, %108 : vector<16x1xf32>
    %110 = vector.broadcast %102 : vector<16x1xf32> to vector<16x32xf32>
    %111 = arith.subf %98, %110 : vector<16x32xf32>
    %cst_54 = arith.constant 9.99999974E-6 : f32
    %112 = vector.broadcast %cst_54 : f32 to vector<16x1xf32>
    %113 = arith.addf %109, %112 : vector<16x1xf32>
    %114 = math.rsqrt %113 : vector<16x1xf32>
    %115 = vector.broadcast %114 : vector<16x1xf32> to vector<16x32xf32>
    %116 = arith.mulf %111, %115 : vector<16x32xf32>
    %c0_55 = arith.constant 0 : index
    %c0_56 = arith.constant 0 : index
    %117 = vector.load %arg15[%c0_55, %c0_56] : memref<1x32xf32, #tpu.memory_space<vmem>>, vector<1x32xf32>
    %118 = vector.broadcast %117 : vector<1x32xf32> to vector<16x32xf32>
    %119 = arith.mulf %116, %118 : vector<16x32xf32>
    %c0_57 = arith.constant 0 : index
    %c0_58 = arith.constant 0 : index
    %120 = vector.load %arg16[%c0_57, %c0_58] : memref<1x32xf32, #tpu.memory_space<vmem>>, vector<1x32xf32>
    %121 = vector.broadcast %120 : vector<1x32xf32> to vector<16x32xf32>
    %122 = arith.addf %119, %121 : vector<16x32xf32>
    %c0_59 = arith.constant 0 : index
    %c0_60 = arith.constant 0 : index
    %123 = vector.load %arg17[%c0_59, %c0_60] : memref<32x96xf32, #tpu.memory_space<vmem>>, vector<32x96xf32>
    %cst_61 = arith.constant dense<0.000000e+00> : vector<16x96xf32>
    %124 = tpu.matmul %5, %123, %cst_61 {dimension_numbers = #tpu.dot_dimension_numbers<[1], [0], [0], [1], [0, 0, 1, 1], [], []>} : vector<16x32xf32>, vector<32x96xf32>, vector<16x96xf32> -> vector<16x96xf32>
    %c0_62 = arith.constant 0 : index
    %c0_63 = arith.constant 0 : index
    %125 = vector.load %arg18[%c0_62, %c0_63] : memref<1x96xf32, #tpu.memory_space<vmem>>, vector<1x96xf32>
    %126 = vector.broadcast %125 : vector<1x96xf32> to vector<16x96xf32>
    %127 = arith.addf %124, %126 : vector<16x96xf32>
    %128 = vector.shape_cast %127 : vector<16x96xf32> to vector<2x8x96xf32>
    %129 = vector.extract_strided_slice %128 {offsets = [0, 0, 0], sizes = [2, 8, 32], strides = [1, 1, 1]} : vector<2x8x96xf32> to vector<2x8x32xf32>
    %130 = vector.extract_strided_slice %128 {offsets = [0, 0, 32], sizes = [2, 8, 32], strides = [1, 1, 1]} : vector<2x8x96xf32> to vector<2x8x32xf32>
    %131 = vector.extract_strided_slice %128 {offsets = [0, 0, 64], sizes = [2, 8, 32], strides = [1, 1, 1]} : vector<2x8x96xf32> to vector<2x8x32xf32>
    "tpu.trace_start"() <{level = 10 : i32, message = "bqh,bkh->bqk"}> : () -> ()
    %cst_64 = arith.constant dense<0.000000e+00> : vector<2x8x8xf32>
    %132 = tpu.matmul %129, %130, %cst_64 {dimension_numbers = #tpu.dot_dimension_numbers<[2], [2], [1], [1], [0, 0, 0, 1, 1, 1], [0], [0]>} : vector<2x8x32xf32>, vector<2x8x32xf32>, vector<2x8x8xf32> -> vector<2x8x8xf32>
    %cst_65 = arith.constant 3.200000e+01 : f32
    "tpu.trace_stop"() : () -> ()
    %133 = math.sqrt %cst_65 : f32
    %cst_66 = arith.constant 1.000000e+00 : f32
    %134 = arith.divf %cst_66, %133 : f32
    %135 = vector.broadcast %134 : f32 to vector<2x8x8xf32>
    %136 = arith.mulf %132, %135 : vector<2x8x8xf32>
    %cst_67 = arith.constant dense<0xFF800000> : vector<2x8xf32>
    %137 = vector.multi_reduction <maximumf>, %136, %cst_67 [2] : vector<2x8x8xf32> to vector<2x8xf32>
    %138 = vector.shape_cast %137 : vector<2x8xf32> to vector<2x8x1xf32>
    %139 = vector.broadcast %138 : vector<2x8x1xf32> to vector<2x8x8xf32>
    %140 = arith.subf %136, %139 : vector<2x8x8xf32>
    %141 = math.exp %140 : vector<2x8x8xf32>
    %cst_68 = arith.constant dense<0.000000e+00> : vector<2x8xf32>
    %142 = vector.multi_reduction <add>, %141, %cst_68 [2] : vector<2x8x8xf32> to vector<2x8xf32>
    %143 = vector.shape_cast %142 : vector<2x8xf32> to vector<2x8x1xf32>
    %144 = tpu.reciprocal %143 {approx = true} : vector<2x8x1xf32> -> vector<2x8x1xf32>
    %145 = vector.broadcast %144 : vector<2x8x1xf32> to vector<2x8x8xf32>
    %146 = arith.mulf %141, %145 : vector<2x8x8xf32>
    "tpu.trace_start"() <{level = 10 : i32, message = "bqk,bkh->bqh"}> : () -> ()
    %cst_69 = arith.constant dense<0.000000e+00> : vector<2x8x32xf32>
    %147 = tpu.matmul %146, %131, %cst_69 {dimension_numbers = #tpu.dot_dimension_numbers<[2], [1], [1], [2], [0, 0, 0, 1, 1, 2], [0], [0]>} : vector<2x8x8xf32>, vector<2x8x32xf32>, vector<2x8x32xf32> -> vector<2x8x32xf32>
    "tpu.trace_stop"() : () -> ()
    %148 = vector.shape_cast %147 : vector<2x8x32xf32> to vector<16x32xf32>
    %c0_70 = arith.constant 0 : index
    %c0_71 = arith.constant 0 : index
    %149 = vector.load %arg19[%c0_70, %c0_71] : memref<32x32xf32, #tpu.memory_space<vmem>>, vector<32x32xf32>
    %cst_72 = arith.constant dense<0.000000e+00> : vector<16x32xf32>
    %150 = tpu.matmul %148, %149, %cst_72 {dimension_numbers = #tpu.dot_dimension_numbers<[1], [0], [0], [1], [0, 0, 1, 1], [], []>} : vector<16x32xf32>, vector<32x32xf32>, vector<16x32xf32> -> vector<16x32xf32>
    %c0_73 = arith.constant 0 : index
    %c0_74 = arith.constant 0 : index
    %151 = vector.load %arg20[%c0_73, %c0_74] : memref<1x32xf32, #tpu.memory_space<vmem>>, vector<1x32xf32>
    %152 = vector.broadcast %151 : vector<1x32xf32> to vector<16x32xf32>
    %153 = arith.addf %150, %152 : vector<16x32xf32>
    %154 = arith.addf %5, %153 : vector<16x32xf32>
    %cst_75 = arith.constant dense<0.000000e+00> : vector<16xf32>
    %155 = vector.multi_reduction <add>, %154, %cst_75 [1] : vector<16x32xf32> to vector<16xf32>
    %156 = vector.shape_cast %155 : vector<16xf32> to vector<16x1xf32>
    %cst_76 = arith.constant 3.200000e+01 : f32
    %157 = vector.broadcast %cst_76 : f32 to vector<16x1xf32>
    %158 = arith.divf %156, %157 : vector<16x1xf32>
    %159 = vector.broadcast %158 : vector<16x1xf32> to vector<16x32xf32>
    %160 = arith.subf %154, %159 : vector<16x32xf32>
    %161 = arith.mulf %160, %160 : vector<16x32xf32>
    %cst_77 = arith.constant dense<0.000000e+00> : vector<16xf32>
    %162 = vector.multi_reduction <add>, %161, %cst_77 [1] : vector<16x32xf32> to vector<16xf32>
    %163 = vector.shape_cast %162 : vector<16xf32> to vector<16x1xf32>
    %cst_78 = arith.constant 3.200000e+01 : f32
    %164 = vector.broadcast %cst_78 : f32 to vector<16x1xf32>
    %165 = arith.divf %163, %164 : vector<16x1xf32>
    %166 = vector.broadcast %158 : vector<16x1xf32> to vector<16x32xf32>
    %167 = arith.subf %154, %166 : vector<16x32xf32>
    %cst_79 = arith.constant 9.99999974E-6 : f32
    %168 = vector.broadcast %cst_79 : f32 to vector<16x1xf32>
    %169 = arith.addf %165, %168 : vector<16x1xf32>
    %170 = math.rsqrt %169 : vector<16x1xf32>
    %171 = vector.broadcast %170 : vector<16x1xf32> to vector<16x32xf32>
    %172 = arith.mulf %167, %171 : vector<16x32xf32>
    %c0_80 = arith.constant 0 : index
    %c0_81 = arith.constant 0 : index
    %173 = vector.load %arg27[%c0_80, %c0_81] : memref<1x32xf32, #tpu.memory_space<vmem>>, vector<1x32xf32>
    %174 = vector.broadcast %173 : vector<1x32xf32> to vector<16x32xf32>
    %175 = arith.mulf %172, %174 : vector<16x32xf32>
    %c0_82 = arith.constant 0 : index
    %c0_83 = arith.constant 0 : index
    %176 = vector.load %arg28[%c0_82, %c0_83] : memref<1x32xf32, #tpu.memory_space<vmem>>, vector<1x32xf32>
    %177 = vector.broadcast %176 : vector<1x32xf32> to vector<16x32xf32>
    %178 = arith.addf %175, %177 : vector<16x32xf32>
    %c0_84 = arith.constant 0 : index
    %c0_85 = arith.constant 0 : index
    %179 = vector.load %arg21[%c0_84, %c0_85] : memref<32x32xf32, #tpu.memory_space<vmem>>, vector<32x32xf32>
    %cst_86 = arith.constant dense<0.000000e+00> : vector<16x32xf32>
    %180 = tpu.matmul %178, %179, %cst_86 {dimension_numbers = #tpu.dot_dimension_numbers<[1], [0], [0], [1], [0, 0, 1, 1], [], []>} : vector<16x32xf32>, vector<32x32xf32>, vector<16x32xf32> -> vector<16x32xf32>
    %c0_87 = arith.constant 0 : index
    %c0_88 = arith.constant 0 : index
    %181 = vector.load %arg22[%c0_87, %c0_88] : memref<1x32xf32, #tpu.memory_space<vmem>>, vector<1x32xf32>
    %182 = vector.broadcast %181 : vector<1x32xf32> to vector<16x32xf32>
    %183 = arith.addf %180, %182 : vector<16x32xf32>
    %184 = vector.shape_cast %183 : vector<16x32xf32> to vector<2x8x32xf32>
    %c0_89 = arith.constant 0 : index
    %c0_90 = arith.constant 0 : index
    %185 = vector.load %arg23[%c0_89, %c0_90] : memref<32x64xf32, #tpu.memory_space<vmem>>, vector<32x64xf32>
    %cst_91 = arith.constant dense<0.000000e+00> : vector<16x64xf32>
    %186 = tpu.matmul %122, %185, %cst_91 {dimension_numbers = #tpu.dot_dimension_numbers<[1], [0], [0], [1], [0, 0, 1, 1], [], []>} : vector<16x32xf32>, vector<32x64xf32>, vector<16x64xf32> -> vector<16x64xf32>
    %c0_92 = arith.constant 0 : index
    %c0_93 = arith.constant 0 : index
    %187 = vector.load %arg24[%c0_92, %c0_93] : memref<1x64xf32, #tpu.memory_space<vmem>>, vector<1x64xf32>
    %188 = vector.broadcast %187 : vector<1x64xf32> to vector<16x64xf32>
    %189 = arith.addf %186, %188 : vector<16x64xf32>
    %190 = vector.shape_cast %189 : vector<16x64xf32> to vector<2x8x64xf32>
    %191 = vector.extract_strided_slice %190 {offsets = [0, 0, 0], sizes = [2, 8, 32], strides = [1, 1, 1]} : vector<2x8x64xf32> to vector<2x8x32xf32>
    %192 = vector.extract_strided_slice %190 {offsets = [0, 0, 32], sizes = [2, 8, 32], strides = [1, 1, 1]} : vector<2x8x64xf32> to vector<2x8x32xf32>
    "tpu.trace_start"() <{level = 10 : i32, message = "bqh,bkh->bqk"}> : () -> ()
    %cst_94 = arith.constant dense<0.000000e+00> : vector<2x8x8xf32>
    %193 = tpu.matmul %184, %191, %cst_94 {dimension_numbers = #tpu.dot_dimension_numbers<[2], [2], [1], [1], [0, 0, 0, 1, 1, 1], [0], [0]>} : vector<2x8x32xf32>, vector<2x8x32xf32>, vector<2x8x8xf32> -> vector<2x8x8xf32>
    %cst_95 = arith.constant 3.200000e+01 : f32
    "tpu.trace_stop"() : () -> ()
    %194 = math.sqrt %cst_95 : f32
    %cst_96 = arith.constant 1.000000e+00 : f32
    %195 = arith.divf %cst_96, %194 : f32
    %196 = vector.broadcast %195 : f32 to vector<2x8x8xf32>
    %197 = arith.mulf %193, %196 : vector<2x8x8xf32>
    %cst_97 = arith.constant dense<0xFF800000> : vector<2x8xf32>
    %198 = vector.multi_reduction <maximumf>, %197, %cst_97 [2] : vector<2x8x8xf32> to vector<2x8xf32>
    %199 = vector.shape_cast %198 : vector<2x8xf32> to vector<2x8x1xf32>
    %200 = vector.broadcast %199 : vector<2x8x1xf32> to vector<2x8x8xf32>
    %201 = arith.subf %197, %200 : vector<2x8x8xf32>
    %202 = math.exp %201 : vector<2x8x8xf32>
    %cst_98 = arith.constant dense<0.000000e+00> : vector<2x8xf32>
    %203 = vector.multi_reduction <add>, %202, %cst_98 [2] : vector<2x8x8xf32> to vector<2x8xf32>
    %204 = vector.shape_cast %203 : vector<2x8xf32> to vector<2x8x1xf32>
    %205 = tpu.reciprocal %204 {approx = true} : vector<2x8x1xf32> -> vector<2x8x1xf32>
    %206 = vector.broadcast %205 : vector<2x8x1xf32> to vector<2x8x8xf32>
    %207 = arith.mulf %202, %206 : vector<2x8x8xf32>
    "tpu.trace_start"() <{level = 10 : i32, message = "bqk,bkh->bqh"}> : () -> ()
    %cst_99 = arith.constant dense<0.000000e+00> : vector<2x8x32xf32>
    %208 = tpu.matmul %207, %192, %cst_99 {dimension_numbers = #tpu.dot_dimension_numbers<[2], [1], [1], [2], [0, 0, 0, 1, 1, 2], [0], [0]>} : vector<2x8x8xf32>, vector<2x8x32xf32>, vector<2x8x32xf32> -> vector<2x8x32xf32>
    "tpu.trace_stop"() : () -> ()
    %209 = vector.shape_cast %208 : vector<2x8x32xf32> to vector<16x32xf32>
    %c0_100 = arith.constant 0 : index
    %c0_101 = arith.constant 0 : index
    %210 = vector.load %arg25[%c0_100, %c0_101] : memref<32x32xf32, #tpu.memory_space<vmem>>, vector<32x32xf32>
    %cst_102 = arith.constant dense<0.000000e+00> : vector<16x32xf32>
    %211 = tpu.matmul %209, %210, %cst_102 {dimension_numbers = #tpu.dot_dimension_numbers<[1], [0], [0], [1], [0, 0, 1, 1], [], []>} : vector<16x32xf32>, vector<32x32xf32>, vector<16x32xf32> -> vector<16x32xf32>
    %c0_103 = arith.constant 0 : index
    %c0_104 = arith.constant 0 : index
    %212 = vector.load %arg26[%c0_103, %c0_104] : memref<1x32xf32, #tpu.memory_space<vmem>>, vector<1x32xf32>
    %213 = vector.broadcast %212 : vector<1x32xf32> to vector<16x32xf32>
    %214 = arith.addf %211, %213 : vector<16x32xf32>
    %215 = arith.addf %178, %214 : vector<16x32xf32>
    %cst_105 = arith.constant dense<0.000000e+00> : vector<16xf32>
    %216 = vector.multi_reduction <add>, %215, %cst_105 [1] : vector<16x32xf32> to vector<16xf32>
    %217 = vector.shape_cast %216 : vector<16xf32> to vector<16x1xf32>
    %cst_106 = arith.constant 3.200000e+01 : f32
    %218 = vector.broadcast %cst_106 : f32 to vector<16x1xf32>
    %219 = arith.divf %217, %218 : vector<16x1xf32>
    %220 = vector.broadcast %219 : vector<16x1xf32> to vector<16x32xf32>
    %221 = arith.subf %215, %220 : vector<16x32xf32>
    %222 = arith.mulf %221, %221 : vector<16x32xf32>
    %cst_107 = arith.constant dense<0.000000e+00> : vector<16xf32>
    %223 = vector.multi_reduction <add>, %222, %cst_107 [1] : vector<16x32xf32> to vector<16xf32>
    %224 = vector.shape_cast %223 : vector<16xf32> to vector<16x1xf32>
    %cst_108 = arith.constant 3.200000e+01 : f32
    %225 = vector.broadcast %cst_108 : f32 to vector<16x1xf32>
    %226 = arith.divf %224, %225 : vector<16x1xf32>
    %227 = vector.broadcast %219 : vector<16x1xf32> to vector<16x32xf32>
    %228 = arith.subf %215, %227 : vector<16x32xf32>
    %cst_109 = arith.constant 9.99999974E-6 : f32
    %229 = vector.broadcast %cst_109 : f32 to vector<16x1xf32>
    %230 = arith.addf %226, %229 : vector<16x1xf32>
    %231 = math.rsqrt %230 : vector<16x1xf32>
    %232 = vector.broadcast %231 : vector<16x1xf32> to vector<16x32xf32>
    %233 = arith.mulf %228, %232 : vector<16x32xf32>
    %c0_110 = arith.constant 0 : index
    %c0_111 = arith.constant 0 : index
    %234 = vector.load %arg29[%c0_110, %c0_111] : memref<1x32xf32, #tpu.memory_space<vmem>>, vector<1x32xf32>
    %235 = vector.broadcast %234 : vector<1x32xf32> to vector<16x32xf32>
    %236 = arith.mulf %233, %235 : vector<16x32xf32>
    %c0_112 = arith.constant 0 : index
    %c0_113 = arith.constant 0 : index
    %237 = vector.load %arg30[%c0_112, %c0_113] : memref<1x32xf32, #tpu.memory_space<vmem>>, vector<1x32xf32>
    %238 = vector.broadcast %237 : vector<1x32xf32> to vector<16x32xf32>
    %239 = arith.addf %236, %238 : vector<16x32xf32>
    %c0_114 = arith.constant 0 : index
    %c0_115 = arith.constant 0 : index
    %240 = vector.load %arg33[%c0_114, %c0_115] : memref<32x2048xf32, #tpu.memory_space<vmem>>, vector<32x2048xf32>
    %cst_116 = arith.constant dense<0.000000e+00> : vector<16x2048xf32>
    %241 = tpu.matmul %239, %240, %cst_116 {dimension_numbers = #tpu.dot_dimension_numbers<[1], [0], [0], [1], [0, 0, 1, 1], [], []>} : vector<16x32xf32>, vector<32x2048xf32>, vector<16x2048xf32> -> vector<16x2048xf32>
    %c0_117 = arith.constant 0 : index
    %c0_118 = arith.constant 0 : index
    %242 = vector.load %arg34[%c0_117, %c0_118] : memref<1x2048xf32, #tpu.memory_space<vmem>>, vector<1x2048xf32>
    %243 = vector.broadcast %242 : vector<1x2048xf32> to vector<16x2048xf32>
    %244 = arith.addf %241, %243 : vector<16x2048xf32>
    %cst_119 = arith.constant 0.000000e+00 : f32
    %245 = vector.broadcast %cst_119 : f32 to vector<16x2048xf32>
    %246 = arith.maximumf %244, %245 : vector<16x2048xf32>
    %c0_120 = arith.constant 0 : index
    %c0_121 = arith.constant 0 : index
    %247 = vector.load %arg35[%c0_120, %c0_121] : memref<2048x32xf32, #tpu.memory_space<vmem>>, vector<2048x32xf32>
    %cst_122 = arith.constant dense<0.000000e+00> : vector<16x32xf32>
    %248 = tpu.matmul %246, %247, %cst_122 {dimension_numbers = #tpu.dot_dimension_numbers<[1], [0], [0], [1], [0, 0, 1, 1], [], []>} : vector<16x2048xf32>, vector<2048x32xf32>, vector<16x32xf32> -> vector<16x32xf32>
    %c0_123 = arith.constant 0 : index
    %c0_124 = arith.constant 0 : index
    %249 = vector.load %arg36[%c0_123, %c0_124] : memref<1x32xf32, #tpu.memory_space<vmem>>, vector<1x32xf32>
    %250 = vector.broadcast %249 : vector<1x32xf32> to vector<16x32xf32>
    %251 = arith.addf %248, %250 : vector<16x32xf32>
    %252 = arith.addf %239, %251 : vector<16x32xf32>
    %cst_125 = arith.constant dense<0.000000e+00> : vector<16xf32>
    %253 = vector.multi_reduction <add>, %252, %cst_125 [1] : vector<16x32xf32> to vector<16xf32>
    %254 = vector.shape_cast %253 : vector<16xf32> to vector<16x1xf32>
    %cst_126 = arith.constant 3.200000e+01 : f32
    %255 = vector.broadcast %cst_126 : f32 to vector<16x1xf32>
    %256 = arith.divf %254, %255 : vector<16x1xf32>
    %257 = vector.broadcast %256 : vector<16x1xf32> to vector<16x32xf32>
    %258 = arith.subf %252, %257 : vector<16x32xf32>
    %259 = arith.mulf %258, %258 : vector<16x32xf32>
    %cst_127 = arith.constant dense<0.000000e+00> : vector<16xf32>
    %260 = vector.multi_reduction <add>, %259, %cst_127 [1] : vector<16x32xf32> to vector<16xf32>
    %261 = vector.shape_cast %260 : vector<16xf32> to vector<16x1xf32>
    %cst_128 = arith.constant 3.200000e+01 : f32
    %262 = vector.broadcast %cst_128 : f32 to vector<16x1xf32>
    %263 = arith.divf %261, %262 : vector<16x1xf32>
    %264 = vector.broadcast %256 : vector<16x1xf32> to vector<16x32xf32>
    %265 = arith.subf %252, %264 : vector<16x32xf32>
    %cst_129 = arith.constant 9.99999974E-6 : f32
    %266 = vector.broadcast %cst_129 : f32 to vector<16x1xf32>
    %267 = arith.addf %263, %266 : vector<16x1xf32>
    %268 = math.rsqrt %267 : vector<16x1xf32>
    %269 = vector.broadcast %268 : vector<16x1xf32> to vector<16x32xf32>
    %270 = arith.mulf %265, %269 : vector<16x32xf32>
    %c0_130 = arith.constant 0 : index
    %c0_131 = arith.constant 0 : index
    %271 = vector.load %arg31[%c0_130, %c0_131] : memref<1x32xf32, #tpu.memory_space<vmem>>, vector<1x32xf32>
    %272 = vector.broadcast %271 : vector<1x32xf32> to vector<16x32xf32>
    %273 = arith.mulf %270, %272 : vector<16x32xf32>
    %c0_132 = arith.constant 0 : index
    %c0_133 = arith.constant 0 : index
    %274 = vector.load %arg32[%c0_132, %c0_133] : memref<1x32xf32, #tpu.memory_space<vmem>>, vector<1x32xf32>
    %275 = vector.broadcast %274 : vector<1x32xf32> to vector<16x32xf32>
    %276 = arith.addf %273, %275 : vector<16x32xf32>
    %cst_134 = arith.constant dense<0.000000e+00> : vector<16xf32>
    %277 = vector.multi_reduction <add>, %276, %cst_134 [1] : vector<16x32xf32> to vector<16xf32>
    %278 = vector.shape_cast %277 : vector<16xf32> to vector<16x1xf32>
    %cst_135 = arith.constant 3.200000e+01 : f32
    %279 = vector.broadcast %cst_135 : f32 to vector<16x1xf32>
    %280 = arith.divf %278, %279 : vector<16x1xf32>
    %281 = vector.broadcast %280 : vector<16x1xf32> to vector<16x32xf32>
    %282 = arith.subf %276, %281 : vector<16x32xf32>
    %283 = arith.mulf %282, %282 : vector<16x32xf32>
    %cst_136 = arith.constant dense<0.000000e+00> : vector<16xf32>
    %284 = vector.multi_reduction <add>, %283, %cst_136 [1] : vector<16x32xf32> to vector<16xf32>
    %285 = vector.shape_cast %284 : vector<16xf32> to vector<16x1xf32>
    %cst_137 = arith.constant 3.200000e+01 : f32
    %286 = vector.broadcast %cst_137 : f32 to vector<16x1xf32>
    %287 = arith.divf %285, %286 : vector<16x1xf32>
    %288 = vector.broadcast %280 : vector<16x1xf32> to vector<16x32xf32>
    %289 = arith.subf %276, %288 : vector<16x32xf32>
    %cst_138 = arith.constant 9.99999974E-6 : f32
    %290 = vector.broadcast %cst_138 : f32 to vector<16x1xf32>
    %291 = arith.addf %287, %290 : vector<16x1xf32>
    %292 = math.rsqrt %291 : vector<16x1xf32>
    %293 = vector.broadcast %292 : vector<16x1xf32> to vector<16x32xf32>
    %294 = arith.mulf %289, %293 : vector<16x32xf32>
    %c0_139 = arith.constant 0 : index
    %c0_140 = arith.constant 0 : index
    %295 = vector.load %arg37[%c0_139, %c0_140] : memref<1x32xf32, #tpu.memory_space<vmem>>, vector<1x32xf32>
    %296 = vector.broadcast %295 : vector<1x32xf32> to vector<16x32xf32>
    %297 = arith.mulf %294, %296 : vector<16x32xf32>
    %c0_141 = arith.constant 0 : index
    %c0_142 = arith.constant 0 : index
    %298 = vector.load %arg38[%c0_141, %c0_142] : memref<1x32xf32, #tpu.memory_space<vmem>>, vector<1x32xf32>
    %299 = vector.broadcast %298 : vector<1x32xf32> to vector<16x32xf32>
    %300 = arith.addf %297, %299 : vector<16x32xf32>
    %301 = vector.shape_cast %300 : vector<16x32xf32> to vector<2x8x32xf32>
    %cst_143 = arith.constant dense<0.000000e+00> : vector<2x32xf32>
    %302 = vector.multi_reduction <add>, %301, %cst_143 [1] : vector<2x8x32xf32> to vector<2x32xf32>
    %cst_144 = arith.constant 8.000000e+00 : f32
    %303 = vector.broadcast %cst_144 : f32 to vector<2x32xf32>
    %304 = arith.divf %302, %303 : vector<2x32xf32>
    %c0_145 = arith.constant 0 : index
    %c0_146 = arith.constant 0 : index
    %305 = vector.load %arg39[%c0_145, %c0_146] : memref<32x4xf32, #tpu.memory_space<vmem>>, vector<32x4xf32>
    %cst_147 = arith.constant dense<0.000000e+00> : vector<2x4xf32>
    %306 = tpu.matmul %304, %305, %cst_147 {dimension_numbers = #tpu.dot_dimension_numbers<[1], [0], [0], [1], [0, 0, 1, 1], [], []>} : vector<2x32xf32>, vector<32x4xf32>, vector<2x4xf32> -> vector<2x4xf32>
    %c0_148 = arith.constant 0 : index
    %c0_149 = arith.constant 0 : index
    %307 = vector.load %arg40[%c0_148, %c0_149] : memref<1x4xf32, #tpu.memory_space<vmem>>, vector<1x4xf32>
    %308 = vector.broadcast %307 : vector<1x4xf32> to vector<2x4xf32>
    %309 = arith.addf %306, %308 : vector<2x4xf32>
    %c0_150 = arith.constant 0 : index
    %c0_151 = arith.constant 0 : index
    %310 = vector.load %arg41[%c0_150, %c0_151] : memref<2x4xf32, #tpu.memory_space<vmem>>, vector<2x4xf32>
    tpu.vector_store %arg41[%c0_150, %c0_151], %309 {strides = array<i32>} : memref<2x4xf32, #tpu.memory_space<vmem>>, vector<2x4xf32>,
    return
  }
}

</mosaic_0001>

<bundles_post_ra>
// kernel: tpu_custom_call.1
= control target key start
LH: loop header
LB: loop body
LE: loop exit
PB: predicated region body
PF: predicated region fallthrough
CT: control target
= control target key end

     0   :  { %s7461_s6 = smov 1   ;;  %s7462_s10 = smov 2   ;;  %s8966_s0 = inlined_call_operand.smem [shape: u32[42], index: -1, kind: input, shape index: {}] }
   0x1   :  { %s7516_s5 = sld [smem:[%s8966_s0]]   ;;  %s7463_s14 = smov 3  }
   0x2   :  { %s7521_s9 = sld [smem:[%s8966_s0 + %s7461_s6]]   ;;  %s7464_s18 = smov 4  }
   0x3   :  { %s7526_s13 = sld [smem:[%s8966_s0 + %s7462_s10]]   ;;  %s7465_s22 = smov 5  }
   0x4   :  { %s7531_s17 = sld [smem:[%s8966_s0 + %s7463_s14]]   ;;  %s7466_s26 = smov 6  }
   0x5   :  { %s7536_s21 = sld [smem:[%s8966_s0 + %s7464_s18]]   ;;  %s7467_s30 = smov 7  }
   0x6   :  { %s7541_s25 = sld [smem:[%s8966_s0 + %s7465_s22]]   ;;  %s7468_s4 = smov 8  }
   0x7   :  { %s7546_s29 = sld [smem:[%s8966_s0 + %s7466_s26]]   ;;  %s7469_s10 = smov 9  }
   0x8   :  { %s7551_s3 = sld [smem:[%s8966_s0 + %s7467_s30]]   ;;  %s7470_s15 = smov 10  }
   0x9   :  { %s7556_s8 = sld [smem:[%s8966_s0 + %s7468_s4]]   ;;  %s7471_s20 = smov 11  }
   0xa   :  { %s7561_s14 = sld [smem:[%s8966_s0 + %s7469_s10]]   ;;  %s7472_s26 = smov 12  }
   0xb   :  { %s7566_s19 = sld [smem:[%s8966_s0 + %s7470_s15]]   ;;  %s7473_s1 = smov 13  }
   0xc   :  { %s7571_s24 = sld [smem:[%s8966_s0 + %s7471_s20]]   ;;  %s7474_s7 = smov 14  }
   0xd   :  { %s7576_s30 = sld [smem:[%s8966_s0 + %s7472_s26]]   ;;  %s7475_s15 = smov 15  }
   0xe   :  { %s7581_s6 = sld [smem:[%s8966_s0 + %s7473_s1]]   ;;  %s7476_s22 = smov 16  }
   0xf   :  { %s7586_s12 = sld [smem:[%s8966_s0 + %s7474_s7]]   ;;  %s7477_s28 = smov 17  }
  0x10   :  { %8977 = sst [smem:[#allocation5_spill]] %s7561_s14  ;;  %s7478_s7 = smov 18  }
  0x11   :  { %8978 = sst [smem:[#allocation6_spill]] %s7566_s19 }
  0x12   :  { %s7591_s20 = sld [smem:[%s8966_s0 + %s7475_s15]]   ;;  %s7479_s15 = smov 19  }
  0x13   :  { %s7596_s27 = sld [smem:[%s8966_s0 + %s7476_s22]]   ;;  %s7480_s22 = smov 20  }
  0x14   :  { %s7601_s4 = sld [smem:[%s8966_s0 + %s7477_s28]]   ;;  %s7481_s28 = smov 21  }
  0x15   :  { %s7606_s19 = sld [smem:[%s8966_s0 + %s7478_s7]]   ;;  %s7482_s7 = smov 22  }
  0x16   :  { %s7621_s14 = sld [smem:[%s8966_s0 + %s7481_s28]]   ;;  %s7485_s28 = smov 25  }
  0x18   :  { %8979 = sst [smem:[#allocation7_spill]] %s7591_s20 }
  0x19   :  { %8980 = sst [smem:[#allocation8_spill]] %s7596_s27 }
  0x1a   :  { %s7611_s20 = sld [smem:[%s8966_s0 + %s7479_s15]]   ;;  %s7483_s15 = smov 23  }
  0x1b   :  { %8981 = sst [smem:[#allocation9_spill]] %s7606_s19 }
  0x1c   :  { %s7616_s27 = sld [smem:[%s8966_s0 + %s7480_s22]]   ;;  %s7484_s22 = smov 24  }
  0x1d   :  { %8984 = sst [smem:[#allocation12_spill]] %s7621_s14 }
  0x1e   :  { %s7626_s19 = sld [smem:[%s8966_s0 + %s7482_s7]]   ;;  %s7486_s7 = smov 26  }
  0x1f   :  { %s7641_s14 = sld [smem:[%s8966_s0 + %s7485_s28]]   ;;  %s7489_s28 = smov 29  }
  0x20   :  { %8982 = sst [smem:[#allocation10_spill]] %s7611_s20 }
  0x21   :  { %s7631_s20 = sld [smem:[%s8966_s0 + %s7483_s15]]   ;;  %s7487_s15 = smov 27  }
  0x22   :  { %8983 = sst [smem:[#allocation11_spill]] %s7616_s27 }
  0x23   :  { %s7636_s27 = sld [smem:[%s8966_s0 + %s7484_s22]]   ;;  %s7488_s22 = smov 28  }
  0x24   :  { %8985 = sst [smem:[#allocation13_spill]] %s7626_s19 }
  0x25   :  { %8988 = sst [smem:[#allocation16_spill]] %s7641_s14 }
  0x26   :  { %s7646_s19 = sld [smem:[%s8966_s0 + %s7486_s7]]   ;;  %s7490_s7 = smov 30  }
  0x27   :  { %8986 = sst [smem:[#allocation14_spill]] %s7631_s20 }
  0x28   :  { %s7651_s20 = sld [smem:[%s8966_s0 + %s7487_s15]]   ;;  %s7491_s15 = smov 31  }
  0x29   :  { %8987 = sst [smem:[#allocation15_spill]] %s7636_s27 }
  0x2a   :  { %s7656_s27 = sld [smem:[%s8966_s0 + %s7488_s22]]   ;;  %s7492_s22 = smov 32  }
  0x2b   :  { %s7661_s14 = sld [smem:[%s8966_s0 + %s7489_s28]]   ;;  %s7493_s28 = smov 33  }
  0x2c   :  { %8989 = sst [smem:[#allocation17_spill]] %s7646_s19 }
  0x2d   :  { %s7666_s19 = sld [smem:[%s8966_s0 + %s7490_s7]]   ;;  %s7494_s7 = smov 34  }
  0x2e   :  { %8990 = sst [smem:[#allocation18_spill]] %s7651_s20 }
  0x2f   :  { %s7671_s20 = sld [smem:[%s8966_s0 + %s7491_s15]]   ;;  %s7495_s15 = smov 35  }
  0x30   :  { %8991 = sst [smem:[#allocation19_spill]] %s7656_s27 }
  0x31   :  { %8992 = sst [smem:[#allocation20_spill]] %s7661_s14 }
  0x32   :  { %s7676_s27 = sld [smem:[%s8966_s0 + %s7492_s22]]   ;;  %s7496_s22 = smov 36  }
  0x33   :  { %8993 = sst [smem:[#allocation21_spill]] %s7666_s19 }
  0x34   :  { %s7681_s14 = sld [smem:[%s8966_s0 + %s7493_s28]]   ;;  %s7497_s28 = smov 37  }
  0x35   :  { %8994 = sst [smem:[#allocation22_spill]] %s7671_s20 }
  0x36   :  { %s7686_s19 = sld [smem:[%s8966_s0 + %s7494_s7]]   ;;  %s7498_s7 = smov 38  }
  0x37   :  { %s7691_s20 = sld [smem:[%s8966_s0 + %s7495_s15]]   ;;  %s7499_s15 = smov 39  }
  0x38   :  { %8995 = sst [smem:[#allocation23_spill]] %s7676_s27 }
  0x39   :  { %s7696_s27 = sld [smem:[%s8966_s0 + %s7496_s22]]   ;;  %s7500_s22 = smov 40  }
  0x3a   :  { %8996 = sst [smem:[#allocation24_spill]] %s7681_s14 }
  0x3b   :  { %s7701_s14 = sld [smem:[%s8966_s0 + %s7497_s28]]   ;;  %s7501_s28 = smov 41  }
  0x3c   :  { %8997 = sst [smem:[#allocation25_spill]] %s7686_s19 }
  0x3d   :  { %8998 = sst [smem:[#allocation26_spill]] %s7691_s20 }
  0x3e   :  { %s7706_s19 = sld [smem:[%s8966_s0 + %s7498_s7]]  }
  0x3f   :  { %8999 = sst [smem:[#allocation27_spill]] %s7696_s27 }
  0x40   :  { %s7711_s20 = sld [smem:[%s8966_s0 + %s7499_s15]]  }
  0x41   :  { %9000 = sst [smem:[#allocation28_spill]] %s7701_s14 }
  0x42   :  { %s7716_s27 = sld [smem:[%s8966_s0 + %s7500_s22]]  }
  0x43   :  { %s7721_s14 = sld [smem:[%s8966_s0 + %s7501_s28]]  }
  0x44   :  { %v173_v0 = vld [vmem:[%s7521_s9] sm:$0xff]  ;;  %v174_v1 = vld [vmem:[%s7521_s9 + $0x8] sm:$0xff]  ;;  %vm182_vm0 = vcmask 130048  }
  0x45   :  { %v171_v2 = vld [vmem:[%s7516_s5] sm:$0xff]  ;;  %v6632_v3 = vpack.c.bf16 %v174_v1, %v173_v0  ;;  %v265_v5 = vld [vmem:[%s7531_s17 + $0x8] sm:$0xff] }
  0x46   :  { %6481 = vmatprep.mubr.msk.f32.mxu0 %vm182_vm0, %v171_v2  ;;  %v264_v4 = vld [vmem:[%s7531_s17] sm:$0xff] }
  0x47   :  { %v6636_v6 = vpack.c.bf16 %v265_v5, %v264_v4 }
  0x48   :  { %88 = vsyncpa [#allocation3], 0  ;;  %6633 = vmatprep.subr.bf16.mxu0 %v6632_v3  ;;  %v172_v7 = vld [vmem:[%s7516_s5 + $0x8] sm:$0xff]  ;;  %v266_v8 = vld [vmem:[%s7531_s17 + $0x10] sm:$0xff]  ;;  %vm275_vm1 = vcmask 261120   ;;  %v8974_v16 = vmov 0.0  }
  0x49   :  { %6635 = vmatpush3.bf16.msra.mxu0 %v6632_v3  ;;  %6637 = vmatprep.subr.bf16.mxu1 %v6636_v6  ;;  %v267_v9 = vld [vmem:[%s7531_s17 + $0x18] sm:$0xff]  ;;  %v5702_v11 = vld [vmem:[%s7526_s13] ss:$0 sm:$0xff]  ;;  %vm7503_vm2 = vmmov 0   ;;  %s7504_s0 = smov 96   ;;  %vm513_vm3 = vcmask 64512  }
  0x4a   :  { %6639 = vmatpush3.bf16.msra.mxu1 %v6636_v6  ;;  %v6640_v10 = vpack.c.bf16 %v267_v9, %v266_v8  ;;  %6495 = vmatprep.subr.mxu0 %v8974_v16  ;;  %v5705_v17 = vld [vmem:[%s7536_s21] ss:$0 sm:$0xff]  ;;  %s7505_s5 = smov 64   ;;  %v689_v44 = vld [vmem:[%s7541_s25 + $0x8] sm:$0xff]  ;;  %v690_v53 = vld [vmem:[%s7541_s25 + $0x10] sm:$0xff]  ;;  %s9003_s9 = sld [smem:[#allocation9_spill]] }
  0x4b   :  { %v688_v43 = vld [vmem:[%s7541_s25] sm:$0xff]  ;;  %v691_v54 = vld [vmem:[%s7541_s25 + $0x18] sm:$0xff]  ;;  %s9005_s13 = sld [smem:[#allocation10_spill]]  ;;  %s9006_s17 = sld [smem:[#allocation5_spill]]  ;;  %vm5571_vm4 = vcmask 1041409   ;;  %vm5645_vm5 = vcmask 25600  }
  0x4c   :  { %6482 = vmatmul.mubr.msk.f32.vlgmr.msra.gmra.mrb[0].mxu0 %vm182_vm0, %v172_v7  ;;  %6641 = vmatprep.subr.bf16.mxu1 %v6640_v10  ;;  %v6644_v45 = vpack.c.bf16 %v689_v44, %v688_v43  ;;  %v6648_v55 = vpack.c.bf16 %v691_v54, %v690_v53  ;;  %v5714_v60 = vld [vmem:[%s7546_s29] ss:$0 sm:$0xff]  ;;  %v848_v43 = vld [vmem:[%s7571_s24 + $0xa8] sm:$0xff]  ;;  %v834_v44 = vld [vmem:[%s7571_s24 + $0x38] sm:$0xff]  ;;  %s9007_s21 = sld [smem:[#allocation6_spill]]  ;;  %s9008_s25 = sld [smem:[#allocation11_spill]] }
  0x4d   :  { %6497 = vmatprep.mubr.msk.f32.mxu0 %vm7503_vm2, %v8974_v16  ;;  %s9009_s29 = sld [smem:[#allocation14_spill]]  ;;  %s9017_s7 = sld [smem:[#allocation16_spill]] }
  0x4e   :  { %6643 = vmatpush3.bf16.msra.mxu1 %v6640_v10  ;;  %s9018_s10 = sld [smem:[#allocation17_spill]]  ;;  %s9019_s11 = sld [smem:[#allocation24_spill]] }
  0x4f   :  { %6505 = vmatprep.subr.mxu1 %v8974_v16  ;;  %s9020_s15 = sld [smem:[#allocation20_spill]]  ;;  %s9021_s16 = sld [smem:[#allocation21_spill]] }
  0x50   :  { %s9022_s18 = sld [smem:[#allocation26_spill]]  ;;  %s9023_s22 = sld [smem:[#allocation25_spill]] }
  0x51   :  { %s9024_s23 = sld [smem:[#allocation27_spill]]  ;;  %s9025_s26 = sld [smem:[#allocation22_spill]] }
  0x52   :  { %s9026_s28 = sld [smem:[#allocation23_spill]]  ;;  %s9027_s1 = sld [smem:[#allocation28_spill]] }
 0x11f   :  { %v6483_v12 = vpop.f32.mrb[0].mxu0 }
 0x120   :  { %v255_v13 = vpop.f32.mrb[1].mxu0  ;;  %v7734_v15 = vadd.f32 %v6483_v12, %v5702_v11 }
 0x121   :  { %v7732_v14 = vadd.f32 %v5702_v11, %v255_v13 }
 0x123   :  { %6492 = vmatprep.mubr.msk.f32.mxu1 %vm275_vm1, %v7732_v14 }
 0x124   :  { %6493 = vmatmul.mubr.msk.f32.vlgmr.msra.gmra.mrb[0].mxu1 %vm275_vm1, %v7734_v15 }
 0x125   :  { %6507 = vmatprep.mubr.msk.f32.mxu1 %vm7503_vm2, %v8974_v16 }
 0x1f7   :  { %v6494_v18 = vpop.f32.mrb[0].mxu1 }
 0x1f8   :  { %v348_v19 = vpop.f32.mrb[1].mxu1  ;;  %v354_v21 = vadd.f32 %v6494_v18, %v5705_v17  ;;  %v828_v18 = vld [vmem:[%s7571_s24 + $0x8] sm:$0xff] }
 0x1f9   :  { %v349_v20 = vadd.f32 %v5705_v17, %v348_v19  ;;  %v844_v19 = vld [vmem:[%s7571_s24 + $0x88] sm:$0xff] }
 0x1fb   :  { %358 = vrot.lane.b32.xlu0 %v349_v20, %s7504_s0 }
 0x1ff   :  { %435 = vrot.lane.b32.xlu0 %v354_v21, %s7504_s0 }
 0x26d   :  { %v359_v22 = vpop.permute.xlu0 %358 }
 0x26e   :  { %6496 = vmatpush3.xpose.msk.msra.mxu0 %vm275_vm1, %v359_v22  ;;  %v846_v22 = vld [vmem:[%s7571_s24 + $0x98] sm:$0xff] }
 0x26f   :  { %6500 = vmatprep.subr.mxu0 %v8974_v16 }
 0x271   :  { %6498 = vmatmul.mubr.msk.f32.vlgmr.msra.gmra.mrb[2].mxu0 %vm275_vm1, %v349_v20  ;;  %v436_v23 = vpop.permute.xlu0 %435 }
 0x272   :  { %6501 = vmatpush3.xpose.msk.msra.mxu0 %vm275_vm1, %v436_v23  ;;  %6502 = vmatprep.mubr.msk.f32.mxu0 %vm7503_vm2, %v8974_v16  ;;  %v827_v23 = vld [vmem:[%s7571_s24] sm:$0xff] }
 0x273   :  { %6510 = vmatprep.subr.mxu0 %v8974_v16 }
 0x275   :  { %6503 = vmatmul.mubr.msk.f32.vlgmr.msra.gmra.mrb[4].mxu0 %vm275_vm1, %v354_v21 }
 0x276   :  { %6512 = vmatprep.mubr.msk.f32.mxu0 %vm7503_vm2, %v8974_v16 }
 0x344   :  { %v430_v24 = vpop.f32.mrb[2].mxu0 }
 0x345   :  { %v511_v25 = vmul.f32 0.17677669, %v430_v24  ;;  %v6499_v26 = vpop.f32.mrb[3].mxu0  ;;  %v843_v24 = vld [vmem:[%s7571_s24 + $0x80] sm:$0xff] }
 0x346   :  { %v6654_v26 = vpack.c.bf16 %v843_v24, %v827_v23  ;;  %v835_v24 = vld [vmem:[%s7571_s24 + $0x40] sm:$0xff] }
 0x347   :  { %v514_v27 = vsel %vm513_vm3, %v511_v25, -inf }
 0x348   :  { %515 = vmax.xlane.f32.xlu1 %v514_v27  ;;  %v507_v28 = vpop.f32.mrb[4].mxu0  ;;  %v829_v27 = vld [vmem:[%s7571_s24 + $0x10] sm:$0xff] }
 0x349   :  { %v512_v29 = vmul.f32 0.17677669, %v507_v28  ;;  %v6504_v30 = vpop.f32.mrb[5].mxu0  ;;  %v845_v28 = vld [vmem:[%s7571_s24 + $0x90] sm:$0xff] }
 0x34a   :  { %v860_v30 = vld [vmem:[%s7571_s24 + $0x108] sm:$0xff] }
 0x34b   :  { %v517_v31 = vsel %vm513_vm3, %v512_v29, -inf }
 0x34c   :  { %518 = vmax.xlane.f32.xlu1 %v517_v31  ;;  %v876_v31 = vld [vmem:[%s7571_s24 + $0x188] sm:$0xff] }
 0x35d   :  { %536 = vrot.lane.b32.xlu1 %v349_v20, %s7505_s5  ;;  %v830_v20 = vld [vmem:[%s7571_s24 + $0x18] sm:$0xff] }
 0x3d5   :  { %v516_v32 = vpop.xlane.xlu1 %515 }
 0x3d6   :  { %v520_v33 = vsub.f32 %v511_v25, %v516_v32  ;;  %v6660_v25 = vpack.c.bf16 %v846_v22, %v830_v20  ;;  %v862_v32 = vld [vmem:[%s7571_s24 + $0x118] sm:$0xff]  ;;  %v852_v20 = vld [vmem:[%s7571_s24 + $0xc8] sm:$0xff] }
 0x3d8   :  { %v522_v34 = vmul.f32 1.442695, %v520_v33  ;;  %v6656_v33 = vpack.c.bf16 %v876_v31, %v860_v30  ;;  %v868_v31 = vld [vmem:[%s7571_s24 + $0x148] sm:$0xff] }
 0x3d9   :  { %v519_v35 = vpop.xlane.xlu1 %518 }
 0x3da   :  { %7385 = vpow2.f32 %v522_v34  ;;  %v521_v36 = vsub.f32 %v512_v29, %v519_v35  ;;  %v6662_v29 = vpack.c.bf16 %v845_v28, %v829_v27  ;;  %v878_v34 = vld [vmem:[%s7571_s24 + $0x198] sm:$0xff]  ;;  %v859_v35 = vld [vmem:[%s7571_s24 + $0x100] sm:$0xff]  ;;  %v837_v27 = vld [vmem:[%s7571_s24 + $0x50] sm:$0xff] }
 0x3db   :  { %v853_v28 = vld [vmem:[%s7571_s24 + $0xd0] sm:$0xff] }
 0x3dc   :  { %v524_v37 = vmul.f32 1.442695, %v521_v36  ;;  %v875_v36 = vld [vmem:[%s7571_s24 + $0x180] sm:$0xff] }
 0x3dd   :  { %v537_v38 = vpop.permute.xlu1 %536 }
 0x3de   :  { %7387 = vpow2.f32 %v524_v37  ;;  %6506 = vmatpush3.msra.mxu1 %v537_v38  ;;  %v6664_v37 = vpack.c.bf16 %v878_v34, %v862_v32  ;;  %v6658_v38 = vpack.c.bf16 %v875_v36, %v859_v35  ;;  %v884_v32 = vld [vmem:[%s7571_s24 + $0x1c8] sm:$0xff]  ;;  %v886_v34 = vld [vmem:[%s7571_s24 + $0x1d8] sm:$0xff]  ;;  %v6694_v36 = vpack.c.bf16 %v853_v28, %v837_v27 }
 0x3df   :  { %6645 = vmatprep.subr.bf16.mxu1 %v6644_v45  ;;  %v1632_v27 = vld [vmem:[%s7581_s6 + $0x18] sm:$0xff] }
 0x3e4   :  { %v7386_v39 = vpop.eup %7385 }
 0x3e5   :  { %v526_v40 = vsel %vm513_vm3, %v7386_v39, 0.0 }
 0x3e6   :  { %527 = vadd.xlane.f32.xlu0 %v526_v40  ;;  %v877_v40 = vld [vmem:[%s7571_s24 + $0x190] sm:$0xff] }
 0x3e8   :  { %v7388_v41 = vpop.eup %7387 }
 0x3e9   :  { %v529_v42 = vsel %vm513_vm3, %v7388_v41, 0.0 }
 0x3ea   :  { %530 = vadd.xlane.f32.xlu1 %v529_v42  ;;  %v832_v42 = vld [vmem:[%s7571_s24 + $0x28] sm:$0xff] }
 0x3fb   :  { %612 = vrot.lane.b32.xlu1 %v354_v21, %s7505_s5  ;;  %v6652_v21 = vpack.c.bf16 %v844_v19, %v828_v18  ;;  %v836_v18 = vld [vmem:[%s7571_s24 + $0x48] sm:$0xff] }
 0x473   :  { %v528_v46 = vpop.xlane.xlu0 %527 }
 0x474   :  { %7389 = vrcp.f32 %v528_v46  ;;  %v850_v46 = vld [vmem:[%s7571_s24 + $0xb8] sm:$0xff] }
 0x477   :  { %v531_v47 = vpop.xlane.xlu1 %530 }
 0x478   :  { %7391 = vrcp.f32 %v531_v47  ;;  %v6676_v47 = vpack.c.bf16 %v850_v46, %v834_v44  ;;  %v856_v44 = vld [vmem:[%s7571_s24 + $0xe8] sm:$0xff]  ;;  %v858_v46 = vld [vmem:[%s7571_s24 + $0xf8] sm:$0xff] }
 0x47b   :  { %v613_v48 = vpop.permute.xlu1 %612 }
 0x47c   :  { %6511 = vmatpush3.msra.mxu0 %v613_v48 }
 0x47d   :  { %6653 = vmatprep.subr.bf16.mxu0 %v6652_v21  ;;  %v838_v21 = vld [vmem:[%s7571_s24 + $0x58] sm:$0xff] }
 0x47e   :  { %v7390_v49 = vpop.eup %7389 }
 0x47f   :  { %v534_v50 = vmul.f32 %v7390_v49, %v7386_v39  ;;  %v861_v39 = vld [vmem:[%s7571_s24 + $0x110] sm:$0xff] }
 0x481   :  { %6508 = vmatmul.mubr.msk.f32.vlgmr.msra.gmra.mrb[2].mxu1 %vm513_vm3, %v534_v50 }
 0x482   :  { %v7392_v51 = vpop.eup %7391  ;;  %6647 = vmatpush3.bf16.msra.mxu1 %v6644_v45  ;;  %v6668_v45 = vpack.c.bf16 %v848_v43, %v832_v42  ;;  %v840_v43 = vld [vmem:[%s7571_s24 + $0x68] sm:$0xff] }
 0x483   :  { %v535_v52 = vmul.f32 %v7392_v51, %v7388_v41  ;;  %6649 = vmatprep.subr.bf16.mxu1 %v6648_v55  ;;  %v6666_v41 = vpack.c.bf16 %v877_v40, %v861_v39  ;;  %v869_v39 = vld [vmem:[%s7571_s24 + $0x150] sm:$0xff] }
 0x484   :  { %v885_v40 = vld [vmem:[%s7571_s24 + $0x1d0] sm:$0xff] }
 0x485   :  { %6513 = vmatmul.mubr.msk.f32.vlgmr.msra.gmra.mrb[6].mxu0 %vm513_vm3, %v535_v52 }
 0x486   :  { %1045 = vmatprep.mubr.f32.mxu0 %v8974_v16  ;;  %6651 = vmatpush3.bf16.msra.mxu1 %v6648_v55  ;;  %v5717_v55 = vld [vmem:[%s7551_s3] ss:$0 sm:$0xff]  ;;  %s9010_s3 = sld [smem:[#allocation7_spill]] }
 0x487   :  { %6661 = vmatprep.subr.bf16.mxu1 %v6660_v25  ;;  %6655 = vmatpush1.bf16.msra.mxu0 %v6654_v26  ;;  %v851_v26 = vld [vmem:[%s7571_s24 + $0xc0] sm:$0xff] }
 0x488   :  { %6657 = vmatprep.subr.bf16.mxu0 %v6656_v33  ;;  %v870_v33 = vld [vmem:[%s7571_s24 + $0x158] sm:$0xff]  ;;  %v6686_v35 = vpack.c.bf16 %v851_v26, %v835_v24  ;;  %v1631_v26 = vld [vmem:[%s7581_s6 + $0x10] sm:$0xff] }
 0x489   :  { %v6696_v42 = vpack.c.bf16 %v886_v34, %v870_v33  ;;  %v1650_v33 = vld [vmem:[%s7581_s6 + $0xa8] sm:$0xff]  ;;  %v1681_v34 = vld [vmem:[%s7581_s6 + $0x1a0] sm:$0xff] }
 0x48b   :  { %6659 = vmatpush1.bf16.msra.mxu0 %v6658_v38  ;;  %v883_v38 = vld [vmem:[%s7571_s24 + $0x1c0] sm:$0xff] }
 0x48c   :  { %6669 = vmatprep.subr.bf16.mxu0 %v6668_v45  ;;  %v842_v45 = vld [vmem:[%s7571_s24 + $0x78] sm:$0xff] }
 0x554   :  { %v608_v56 = vpop.f32.mrb[2].mxu1 }
 0x555   :  { %v6509_v57 = vpop.f32.mrb[3].mxu1  ;;  %6523 = vmatprep.mubr.msk.f32.mxu1 %vm275_vm1, %v608_v56  ;;  %v831_v56 = vld [vmem:[%s7571_s24 + $0x20] sm:$0xff] }
 0x558   :  { %v684_v58 = vpop.f32.mrb[6].mxu0 }
 0x559   :  { %v6514_v59 = vpop.f32.mrb[7].mxu0  ;;  %6524 = vmatmul.mubr.msk.f32.vlgmr.msra.gmra.mrb[4].mxu1 %vm275_vm1, %v684_v58  ;;  %v847_v58 = vld [vmem:[%s7571_s24 + $0xa0] sm:$0xff] }
 0x55a   :  { %1122 = vmatprep.mubr.f32.mxu1 %v8974_v16  ;;  %6663 = vmatpush1.bf16.msra.mxu1 %v6662_v29  ;;  %v833_v59 = vld [vmem:[%s7571_s24 + $0x30] sm:$0xff]  ;;  %v6684_v29 = vpack.c.bf16 %v852_v20, %v836_v18  ;;  %v1661_v18 = vld [vmem:[%s7581_s6 + $0x100] sm:$0xff] }
 0x55b   :  { %6665 = vmatprep.subr.bf16.mxu1 %v6664_v37  ;;  %v867_v37 = vld [vmem:[%s7571_s24 + $0x140] sm:$0xff]  ;;  %v1647_v20 = vld [vmem:[%s7581_s6 + $0x90] sm:$0xff] }
 0x55e   :  { %6667 = vmatpush1.bf16.msra.mxu1 %v6666_v41  ;;  %v6688_v41 = vpack.c.bf16 %v884_v32, %v868_v31  ;;  %v1664_v31 = vld [vmem:[%s7581_s6 + $0x118] sm:$0xff]  ;;  %v1649_v32 = vld [vmem:[%s7581_s6 + $0xa0] sm:$0xff] }
 0x55f   :  { %6677 = vmatprep.subr.bf16.mxu1 %v6676_v47  ;;  %v6690_v47 = vpack.c.bf16 %v883_v38, %v867_v37  ;;  %v1633_v38 = vld [vmem:[%s7581_s6 + $0x20] sm:$0xff] }
 0x62c   :  { %v6525_v61 = vpop.f32.mrb[4].mxu1 }
 0x62d   :  { %v777_v62 = vadd.f32 %v6525_v61, %v5714_v60  ;;  %v771_v63 = vpop.f32.mrb[5].mxu1  ;;  %v5718_v61 = vld [vmem:[%s7556_s8] ss:$0 sm:$0xff]  ;;  %s9011_s8 = sld [smem:[#allocation8_spill]] }
 0x62e   :  { %v772_v0 = vadd.f32 %v5714_v60, %v771_v63  ;;  %v849_v60 = vld [vmem:[%s7571_s24 + $0xb0] sm:$0xff] }
 0x62f   :  { %v781_v1 = vadd.f32 %v777_v62, %v7734_v15  ;;  %v864_v62 = vld [vmem:[%s7571_s24 + $0x128] sm:$0xff] }
 0x630   :  { %v780_v2 = vadd.f32 %v772_v0, %v7732_v14  ;;  %v880_v0 = vld [vmem:[%s7571_s24 + $0x1a8] sm:$0xff] }
 0x631   :  { %v785_v3 = vsel %vm275_vm1, %v781_v1, 0.0 }
 0x632   :  { %786 = vadd.xlane.f32.xlu0 %v785_v3  ;;  %v782_v4 = vsel %vm275_vm1, %v780_v2, 0.0 }
 0x633   :  { %783 = vadd.xlane.f32.xlu1 %v782_v4  ;;  %v6670_v4 = vpack.c.bf16 %v847_v58, %v831_v56  ;;  %v888_v56 = vld [vmem:[%s7571_s24 + $0x1e8] sm:$0xff]  ;;  %v890_v58 = vld [vmem:[%s7571_s24 + $0x1f8] sm:$0xff] }
 0x6bf   :  { %v787_v5 = vpop.xlane.xlu0 %786 }
 0x6c0   :  { %v790_v6 = vmul.f32 0.03125, %v787_v5  ;;  %v784_v7 = vpop.xlane.xlu1 %783  ;;  %v6678_v5 = vpack.c.bf16 %v849_v60, %v833_v59 }
 0x6c1   :  { %v789_v8 = vmul.f32 0.03125, %v784_v7 }
 0x6c2   :  { %v7780_v9 = vsub.f32 %v781_v1, %v790_v6  ;;  %v866_v1 = vld [vmem:[%s7571_s24 + $0x138] sm:$0xff]  ;;  %v863_v6 = vld [vmem:[%s7571_s24 + $0x120] sm:$0xff] }
 0x6c3   :  { %v791_v10 = vsub.f32 %v780_v2, %v789_v8  ;;  %v882_v2 = vld [vmem:[%s7571_s24 + $0x1b8] sm:$0xff] }
 0x6c4   :  { %v794_v13 = vmul.f32 %v7780_v9, %v7780_v9 }
 0x6c5   :  { %v793_v11 = vmul.f32 %v791_v10, %v791_v10 }
 0x6c6   :  { %v798_v17 = vsel %vm275_vm1, %v794_v13, 0.0  ;;  %v6672_v13 = vpack.c.bf16 %v880_v0, %v864_v62  ;;  %v887_v62 = vld [vmem:[%s7571_s24 + $0x1e0] sm:$0xff]  ;;  %v889_v0 = vld [vmem:[%s7571_s24 + $0x1f0] sm:$0xff] }
 0x6c7   :  { %v795_v12 = vsel %vm275_vm1, %v793_v11, 0.0  ;;  %v865_v11 = vld [vmem:[%s7571_s24 + $0x130] sm:$0xff] }
 0x6c8   :  { %796 = vadd.xlane.f32.xlu0 %v795_v12  ;;  %v881_v12 = vld [vmem:[%s7571_s24 + $0x1b0] sm:$0xff] }
 0x6c9   :  { %v6682_v23 = vpack.c.bf16 %v881_v12, %v865_v11  ;;  %v1629_v11 = vld [vmem:[%s7581_s6] sm:$0xff]  ;;  %v1630_v12 = vld [vmem:[%s7581_s6 + $0x8] sm:$0xff] }
 0x6cc   :  { %799 = vadd.xlane.f32.xlu0 %v798_v17  ;;  %v6680_v17 = vpack.c.bf16 %v882_v2, %v866_v1 }
 0x755   :  { %v797_v48 = vpop.xlane.xlu0 %796 }
 0x756   :  { %v801_v49 = vmul.f32 0.03125, %v797_v48  ;;  %v6698_v48 = vpack.c.bf16 %v885_v40, %v869_v39  ;;  %v1634_v39 = vld [vmem:[%s7581_s6 + $0x28] sm:$0xff]  ;;  %v6724_v40 = vpack.c.bf16 %v1650_v33, %v1649_v32 }
 0x757   :  { %v1674_v32 = vld [vmem:[%s7581_s6 + $0x168] sm:$0xff] }
 0x758   :  { %v803_v50 = vadd.f32 1e-05, %v801_v49  ;;  %v839_v49 = vld [vmem:[%s7571_s24 + $0x60] sm:$0xff] }
 0x759   :  { %v800_v51 = vpop.xlane.xlu0 %799 }
 0x75a   :  { %7393 = vrsqrt.f32 %v803_v50  ;;  %v802_v52 = vmul.f32 0.03125, %v800_v51  ;;  %v855_v50 = vld [vmem:[%s7571_s24 + $0xe0] sm:$0xff]  ;;  %v841_v51 = vld [vmem:[%s7571_s24 + $0x70] sm:$0xff] }
 0x75b   :  { %v6702_v59 = vpack.c.bf16 %v855_v50, %v839_v49  ;;  %v1635_v50 = vld [vmem:[%s7581_s6 + $0x30] sm:$0xff] }
 0x75c   :  { %v804_v53 = vadd.f32 1e-05, %v802_v52  ;;  %v857_v52 = vld [vmem:[%s7571_s24 + $0xf0] sm:$0xff] }
 0x75d   :  { %v6710_v60 = vpack.c.bf16 %v857_v52, %v841_v51  ;;  %v1636_v51 = vld [vmem:[%s7581_s6 + $0x38] sm:$0xff] }
 0x75e   :  { %7395 = vrsqrt.f32 %v804_v53  ;;  %v6700_v53 = vpack.c.bf16 %v856_v44, %v840_v43  ;;  %v1666_v43 = vld [vmem:[%s7581_s6 + $0x128] sm:$0xff]  ;;  %v1651_v44 = vld [vmem:[%s7581_s6 + $0xb0] sm:$0xff] }
 0x764   :  { %v7394_v54 = vpop.eup %7393 }
 0x765   :  { %v807_v57 = vmul.f32 %v7394_v54, %v791_v10  ;;  %v879_v10 = vld [vmem:[%s7571_s24 + $0x1a0] sm:$0xff]  ;;  %v6708_v54 = vpack.c.bf16 %v858_v46, %v842_v45  ;;  %v1652_v45 = vld [vmem:[%s7581_s6 + $0xb8] sm:$0xff]  ;;  %v1683_v46 = vld [vmem:[%s7581_s6 + $0x1b0] sm:$0xff] }
 0x766   :  { %v6674_v22 = vpack.c.bf16 %v879_v10, %v863_v6  ;;  %v1678_v6 = vld [vmem:[%s7581_s6 + $0x188] sm:$0xff]  ;;  %v6728_v52 = vpack.c.bf16 %v1652_v45, %v1651_v44  ;;  %v1675_v44 = vld [vmem:[%s7581_s6 + $0x170] sm:$0xff]  ;;  %v1676_v45 = vld [vmem:[%s7581_s6 + $0x178] sm:$0xff] }
 0x767   :  { %v816_v63 = vmul.f32 %v5717_v55, %v807_v57  ;;  %v874_v57 = vld [vmem:[%s7571_s24 + $0x178] sm:$0xff] }
 0x768   :  { %v7396_v3 = vpop.eup %7395  ;;  %v6712_v2 = vpack.c.bf16 %v890_v58, %v874_v57  ;;  %v1654_v57 = vld [vmem:[%s7581_s6 + $0xc8] sm:$0xff]  ;;  %v1685_v58 = vld [vmem:[%s7581_s6 + $0x1c0] sm:$0xff] }
 0x769   :  { %v7817_v7 = vadd.f32 %v5718_v61, %v816_v63  ;;  %v808_v8 = vmul.f32 %v7396_v3, %v7780_v9  ;;  %v854_v9 = vld [vmem:[%s7571_s24 + $0xd8] sm:$0xff]  ;;  %v873_v63 = vld [vmem:[%s7571_s24 + $0x170] sm:$0xff]  ;;  %v1645_v3 = vld [vmem:[%s7581_s6 + $0x80] sm:$0xff] }
 0x76a   :  { %v6692_v30 = vpack.c.bf16 %v854_v9, %v838_v21  ;;  %v6714_v10 = vpack.c.bf16 %v889_v0, %v873_v63  ;;  %v1648_v21 = vld [vmem:[%s7581_s6 + $0x98] sm:$0xff]  ;;  %v1679_v9 = vld [vmem:[%s7581_s6 + $0x190] sm:$0xff]  ;;  %v1638_v63 = vld [vmem:[%s7581_s6 + $0x48] sm:$0xff] }
 0x76b   :  { %9001 = vst [vmem:[#allocation29_spill] sm:$0xff] %v7817_v7  ;;  %v817_v19 = vmul.f32 %v5717_v55, %v808_v8  ;;  %5719 = vmatmul.mubr.msk.f32.vlgmr.msra.gmra.mrb[8].mxu0 %vm275_vm1, %v7817_v7  ;;  %5721 = vmatmul.mubr.msk.f32.vlgmr.msra.gmra.mrb[6].mxu1 %vm275_vm1, %v7817_v7  ;;  %v872_v55 = vld [vmem:[%s7571_s24 + $0x168] sm:$0xff]  ;;  %v6720_v28 = vpack.c.bf16 %v1648_v21, %v1647_v20  ;;  %v1672_v20 = vld [vmem:[%s7581_s6 + $0x158] sm:$0xff]  ;;  %v1657_v21 = vld [vmem:[%s7581_s6 + $0xe0] sm:$0xff] }
 0x76c   :  { %6671 = vmatpush1.bf16.msra.mxu0 %v6670_v4  ;;  %6679 = vmatpush1.bf16.msra.mxu1 %v6678_v5  ;;  %v6704_v1 = vpack.c.bf16 %v888_v56, %v872_v55  ;;  %v1646_v4 = vld [vmem:[%s7581_s6 + $0x88] sm:$0xff]  ;;  %v1677_v5 = vld [vmem:[%s7581_s6 + $0x180] sm:$0xff]  ;;  %v1668_v55 = vld [vmem:[%s7581_s6 + $0x138] sm:$0xff] }
 0x76d   :  { %v7832_v25 = vadd.f32 %v5718_v61, %v817_v19  ;;  %1051 = vmatprep.mubr.f32.mxu0 %v8974_v16  ;;  %1128 = vmatprep.mubr.f32.mxu1 %v8974_v16  ;;  %v871_v61 = vld [vmem:[%s7571_s24 + $0x160] sm:$0xff]  ;;  %v1662_v19 = vld [vmem:[%s7581_s6 + $0x108] sm:$0xff]  ;;  %s9012_s24 = sld [smem:[#allocation12_spill]] }
 0x76e   :  { %6673 = vmatprep.subr.bf16.mxu0 %v6672_v13  ;;  %6681 = vmatprep.subr.bf16.mxu1 %v6680_v17  ;;  %v6706_v8 = vpack.c.bf16 %v887_v62, %v871_v61  ;;  %v6716_v13 = vpack.c.bf16 %v1646_v4, %v1645_v3  ;;  %v6748_v17 = vpack.c.bf16 %v1678_v6, %v1677_v5  ;;  %v1653_v56 = vld [vmem:[%s7581_s6 + $0xc0] sm:$0xff]  ;;  %v1670_v3 = vld [vmem:[%s7581_s6 + $0x148] sm:$0xff]  ;;  %v1655_v4 = vld [vmem:[%s7581_s6 + $0xd0] sm:$0xff] }
 0x76f   :  { %5720 = vmatmul.mubr.msk.f32.gmra.mrb[10].mxu0 %vm275_vm1, %v7832_v25  ;;  %5722 = vmatmul.mubr.msk.f32.gmra.mrb[8].mxu1 %vm275_vm1, %v7832_v25  ;;  %v6750_v24 = vpack.c.bf16 %v1662_v19, %v1661_v18  ;;  %v1637_v62 = vld [vmem:[%s7581_s6 + $0x40] sm:$0xff]  ;;  %v6732_v0 = vpack.c.bf16 %v1654_v57, %v1653_v56  ;;  %v1656_v5 = vld [vmem:[%s7581_s6 + $0xd8] sm:$0xff]  ;;  %v1687_v6 = vld [vmem:[%s7581_s6 + $0x1d0] sm:$0xff] }
 0x770   :  { %6675 = vmatpush1.bf16.msra.mxu0 %v6674_v22  ;;  %6683 = vmatpush1.bf16.msra.mxu1 %v6682_v23  ;;  %v1680_v22 = vld [vmem:[%s7581_s6 + $0x198] sm:$0xff]  ;;  %v6718_v23 = vpack.c.bf16 %v1630_v12, %v1629_v11  ;;  %v1639_v12 = vld [vmem:[%s7581_s6 + $0x50] sm:$0xff]  ;;  %v7980_v57 = vld [vmem:[%s7576_s30] sm:$0xff] }
 0x771   :  { %1199 = vmatprep.mubr.f32.mxu0 %v8974_v16  ;;  %1276 = vmatprep.mubr.f32.mxu1 %v8974_v16  ;;  %v1671_v19 = vld [vmem:[%s7581_s6 + $0x150] sm:$0xff] }
 0x772   :  { %6685 = vmatprep.subr.bf16.mxu0 %v6684_v29  ;;  %6693 = vmatprep.subr.bf16.mxu1 %v6692_v30  ;;  %v6752_v29 = vpack.c.bf16 %v1680_v22, %v1679_v9  ;;  %v1663_v30 = vld [vmem:[%s7581_s6 + $0x110] sm:$0xff]  ;;  %v1658_v9 = vld [vmem:[%s7581_s6 + $0xe8] sm:$0xff]  ;;  %v1689_v22 = vld [vmem:[%s7581_s6 + $0x1e0] sm:$0xff] }
 0x773   :  { %5723 = vmatmul.mubr.msk.f32.vlgmr.msra.gmra.mrb[12].mxu0 %vm275_vm1, %v7817_v7  ;;  %5725 = vmatmul.mubr.msk.f32.vlgmr.msra.gmra.mrb[10].mxu1 %vm275_vm1, %v7817_v7  ;;  %v6754_v37 = vpack.c.bf16 %v1664_v31, %v1663_v30  ;;  %v1642_v30 = vld [vmem:[%s7581_s6 + $0x68] sm:$0xff]  ;;  %v1673_v31 = vld [vmem:[%s7581_s6 + $0x160] sm:$0xff] }
 0x774   :  { %6687 = vmatpush1.bf16.msra.mxu0 %v6686_v35  ;;  %6695 = vmatpush1.bf16.msra.mxu1 %v6694_v36  ;;  %v1682_v35 = vld [vmem:[%s7581_s6 + $0x1a8] sm:$0xff]  ;;  %v6722_v36 = vpack.c.bf16 %v1632_v27, %v1631_v26  ;;  %v6770_v26 = vpack.c.bf16 %v1672_v20, %v1671_v19  ;;  %v1641_v27 = vld [vmem:[%s7581_s6 + $0x60] sm:$0xff]  ;;  %v1744_v19 = vld [vmem:[%s7581_s6 + $0x398] sm:$0xff] }
 0x775   :  { %1205 = vmatprep.mubr.f32.mxu0 %v8974_v16  ;;  %1282 = vmatprep.mubr.f32.mxu1 %v8974_v16  ;;  %v6742_v33 = vpack.c.bf16 %v1642_v30, %v1641_v27 }
 0x776   :  { %6689 = vmatprep.subr.bf16.mxu0 %v6688_v41  ;;  %6697 = vmatprep.subr.bf16.mxu1 %v6696_v42  ;;  %v6756_v41 = vpack.c.bf16 %v1682_v35, %v1681_v34  ;;  %v1665_v42 = vld [vmem:[%s7581_s6 + $0x120] sm:$0xff]  ;;  %v6774_v34 = vpack.c.bf16 %v1674_v32, %v1673_v31  ;;  %v1659_v35 = vld [vmem:[%s7581_s6 + $0xf0] sm:$0xff] }
 0x777   :  { %5724 = vmatmul.mubr.msk.f32.gmra.mrb[14].mxu0 %vm275_vm1, %v7832_v25  ;;  %5726 = vmatmul.mubr.msk.f32.gmra.mrb[12].mxu1 %vm275_vm1, %v7832_v25  ;;  %v6758_v49 = vpack.c.bf16 %v1666_v43, %v1665_v42 }
 0x778   :  { %6691 = vmatpush1.bf16.msra.mxu0 %v6690_v47  ;;  %6699 = vmatpush1.bf16.msra.mxu1 %v6698_v48  ;;  %v1684_v47 = vld [vmem:[%s7581_s6 + $0x1b8] sm:$0xff]  ;;  %v6726_v48 = vpack.c.bf16 %v1634_v39, %v1633_v38 }
 0x779   :  { %1353 = vmatprep.mubr.f32.mxu0 %v8974_v16  ;;  %1430 = vmatprep.mubr.f32.mxu1 %v8974_v16  ;;  %v1692_v39 = vld [vmem:[%s7581_s6 + $0x1f8] sm:$0xff] }
 0x77a   :  { %6701 = vmatprep.subr.bf16.mxu0 %v6700_v53  ;;  %6709 = vmatprep.subr.bf16.mxu1 %v6708_v54  ;;  %v6760_v53 = vpack.c.bf16 %v1684_v47, %v1683_v46  ;;  %v1667_v54 = vld [vmem:[%s7581_s6 + $0x130] sm:$0xff]  ;;  %v6778_v46 = vpack.c.bf16 %v1676_v45, %v1675_v44  ;;  %v1709_v47 = vld [vmem:[%s7581_s6 + $0x280] sm:$0xff] }
 0x77b   :  { %5727 = vmatmul.mubr.msk.f32.vlgmr.msra.gmra.mrb[16].mxu0 %vm275_vm1, %v7817_v7  ;;  %5729 = vmatmul.mubr.msk.f32.vlgmr.msra.gmra.mrb[14].mxu1 %vm275_vm1, %v7817_v7  ;;  %v6762_v61 = vpack.c.bf16 %v1668_v55, %v1667_v54 }
 0x77c   :  { %6703 = vmatpush1.bf16.msra.mxu0 %v6702_v59  ;;  %6711 = vmatpush1.bf16.msra.mxu1 %v6710_v60  ;;  %v1686_v59 = vld [vmem:[%s7581_s6 + $0x1c8] sm:$0xff]  ;;  %v6730_v60 = vpack.c.bf16 %v1636_v51, %v1635_v50 }
 0x77d   :  { %1359 = vmatprep.mubr.f32.mxu0 %v8974_v16  ;;  %1436 = vmatprep.mubr.f32.mxu1 %v8974_v16  ;;  %v1742_v51 = vld [vmem:[%s7581_s6 + $0x388] sm:$0xff] }
 0x77e   :  { %6705 = vmatprep.subr.bf16.mxu0 %v6704_v1  ;;  %6713 = vmatprep.subr.bf16.mxu1 %v6712_v2  ;;  %v6764_v1 = vpack.c.bf16 %v1686_v59, %v1685_v58  ;;  %v1669_v2 = vld [vmem:[%s7581_s6 + $0x140] sm:$0xff] }
 0x77f   :  { %5728 = vmatmul.mubr.msk.f32.gmra.mrb[18].mxu0 %vm275_vm1, %v7832_v25  ;;  %5730 = vmatmul.mubr.msk.f32.gmra.mrb[16].mxu1 %vm275_vm1, %v7832_v25  ;;  %v6766_v11 = vpack.c.bf16 %v1670_v3, %v1669_v2 }
 0x780   :  { %6707 = vmatpush1.bf16.msra.mxu0 %v6706_v8  ;;  %6715 = vmatpush1.bf16.msra.mxu1 %v6714_v10  ;;  %v1688_v8 = vld [vmem:[%s7581_s6 + $0x1d8] sm:$0xff]  ;;  %v6734_v10 = vpack.c.bf16 %v1638_v63, %v1637_v62 }
 0x781   :  { %1507 = vmatprep.mubr.f32.mxu0 %v8974_v16  ;;  %1584 = vmatprep.mubr.f32.mxu1 %v8974_v16  ;;  %v6768_v18 = vpack.c.bf16 %v1688_v8, %v1687_v6  ;;  %v1726_v6 = vld [vmem:[%s7581_s6 + $0x308] sm:$0xff]  ;;  %v1711_v8 = vld [vmem:[%s7581_s6 + $0x290] sm:$0xff] }
 0x782   :  { %6717 = vmatprep.subr.bf16.mxu0 %v6716_v13  ;;  %6749 = vmatprep.subr.bf16.mxu1 %v6748_v17  ;;  %v1640_v13 = vld [vmem:[%s7581_s6 + $0x58] sm:$0xff]  ;;  %v6736_v17 = vpack.c.bf16 %v1656_v5, %v1655_v4  ;;  %v1725_v5 = vld [vmem:[%s7581_s6 + $0x300] sm:$0xff] }
 0x783   :  { %5731 = vmatmul.mubr.msk.f32.vlgmr.msra.gmra.mrb[20].mxu0 %vm275_vm1, %v7817_v7  ;;  %5733 = vmatmul.mubr.msk.f32.vlgmr.msra.gmra.mrb[18].mxu1 %vm275_vm1, %v7817_v7  ;;  %v1808_v7 = vld [vmem:[%s7581_s6 + $0x598] sm:$0xff] }
 0x784   :  { %1513 = vmatprep.mubr.f32.mxu0 %v8974_v16  ;;  %1590 = vmatprep.mubr.f32.mxu1 %v8974_v16  ;;  %v1807_v16 = vld [vmem:[%s7581_s6 + $0x590] sm:$0xff] }
 0x785   :  { %6719 = vmatpush3.bf16.msra.mxu0 %v6718_v23  ;;  %6751 = vmatpush3.bf16.msra.mxu1 %v6750_v24  ;;  %v1690_v23 = vld [vmem:[%s7581_s6 + $0x1e8] sm:$0xff]  ;;  %v6738_v24 = vpack.c.bf16 %v1640_v13, %v1639_v12 }
 0x786   :  { %6721 = vmatprep.subr.bf16.mxu0 %v6720_v28  ;;  %6753 = vmatprep.subr.bf16.mxu1 %v6752_v29  ;;  %v6740_v28 = vpack.c.bf16 %v1658_v9, %v1657_v21  ;;  %v6772_v29 = vpack.c.bf16 %v1690_v23, %v1689_v22  ;;  %v6814_v23 = vpack.c.bf16 %v1726_v6, %v1725_v5 }
 0x787   :  { %5732 = vmatmul.mubr.msk.f32.gmra.mrb[22].mxu0 %vm275_vm1, %v7832_v25  ;;  %5734 = vmatmul.mubr.msk.f32.gmra.mrb[20].mxu1 %vm275_vm1, %v7832_v25 }
 0x789   :  { %6723 = vmatpush3.bf16.msra.mxu0 %v6722_v36  ;;  %6755 = vmatpush3.bf16.msra.mxu1 %v6754_v37  ;;  %v1660_v36 = vld [vmem:[%s7581_s6 + $0xf8] sm:$0xff]  ;;  %v1691_v37 = vld [vmem:[%s7581_s6 + $0x1f0] sm:$0xff] }
 0x78a   :  { %6725 = vmatprep.subr.bf16.mxu0 %v6724_v40  ;;  %6757 = vmatprep.subr.bf16.mxu1 %v6756_v41  ;;  %v6744_v38 = vpack.c.bf16 %v1660_v36, %v1659_v35  ;;  %v1643_v40 = vld [vmem:[%s7581_s6 + $0x70] sm:$0xff]  ;;  %v1644_v41 = vld [vmem:[%s7581_s6 + $0x78] sm:$0xff]  ;;  %v6776_v42 = vpack.c.bf16 %v1692_v39, %v1691_v37 }
 0x78b   :  { %v6746_v43 = vpack.c.bf16 %v1644_v41, %v1643_v40  ;;  %v1728_v41 = vld [vmem:[%s7581_s6 + $0x318] sm:$0xff] }
 0x78d   :  { %6727 = vmatpush3.bf16.msra.mxu0 %v6726_v48  ;;  %6759 = vmatpush3.bf16.msra.mxu1 %v6758_v49  ;;  %v1710_v48 = vld [vmem:[%s7581_s6 + $0x288] sm:$0xff]  ;;  %v1741_v49 = vld [vmem:[%s7581_s6 + $0x380] sm:$0xff] }
 0x78e   :  { %6729 = vmatprep.subr.bf16.mxu0 %v6728_v52  ;;  %6761 = vmatprep.subr.bf16.mxu1 %v6760_v53  ;;  %v6780_v50 = vpack.c.bf16 %v1710_v48, %v1709_v47  ;;  %v6812_v52 = vpack.c.bf16 %v1742_v51, %v1741_v49  ;;  %v895_v53 = vlaneseq  ;;  %v1745_v47 = vld [vmem:[%s7581_s6 + $0x3a0] sm:$0xff]  ;;  %v1746_v48 = vld [vmem:[%s7581_s6 + $0x3a8] sm:$0xff] }
 0x78f   :  { %v1697_v49 = vld [vmem:[%s7581_s6 + $0x220] sm:$0xff]  ;;  %v6820_v6 = vpack.c.bf16 %v1746_v48, %v1745_v47 }
 0x790   :  { %v7971_v54 = vshrl.u32 %v895_v53, 7 }
 0x791   :  { %6731 = vmatpush3.bf16.msra.mxu0 %v6730_v60  ;;  %6763 = vmatpush3.bf16.msra.mxu1 %v6762_v61 }
 0x792   :  { %6733 = vmatprep.subr.bf16.mxu0 %v6732_v0  ;;  %6765 = vmatprep.subr.bf16.mxu1 %v6764_v1  ;;  %v7974_v55 = vsub.s32 0, %v7971_v54  ;;  %v7977_v56 = vsub.s32 2, %v7971_v54  ;;  %v7983_v58 = vsub.s32 1, %v7971_v54  ;;  %v7986_v59 = vsub.s32 3, %v7971_v54  ;;  %v1693_v0 = vld [vmem:[%s7581_s6 + $0x200] sm:$0xff]  ;;  %v1694_v1 = vld [vmem:[%s7581_s6 + $0x208] sm:$0xff] }
 0x793   :  { %v7999_v2 = vsub.s32 5, %v7971_v54  ;;  %v8008_v9 = vsub.s32 7, %v7971_v54  ;;  %v6782_v22 = vpack.c.bf16 %v1694_v1, %v1693_v0 }
 0x794   :  { %v898_v60 = vrot.slane %v7980_v57, %v7974_v55  ;;  %v906_v61 = vrot.slane %v7980_v57, %v7977_v56  ;;  %v902_v62 = vrot.slane %v7980_v57, %v7983_v58  ;;  %v910_v63 = vrot.slane %v7980_v57, %v7986_v59 }
 0x795   :  { %6735 = vmatpush3.bf16.msra.mxu0 %v6734_v10  ;;  %6767 = vmatpush3.bf16.msra.mxu1 %v6766_v11  ;;  %v8021_v45 = vrot.slane %v7980_v57, %v8008_v9 }
 0x796   :  { %6737 = vmatprep.subr.bf16.mxu0 %v6736_v17  ;;  %6769 = vmatprep.subr.bf16.mxu1 %v6768_v18  ;;  %v1712_v17 = vld [vmem:[%s7581_s6 + $0x298] sm:$0xff]  ;;  %v1743_v18 = vld [vmem:[%s7581_s6 + $0x390] sm:$0xff] }
 0x797   :  { %v6784_v31 = vpack.c.bf16 %v1712_v17, %v1711_v8  ;;  %v6816_v32 = vpack.c.bf16 %v1744_v19, %v1743_v18  ;;  %v1730_v8 = vld [vmem:[%s7581_s6 + $0x328] sm:$0xff]  ;;  %v1747_v17 = vld [vmem:[%s7581_s6 + $0x3b0] sm:$0xff]  ;;  %v1748_v18 = vld [vmem:[%s7581_s6 + $0x3b8] sm:$0xff] }
 0x799   :  { %6739 = vmatpush3.bf16.msra.mxu0 %v6738_v24  ;;  %6771 = vmatpush3.bf16.msra.mxu1 %v6770_v26  ;;  %v8012_v24 = vrot.slane %v7980_v57, %v7999_v2  ;;  %v1695_v26 = vld [vmem:[%s7581_s6 + $0x210] sm:$0xff] }
 0x79a   :  { %6741 = vmatprep.subr.bf16.mxu0 %v6740_v28  ;;  %6773 = vmatprep.subr.bf16.mxu1 %v6772_v29 }
 0x79d   :  { %6743 = vmatpush3.bf16.msra.mxu0 %v6742_v33  ;;  %6775 = vmatpush3.bf16.msra.mxu1 %v6774_v34  ;;  %v1696_v33 = vld [vmem:[%s7581_s6 + $0x218] sm:$0xff]  ;;  %v1727_v34 = vld [vmem:[%s7581_s6 + $0x310] sm:$0xff] }
 0x79e   :  { %6745 = vmatprep.subr.bf16.mxu0 %v6744_v38  ;;  %6777 = vmatprep.subr.bf16.mxu1 %v6776_v42  ;;  %v1713_v42 = vld [vmem:[%s7581_s6 + $0x2a0] sm:$0xff] }
 0x7a1   :  { %6747 = vmatpush3.bf16.msra.mxu0 %v6746_v43  ;;  %6779 = vmatpush3.bf16.msra.mxu1 %v6778_v46  ;;  %v1714_v46 = vld [vmem:[%s7581_s6 + $0x2a8] sm:$0xff] }
 0x7a2   :  { %6781 = vmatprep.subr.bf16.mxu0 %v6780_v50  ;;  %6813 = vmatprep.subr.bf16.mxu1 %v6812_v52  ;;  %v6788_v5 = vpack.c.bf16 %v1714_v46, %v1713_v42 }
 0x83e   :  { %v1047_v3 = vpop.f32.mrb[8].mxu0  ;;  %v1124_v4 = vpop.f32.mrb[6].mxu1 }
 0x83f   :  { %v1048_v10 = vadd.f32 %v1047_v3, %v898_v60  ;;  %v1125_v11 = vadd.f32 %v1124_v4, %v906_v61  ;;  %v1049_v12 = vpop.f32.mrb[9].mxu0  ;;  %v1126_v13 = vpop.f32.mrb[7].mxu1 }
 0x840   :  { %v1050_v20 = vadd.f32 %v1049_v12, %v902_v62  ;;  %v1127_v21 = vadd.f32 %v1126_v13, %v910_v63  ;;  %v1716_v13 = vld [vmem:[%s7581_s6 + $0x2b8] sm:$0xff] }
 0x841   :  { %v1597_v35 = vmax.f32 %v1048_v10, 0.0  ;;  %v1599_v36 = vmax.f32 %v1125_v11, 0.0  ;;  %v1715_v10 = vld [vmem:[%s7581_s6 + $0x2b0] sm:$0xff] }
 0x842   :  { %v1598_v27 = vmax.f32 %v1050_v20, 0.0  ;;  %v1600_v28 = vmax.f32 %v1127_v21, 0.0  ;;  %v1053_v29 = vpop.f32.mrb[10].mxu0  ;;  %v1130_v30 = vpop.f32.mrb[8].mxu1 }
 0x843   :  { %v1054_v37 = vadd.f32 %v1053_v29, %v898_v60  ;;  %v1131_v38 = vadd.f32 %v1130_v30, %v906_v61  ;;  %v1055_v39 = vpop.f32.mrb[11].mxu0  ;;  %v1132_v40 = vpop.f32.mrb[9].mxu1  ;;  %v6786_v60 = vpack.c.bf16 %v1696_v33, %v1695_v26  ;;  %v6818_v61 = vpack.c.bf16 %v1728_v41, %v1727_v34  ;;  %v1731_v33 = vld [vmem:[%s7581_s6 + $0x330] sm:$0xff]  ;;  %v1732_v34 = vld [vmem:[%s7581_s6 + $0x338] sm:$0xff] }
 0x844   :  { %v1056_v43 = vadd.f32 %v1055_v39, %v902_v62  ;;  %v1133_v44 = vadd.f32 %v1132_v40, %v910_v63  ;;  %1956 = vmatprep.mubr.f32.mxu0 %v1598_v27  ;;  %2031 = vmatprep.mubr.f32.mxu1 %v1600_v28  ;;  %v1698_v62 = vld [vmem:[%s7581_s6 + $0x228] sm:$0xff]  ;;  %v1729_v63 = vld [vmem:[%s7581_s6 + $0x320] sm:$0xff]  ;;  %v1699_v27 = vld [vmem:[%s7581_s6 + $0x230] sm:$0xff]  ;;  %v6826_v42 = vpack.c.bf16 %v1732_v34, %v1731_v33 }
 0x845   :  { %1957 = vmatmul.mubr.f32.vlgmr.msra.gmra.mrb[24].mxu0 %v1597_v35  ;;  %2032 = vmatmul.mubr.f32.vlgmr.msra.gmra.mrb[22].mxu1 %v1599_v36  ;;  %v1613_v0 = vmax.f32 %v1054_v37, 0.0  ;;  %v1615_v1 = vmax.f32 %v1131_v38, 0.0  ;;  %v6822_v26 = vpack.c.bf16 %v1730_v8, %v1729_v63  ;;  %v1700_v28 = vld [vmem:[%s7581_s6 + $0x238] sm:$0xff]  ;;  %v1717_v35 = vld [vmem:[%s7581_s6 + $0x2c0] sm:$0xff]  ;;  %v1718_v36 = vld [vmem:[%s7581_s6 + $0x2c8] sm:$0xff] }
 0x846   :  { %v1614_v50 = vmax.f32 %v1056_v43, 0.0  ;;  %v1616_v51 = vmax.f32 %v1133_v44, 0.0  ;;  %6783 = vmatpush3.bf16.msra.mxu0 %v6782_v22  ;;  %6815 = vmatpush3.bf16.msra.mxu1 %v6814_v23  ;;  %v8027_v52 = vpop.f32.mrb[12].mxu0  ;;  %v8029_v53 = vpop.f32.mrb[10].mxu1  ;;  %v6790_v23 = vpack.c.bf16 %v1698_v62, %v1697_v49  ;;  %v1749_v37 = vld [vmem:[%s7581_s6 + $0x3c0] sm:$0xff]  ;;  %v1750_v38 = vld [vmem:[%s7581_s6 + $0x3c8] sm:$0xff]  ;;  %v6794_v41 = vpack.c.bf16 %v1700_v28, %v1699_v27 }
 0x847   :  { %v1203_v3 = vpop.f32.mrb[13].mxu0  ;;  %v1280_v4 = vpop.f32.mrb[11].mxu1  ;;  %6785 = vmatprep.subr.bf16.mxu0 %v6784_v31  ;;  %6817 = vmatprep.subr.bf16.mxu1 %v6816_v32  ;;  %v6792_v31 = vpack.c.bf16 %v1716_v13, %v1715_v10  ;;  %v6824_v32 = vpack.c.bf16 %v1748_v18, %v1747_v17  ;;  %v1701_v43 = vld [vmem:[%s7581_s6 + $0x240] sm:$0xff]  ;;  %v1702_v44 = vld [vmem:[%s7581_s6 + $0x248] sm:$0xff]  ;;  %v6796_v48 = vpack.c.bf16 %v1718_v36, %v1717_v35  ;;  %v1751_v62 = vld [vmem:[%s7581_s6 + $0x3d0] sm:$0xff]  ;;  %v8098_v35 = vsub.s32 6, %v7971_v54 }
 0x848   :  { %v1204_v11 = vadd.f32 %v1203_v3, %v8012_v24  ;;  %v1281_v12 = vadd.f32 %v1280_v4, %v8021_v45  ;;  %1961 = vmatprep.mubr.f32.mxu0 %v1614_v50  ;;  %2036 = vmatprep.mubr.f32.mxu1 %v1616_v51  ;;  %v6828_v49 = vpack.c.bf16 %v1750_v38, %v1749_v37  ;;  %v1733_v50 = vld [vmem:[%s7581_s6 + $0x340] sm:$0xff]  ;;  %v1734_v51 = vld [vmem:[%s7581_s6 + $0x348] sm:$0xff]  ;;  %v1752_v63 = vld [vmem:[%s7581_s6 + $0x3d8] sm:$0xff] }
 0x849   :  { %1962 = vmatmul.mubr.f32.gmra.mrb[26].mxu0 %v1613_v0  ;;  %2037 = vmatmul.mubr.f32.gmra.mrb[24].mxu1 %v1615_v1  ;;  %v6798_v3 = vpack.c.bf16 %v1702_v44, %v1701_v43  ;;  %v6830_v4 = vpack.c.bf16 %v1734_v51, %v1733_v50  ;;  %v1735_v13 = vld [vmem:[%s7581_s6 + $0x350] sm:$0xff]  ;;  %v1736_v17 = vld [vmem:[%s7581_s6 + $0x358] sm:$0xff]  ;;  %v1721_v18 = vld [vmem:[%s7581_s6 + $0x2e0] sm:$0xff] }
 0x84a   :  { %v1602_v19 = vmax.f32 %v1204_v11, 0.0  ;;  %v1604_v20 = vmax.f32 %v1281_v12, 0.0  ;;  %6787 = vmatpush3.bf16.msra.mxu0 %v6786_v60  ;;  %6819 = vmatpush3.bf16.msra.mxu1 %v6818_v61  ;;  %v8040_v21 = vpop.f32.mrb[14].mxu0  ;;  %v8042_v22 = vpop.f32.mrb[12].mxu1  ;;  %v1719_v60 = vld [vmem:[%s7581_s6 + $0x2d0] sm:$0xff]  ;;  %v1720_v61 = vld [vmem:[%s7581_s6 + $0x2d8] sm:$0xff]  ;;  %v6832_v12 = vpack.c.bf16 %v1752_v63, %v1751_v62 }
 0x84b   :  { %v8046_v29 = vpop.f32.mrb[15].mxu0  ;;  %v8048_v30 = vpop.f32.mrb[13].mxu1  ;;  %6789 = vmatprep.subr.bf16.mxu0 %v6788_v5  ;;  %6821 = vmatprep.subr.bf16.mxu1 %v6820_v6  ;;  %v1703_v5 = vld [vmem:[%s7581_s6 + $0x250] sm:$0xff]  ;;  %v1704_v6 = vld [vmem:[%s7581_s6 + $0x258] sm:$0xff]  ;;  %v6800_v11 = vpack.c.bf16 %v1720_v61, %v1719_v60  ;;  %v1705_v33 = vld [vmem:[%s7581_s6 + $0x260] sm:$0xff] }
 0x84c   :  { %2106 = vmatprep.mubr.f32.mxu0 %v1602_v19  ;;  %2181 = vmatprep.mubr.f32.mxu1 %v1604_v20  ;;  %v1722_v19 = vld [vmem:[%s7581_s6 + $0x2e8] sm:$0xff]  ;;  %v1753_v20 = vld [vmem:[%s7581_s6 + $0x3e0] sm:$0xff]  ;;  %v1723_v44 = vld [vmem:[%s7581_s6 + $0x2f0] sm:$0xff] }
 0x84d   :  { %v1706_v34 = vld [vmem:[%s7581_s6 + $0x268] sm:$0xff]  ;;  %v6804_v38 = vpack.c.bf16 %v1722_v19, %v1721_v18  ;;  %v1756_v50 = vld [vmem:[%s7581_s6 + $0x3f8] sm:$0xff]  ;;  %v1707_v63 = vld [vmem:[%s7581_s6 + $0x270] sm:$0xff] }
 0x84e   :  { %6791 = vmatpush3.bf16.msra.mxu0 %v6790_v23  ;;  %6823 = vmatpush3.bf16.msra.mxu1 %v6822_v26  ;;  %v8056_v39 = vpop.f32.mrb[16].mxu0  ;;  %v8058_v40 = vpop.f32.mrb[14].mxu1  ;;  %v1754_v23 = vld [vmem:[%s7581_s6 + $0x3e8] sm:$0xff]  ;;  %v8089_v26 = vsub.s32 4, %v7971_v54  ;;  %v6806_v61 = vpack.c.bf16 %v1706_v34, %v1705_v33  ;;  %v1773_v18 = vld [vmem:[%s7581_s6 + $0x480] sm:$0xff] }
 0x84f   :  { %v8062_v46 = vpop.f32.mrb[17].mxu0  ;;  %v8064_v47 = vpop.f32.mrb[15].mxu1  ;;  %6793 = vmatprep.subr.bf16.mxu0 %v6792_v31  ;;  %6825 = vmatprep.subr.bf16.mxu1 %v6824_v32  ;;  %v6802_v31 = vpack.c.bf16 %v1704_v6, %v1703_v5  ;;  %v6834_v32 = vpack.c.bf16 %v1736_v17, %v1735_v13  ;;  %v1738_v43 = vld [vmem:[%s7581_s6 + $0x368] sm:$0xff]  ;;  %v922_v5 = vrot.slane %v7980_v57, %v8098_v35  ;;  %v1740_v17 = vld [vmem:[%s7581_s6 + $0x378] sm:$0xff] }
 0x850   :  { %v914_v54 = vrot.slane %v7980_v57, %v8089_v26  ;;  %v1774_v19 = vld [vmem:[%s7581_s6 + $0x488] sm:$0xff]  ;;  %v1757_v57 = vld [vmem:[%s7581_s6 + $0x400] sm:$0xff] }
 0x852   :  { %6795 = vmatpush3.bf16.msra.mxu0 %v6794_v41  ;;  %6827 = vmatpush3.bf16.msra.mxu1 %v6826_v42  ;;  %v8072_v0 = vpop.f32.mrb[18].mxu0  ;;  %v8074_v1 = vpop.f32.mrb[16].mxu1  ;;  %v6836_v41 = vpack.c.bf16 %v1754_v23, %v1753_v20  ;;  %v1737_v42 = vld [vmem:[%s7581_s6 + $0x360] sm:$0xff]  ;;  %v1806_v23 = vld [vmem:[%s7581_s6 + $0x588] sm:$0xff] }
 0x853   :  { %v8078_v8 = vpop.f32.mrb[19].mxu0  ;;  %v8080_v10 = vpop.f32.mrb[17].mxu1  ;;  %6797 = vmatprep.subr.bf16.mxu0 %v6796_v48  ;;  %6829 = vmatprep.subr.bf16.mxu1 %v6828_v49  ;;  %v1724_v48 = vld [vmem:[%s7581_s6 + $0x2f8] sm:$0xff]  ;;  %v1755_v49 = vld [vmem:[%s7581_s6 + $0x3f0] sm:$0xff]  ;;  %v6838_v62 = vpack.c.bf16 %v1738_v43, %v1737_v42  ;;  %v1805_v20 = vld [vmem:[%s7581_s6 + $0x580] sm:$0xff] }
 0x854   :  { %v6840_v13 = vpack.c.bf16 %v1756_v50, %v1755_v49  ;;  %v1790_v42 = vld [vmem:[%s7581_s6 + $0x508] sm:$0xff]  ;;  %v1775_v43 = vld [vmem:[%s7581_s6 + $0x490] sm:$0xff]  ;;  %v6876_v49 = vpack.c.bf16 %v1806_v23, %v1805_v20  ;;  %v1776_v50 = vld [vmem:[%s7581_s6 + $0x498] sm:$0xff] }
 0x855   :  { %v1792_v23 = vld [vmem:[%s7581_s6 + $0x518] sm:$0xff] }
 0x856   :  { %6799 = vmatpush3.bf16.msra.mxu0 %v6798_v3  ;;  %6831 = vmatpush3.bf16.msra.mxu1 %v6830_v4  ;;  %v8091_v27 = vpop.f32.mrb[20].mxu0  ;;  %v8093_v28 = vpop.f32.mrb[18].mxu1  ;;  %v1708_v3 = vld [vmem:[%s7581_s6 + $0x278] sm:$0xff]  ;;  %v1739_v4 = vld [vmem:[%s7581_s6 + $0x370] sm:$0xff] }
 0x857   :  { %v8100_v36 = vpop.f32.mrb[21].mxu0  ;;  %v8102_v37 = vpop.f32.mrb[19].mxu1  ;;  %6801 = vmatprep.subr.bf16.mxu0 %v6800_v11  ;;  %6833 = vmatprep.subr.bf16.mxu1 %v6832_v12  ;;  %v6808_v12 = vpack.c.bf16 %v1724_v48, %v1723_v44  ;;  %v6810_v33 = vpack.c.bf16 %v1708_v3, %v1707_v63  ;;  %v6842_v34 = vpack.c.bf16 %v1740_v17, %v1739_v4  ;;  %v1760_v17 = vld [vmem:[%s7581_s6 + $0x418] sm:$0xff] }
 0x858   :  { %v1202_v44 = vadd.f32 %v8027_v52, %v914_v54  ;;  %v1279_v48 = vadd.f32 %v8029_v53, %v922_v5 }
 0x85a   :  { %6803 = vmatpush3.bf16.msra.mxu0 %v6802_v31  ;;  %6835 = vmatpush3.bf16.msra.mxu1 %v6834_v32  ;;  %v8112_v51 = vpop.f32.mrb[22].mxu0  ;;  %v8114_v60 = vpop.f32.mrb[20].mxu1  ;;  %v8131_v31 = vld [vmem:[%s7576_s30 + $0x8] sm:$0xff]  ;;  %v1601_v4 = vmax.f32 %v1202_v44, 0.0  ;;  %v1793_v44 = vld [vmem:[%s7581_s6 + $0x520] sm:$0xff]  ;;  %s9013_s30 = sld [smem:[#allocation18_spill]] }
 0x85b   :  { %v8121_v6 = vpop.f32.mrb[23].mxu0  ;;  %v8123_v11 = vpop.f32.mrb[21].mxu1  ;;  %6805 = vmatprep.subr.bf16.mxu0 %v6804_v38  ;;  %6837 = vmatprep.subr.bf16.mxu1 %v6836_v41  ;;  %v1758_v32 = vld [vmem:[%s7581_s6 + $0x408] sm:$0xff]  ;;  %v6844_v38 = vpack.c.bf16 %v1774_v19, %v1773_v18  ;;  %v1789_v41 = vld [vmem:[%s7581_s6 + $0x500] sm:$0xff]  ;;  %v8149_v63 = vrot.slane %v8131_v31, %v7983_v58  ;;  %v8153_v52 = vrot.slane %v8131_v31, %v7986_v59 }
 0x85c   :  { %v6846_v53 = vpack.c.bf16 %v1758_v32, %v1757_v57  ;;  %v6878_v3 = vpack.c.bf16 %v1790_v42, %v1789_v41 }
 0x85d   :  { %v1358_v20 = vadd.f32 %v8062_v46, %v8149_v63 }
 0x85e   :  { %6807 = vmatpush3.bf16.msra.mxu0 %v6806_v61  ;;  %6839 = vmatpush3.bf16.msra.mxu1 %v6838_v62  ;;  %v1210_v61 = vadd.f32 %v8046_v29, %v8012_v24  ;;  %v1287_v62 = vadd.f32 %v8048_v30, %v8021_v45  ;;  %v6848_v24 = vpack.c.bf16 %v1776_v50, %v1775_v43  ;;  %v1603_v45 = vmax.f32 %v1279_v48, 0.0  ;;  %v1794_v48 = vld [vmem:[%s7581_s6 + $0x528] sm:$0xff]  ;;  %v1780_v50 = vld [vmem:[%s7581_s6 + $0x4b8] sm:$0xff] }
 0x85f   :  { %6809 = vmatprep.subr.bf16.mxu0 %v6808_v12  ;;  %6841 = vmatprep.subr.bf16.mxu1 %v6840_v13  ;;  %v6880_v29 = vpack.c.bf16 %v1808_v7, %v1807_v16  ;;  %v1208_v30 = vadd.f32 %v8040_v21, %v914_v54  ;;  %v1285_v12 = vadd.f32 %v8042_v22, %v922_v5  ;;  %v1759_v13 = vld [vmem:[%s7581_s6 + $0x410] sm:$0xff]  ;;  %v1777_v21 = vld [vmem:[%s7581_s6 + $0x4a0] sm:$0xff]  ;;  %v1778_v22 = vld [vmem:[%s7581_s6 + $0x4a8] sm:$0xff] }
 0x860   :  { %v1618_v18 = vmax.f32 %v1210_v61, 0.0  ;;  %v1620_v19 = vmax.f32 %v1287_v62, 0.0  ;;  %v1435_v16 = vadd.f32 %v8064_v47, %v8153_v52  ;;  %v1791_v7 = vld [vmem:[%s7581_s6 + $0x510] sm:$0xff]  ;;  %v1809_v54 = vld [vmem:[%s7581_s6 + $0x5a0] sm:$0xff]  ;;  %v1810_v5 = vld [vmem:[%s7581_s6 + $0x5a8] sm:$0xff]  ;;  %v6850_v47 = vpack.c.bf16 %v1760_v17, %v1759_v13 }
 0x861   :  { %v1617_v57 = vmax.f32 %v1208_v30, 0.0  ;;  %v1619_v46 = vmax.f32 %v1285_v12, 0.0  ;;  %v6882_v32 = vpack.c.bf16 %v1792_v23, %v1791_v7  ;;  %v6852_v42 = vpack.c.bf16 %v1778_v22, %v1777_v21  ;;  %v1811_v61 = vld [vmem:[%s7581_s6 + $0x5b0] sm:$0xff]  ;;  %v1812_v62 = vld [vmem:[%s7581_s6 + $0x5b8] sm:$0xff]  ;;  %v1781_v13 = vld [vmem:[%s7581_s6 + $0x4c0] sm:$0xff] }
 0x862   :  { %6811 = vmatpush3.bf16.msra.mxu0 %v6810_v33  ;;  %6843 = vmatpush3.bf16.msra.mxu1 %v6842_v34  ;;  %v1761_v33 = vld [vmem:[%s7581_s6 + $0x420] sm:$0xff]  ;;  %v1762_v34 = vld [vmem:[%s7581_s6 + $0x428] sm:$0xff]  ;;  %v1608_v41 = vmax.f32 %v1435_v16, 0.0  ;;  %v6884_v43 = vpack.c.bf16 %v1810_v5, %v1809_v54  ;;  %v1795_v30 = vld [vmem:[%s7581_s6 + $0x530] sm:$0xff] }
 0x863   :  { %6845 = vmatprep.subr.bf16.mxu0 %v6844_v38  ;;  %6877 = vmatprep.subr.bf16.mxu1 %v6876_v49  ;;  %v1606_v38 = vmax.f32 %v1358_v20, 0.0  ;;  %v1779_v49 = vld [vmem:[%s7581_s6 + $0x4b0] sm:$0xff]  ;;  %v1796_v12 = vld [vmem:[%s7581_s6 + $0x538] sm:$0xff]  ;;  %v1782_v17 = vld [vmem:[%s7581_s6 + $0x4c8] sm:$0xff] }
 0x864   :  { %v6890_v16 = vpack.c.bf16 %v1796_v12, %v1795_v30  ;;  %v1765_v7 = vld [vmem:[%s7581_s6 + $0x440] sm:$0xff]  ;;  %v1766_v23 = vld [vmem:[%s7581_s6 + $0x448] sm:$0xff]  ;;  %v6860_v21 = vpack.c.bf16 %v1782_v17, %v1781_v13  ;;  %v1787_v13 = vld [vmem:[%s7581_s6 + $0x4f0] sm:$0xff] }
 0x865   :  { %2107 = vmatmul.mubr.f32.vlgmr.msra.gmra.mrb[28].mxu0 %v1601_v4  ;;  %2182 = vmatmul.mubr.f32.vlgmr.msra.gmra.mrb[26].mxu1 %v1603_v45  ;;  %v6856_v4 = vpack.c.bf16 %v1780_v50, %v1779_v49  ;;  %v6888_v45 = vpack.c.bf16 %v1812_v62, %v1811_v61  ;;  %v1797_v54 = vld [vmem:[%s7581_s6 + $0x540] sm:$0xff]  ;;  %v1798_v5 = vld [vmem:[%s7581_s6 + $0x548] sm:$0xff]  ;;  %v1788_v17 = vld [vmem:[%s7581_s6 + $0x4f8] sm:$0xff] }
 0x866   :  { %2111 = vmatprep.mubr.f32.mxu0 %v1618_v18  ;;  %2186 = vmatprep.mubr.f32.mxu1 %v1620_v19  ;;  %v1813_v18 = vld [vmem:[%s7581_s6 + $0x5c0] sm:$0xff]  ;;  %v1814_v19 = vld [vmem:[%s7581_s6 + $0x5c8] sm:$0xff] }
 0x867   :  { %6847 = vmatpush3.bf16.msra.mxu0 %v6846_v53  ;;  %6879 = vmatpush3.bf16.msra.mxu1 %v6878_v3  ;;  %v6854_v53 = vpack.c.bf16 %v1762_v34, %v1761_v33  ;;  %v6886_v3 = vpack.c.bf16 %v1794_v48, %v1793_v44  ;;  %v6892_v22 = vpack.c.bf16 %v1814_v19, %v1813_v18  ;;  %v1799_v44 = vld [vmem:[%s7581_s6 + $0x550] sm:$0xff]  ;;  %v1800_v48 = vld [vmem:[%s7581_s6 + $0x558] sm:$0xff]  ;;  %v1785_v49 = vld [vmem:[%s7581_s6 + $0x4e0] sm:$0xff] }
 0x868   :  { %6849 = vmatprep.subr.bf16.mxu0 %v6848_v24  ;;  %6881 = vmatprep.subr.bf16.mxu1 %v6880_v29  ;;  %v1763_v24 = vld [vmem:[%s7581_s6 + $0x430] sm:$0xff]  ;;  %v1764_v29 = vld [vmem:[%s7581_s6 + $0x438] sm:$0xff]  ;;  %v6862_v33 = vpack.c.bf16 %v1766_v23, %v1765_v7  ;;  %v6894_v34 = vpack.c.bf16 %v1798_v5, %v1797_v54  ;;  %v1786_v50 = vld [vmem:[%s7581_s6 + $0x4e8] sm:$0xff]  ;;  %v938_v54 = vrot.slane %v8131_v31, %v7977_v56 }
 0x869   :  { %2112 = vmatmul.mubr.f32.gmra.mrb[30].mxu0 %v1617_v57  ;;  %2187 = vmatmul.mubr.f32.gmra.mrb[28].mxu1 %v1619_v46  ;;  %v6858_v20 = vpack.c.bf16 %v1764_v29, %v1763_v24  ;;  %v1783_v57 = vld [vmem:[%s7581_s6 + $0x4d0] sm:$0xff]  ;;  %v1784_v46 = vld [vmem:[%s7581_s6 + $0x4d8] sm:$0xff]  ;;  %v1817_v61 = vld [vmem:[%s7581_s6 + $0x5e0] sm:$0xff]  ;;  %v6872_v5 = vpack.c.bf16 %v1788_v17, %v1787_v13 }
 0x86a   :  { %2256 = vmatprep.mubr.f32.mxu0 %v1606_v38  ;;  %2331 = vmatprep.mubr.f32.mxu1 %v1608_v41  ;;  %v1767_v38 = vld [vmem:[%s7581_s6 + $0x450] sm:$0xff]  ;;  %v1768_v41 = vld [vmem:[%s7581_s6 + $0x458] sm:$0xff]  ;;  %v1818_v62 = vld [vmem:[%s7581_s6 + $0x5e8] sm:$0xff]  ;;  %v1439_v17 = vadd.f32 %v8074_v1, %v938_v54 }
 0x86b   :  { %6851 = vmatpush3.bf16.msra.mxu0 %v6850_v47  ;;  %6883 = vmatpush3.bf16.msra.mxu1 %v6882_v32  ;;  %v1815_v47 = vld [vmem:[%s7581_s6 + $0x5d0] sm:$0xff]  ;;  %v1816_v32 = vld [vmem:[%s7581_s6 + $0x5d8] sm:$0xff]  ;;  %v1769_v24 = vld [vmem:[%s7581_s6 + $0x460] sm:$0xff] }
 0x86c   :  { %6853 = vmatprep.subr.bf16.mxu0 %v6852_v42  ;;  %6885 = vmatprep.subr.bf16.mxu1 %v6884_v43  ;;  %v6864_v42 = vpack.c.bf16 %v1784_v46, %v1783_v57  ;;  %v6896_v43 = vpack.c.bf16 %v1816_v32, %v1815_v47  ;;  %v1770_v29 = vld [vmem:[%s7581_s6 + $0x468] sm:$0xff]  ;;  %v1801_v30 = vld [vmem:[%s7581_s6 + $0x560] sm:$0xff]  ;;  %v1819_v18 = vld [vmem:[%s7581_s6 + $0x5f0] sm:$0xff] }
 0x86d   :  { %v1802_v12 = vld [vmem:[%s7581_s6 + $0x568] sm:$0xff]  ;;  %v1820_v19 = vld [vmem:[%s7581_s6 + $0x5f8] sm:$0xff]  ;;  %v1771_v23 = vld [vmem:[%s7581_s6 + $0x470] sm:$0xff] }
 0x86e   :  { %v6902_v7 = vpack.c.bf16 %v1802_v12, %v1801_v30  ;;  %v6904_v57 = vpack.c.bf16 %v1820_v19, %v1819_v18  ;;  %v1804_v46 = vld [vmem:[%s7581_s6 + $0x578] sm:$0xff]  ;;  %v1837_v47 = vld [vmem:[%s7581_s6 + $0x680] sm:$0xff]  ;;  %v1838_v32 = vld [vmem:[%s7581_s6 + $0x688] sm:$0xff]  ;;  %v8237_v30 = vrot.slane %v8131_v31, %v7999_v2 }
 0x86f   :  { %6855 = vmatpush3.bf16.msra.mxu0 %v6854_v53  ;;  %6887 = vmatpush3.bf16.msra.mxu1 %v6886_v3  ;;  %v6866_v53 = vpack.c.bf16 %v1768_v41, %v1767_v38  ;;  %v6898_v3 = vpack.c.bf16 %v1800_v48, %v1799_v44  ;;  %v1821_v38 = vld [vmem:[%s7581_s6 + $0x600] sm:$0xff]  ;;  %v1822_v41 = vld [vmem:[%s7581_s6 + $0x608] sm:$0xff]  ;;  %v6908_v44 = vpack.c.bf16 %v1838_v32, %v1837_v47  ;;  %v1823_v18 = vld [vmem:[%s7581_s6 + $0x610] sm:$0xff] }
 0x870   :  { %6857 = vmatprep.subr.bf16.mxu0 %v6856_v4  ;;  %6889 = vmatprep.subr.bf16.mxu1 %v6888_v45  ;;  %v6868_v4 = vpack.c.bf16 %v1786_v50, %v1785_v49  ;;  %v6900_v45 = vpack.c.bf16 %v1818_v62, %v1817_v61  ;;  %v1853_v48 = vld [vmem:[%s7581_s6 + $0x700] sm:$0xff]  ;;  %v1854_v49 = vld [vmem:[%s7581_s6 + $0x708] sm:$0xff]  ;;  %v1839_v50 = vld [vmem:[%s7581_s6 + $0x690] sm:$0xff]  ;;  %v1433_v62 = vadd.f32 %v8058_v40, %v938_v54 }
 0x871   :  { %v6910_v40 = vpack.c.bf16 %v1822_v41, %v1821_v38  ;;  %v6942_v12 = vpack.c.bf16 %v1854_v49, %v1853_v48  ;;  %v1824_v19 = vld [vmem:[%s7581_s6 + $0x618] sm:$0xff]  ;;  %v1842_v1 = vld [vmem:[%s7581_s6 + $0x6a8] sm:$0xff]  ;;  %v1825_v47 = vld [vmem:[%s7581_s6 + $0x620] sm:$0xff] }
 0x872   :  { %v1874_v54 = vld [vmem:[%s7581_s6 + $0x7a8] sm:$0xff]  ;;  %v1844_v48 = vld [vmem:[%s7581_s6 + $0x6b8] sm:$0xff]  ;;  %v1875_v49 = vld [vmem:[%s7581_s6 + $0x7b0] sm:$0xff] }
 0x873   :  { %6859 = vmatpush3.bf16.msra.mxu0 %v6858_v20  ;;  %6891 = vmatpush3.bf16.msra.mxu1 %v6890_v16  ;;  %v930_v20 = vrot.slane %v8131_v31, %v7974_v55  ;;  %v6870_v16 = vpack.c.bf16 %v1770_v29, %v1769_v24  ;;  %v1871_v24 = vld [vmem:[%s7581_s6 + $0x790] sm:$0xff]  ;;  %v1872_v29 = vld [vmem:[%s7581_s6 + $0x798] sm:$0xff]  ;;  %v1826_v32 = vld [vmem:[%s7581_s6 + $0x628] sm:$0xff] }
 0x874   :  { %6861 = vmatprep.subr.bf16.mxu0 %v6860_v21  ;;  %6893 = vmatprep.subr.bf16.mxu1 %v6892_v22  ;;  %v1772_v21 = vld [vmem:[%s7581_s6 + $0x478] sm:$0xff]  ;;  %v1803_v22 = vld [vmem:[%s7581_s6 + $0x570] sm:$0xff] }
 0x875   :  { %v1356_v61 = vadd.f32 %v8056_v39, %v930_v20  ;;  %v8241_v39 = vrot.slane %v8131_v31, %v8008_v9 }
 0x877   :  { %6863 = vmatpush3.bf16.msra.mxu0 %v6862_v33  ;;  %6895 = vmatpush3.bf16.msra.mxu1 %v6894_v34  ;;  %v1869_v33 = vld [vmem:[%s7581_s6 + $0x780] sm:$0xff]  ;;  %v1870_v34 = vld [vmem:[%s7581_s6 + $0x788] sm:$0xff]  ;;  %v1605_v13 = vmax.f32 %v1356_v61, 0.0  ;;  %v6918_v61 = vpack.c.bf16 %v1826_v32, %v1825_v47 }
 0x878   :  { %6865 = vmatprep.subr.bf16.mxu0 %v6864_v42  ;;  %6897 = vmatprep.subr.bf16.mxu1 %v6896_v43  ;;  %v6874_v42 = vpack.c.bf16 %v1772_v21, %v1771_v23  ;;  %v6906_v43 = vpack.c.bf16 %v1804_v46, %v1803_v22  ;;  %v1512_v23 = vadd.f32 %v8100_v36, %v8237_v30  ;;  %v1855_v22 = vld [vmem:[%s7581_s6 + $0x710] sm:$0xff]  ;;  %v1623_v36 = vmax.f32 %v1439_v17, 0.0  ;;  %v1830_v17 = vld [vmem:[%s7581_s6 + $0x648] sm:$0xff]  ;;  %v1849_v47 = vld [vmem:[%s7581_s6 + $0x6e0] sm:$0xff] }
 0x879   :  { %v1589_v21 = vadd.f32 %v8102_v37, %v8241_v39  ;;  %v6914_v37 = vpack.c.bf16 %v1824_v19, %v1823_v18  ;;  %v1850_v32 = vld [vmem:[%s7581_s6 + $0x6e8] sm:$0xff] }
 0x87b   :  { %6867 = vmatpush3.bf16.msra.mxu0 %v6866_v53  ;;  %6899 = vmatpush3.bf16.msra.mxu1 %v6898_v3  ;;  %v6940_v53 = vpack.c.bf16 %v1870_v34, %v1869_v33  ;;  %v1840_v3 = vld [vmem:[%s7581_s6 + $0x698] sm:$0xff]  ;;  %v1610_v33 = vmax.f32 %v1512_v23, 0.0  ;;  %v1612_v34 = vmax.f32 %v1589_v21, 0.0  ;;  %v1847_v23 = vld [vmem:[%s7581_s6 + $0x6d0] sm:$0xff] }
 0x87c   :  { %6869 = vmatprep.subr.bf16.mxu0 %v6868_v4  ;;  %6901 = vmatprep.subr.bf16.mxu1 %v6900_v45  ;;  %v1364_v4 = vadd.f32 %v8078_v8, %v8149_v63  ;;  %v1441_v45 = vadd.f32 %v8080_v10, %v8153_v52  ;;  %v6912_v8 = vpack.c.bf16 %v1840_v3, %v1839_v50  ;;  %v1607_v10 = vmax.f32 %v1433_v62, 0.0  ;;  %v1876_v50 = vld [vmem:[%s7581_s6 + $0x7b8] sm:$0xff] }
 0x87d   :  { %v6944_v63 = vpack.c.bf16 %v1872_v29, %v1871_v24  ;;  %v1362_v52 = vadd.f32 %v8072_v0, %v930_v20  ;;  %v1841_v0 = vld [vmem:[%s7581_s6 + $0x6a0] sm:$0xff]  ;;  %v1828_v3 = vld [vmem:[%s7581_s6 + $0x638] sm:$0xff]  ;;  %v6952_v29 = vpack.c.bf16 %v1876_v50, %v1875_v49  ;;  %v1866_v50 = vld [vmem:[%s7581_s6 + $0x768] sm:$0xff] }
 0x87e   :  { %v1873_v20 = vld [vmem:[%s7581_s6 + $0x7a0] sm:$0xff]  ;;  %v6916_v38 = vpack.c.bf16 %v1842_v1, %v1841_v0  ;;  %v1848_v21 = vld [vmem:[%s7581_s6 + $0x6d8] sm:$0xff] }
 0x87f   :  { %6871 = vmatpush3.bf16.msra.mxu0 %v6870_v16  ;;  %6903 = vmatpush3.bf16.msra.mxu1 %v6902_v7  ;;  %v1622_v16 = vmax.f32 %v1364_v4, 0.0  ;;  %v1624_v7 = vmax.f32 %v1441_v45, 0.0  ;;  %v6948_v41 = vpack.c.bf16 %v1874_v54, %v1873_v20  ;;  %v1859_v4 = vld [vmem:[%s7581_s6 + $0x730] sm:$0xff]  ;;  %v1860_v45 = vld [vmem:[%s7581_s6 + $0x738] sm:$0xff]  ;;  %v1865_v49 = vld [vmem:[%s7581_s6 + $0x760] sm:$0xff] }
 0x880   :  { %6873 = vmatprep.subr.bf16.mxu0 %v6872_v5  ;;  %6905 = vmatprep.subr.bf16.mxu1 %v6904_v57  ;;  %v1856_v5 = vld [vmem:[%s7581_s6 + $0x718] sm:$0xff]  ;;  %v1621_v57 = vmax.f32 %v1362_v52, 0.0  ;;  %v1829_v52 = vld [vmem:[%s7581_s6 + $0x640] sm:$0xff]  ;;  %v1831_v20 = vld [vmem:[%s7581_s6 + $0x650] sm:$0xff] }
 0x881   :  { %v6946_v46 = vpack.c.bf16 %v1856_v5, %v1855_v22  ;;  %v1879_v22 = vld [vmem:[%s7581_s6 + $0x7d0] sm:$0xff]  ;;  %v1880_v5 = vld [vmem:[%s7581_s6 + $0x7d8] sm:$0xff]  ;;  %v6926_v0 = vpack.c.bf16 %v1830_v17, %v1829_v52  ;;  %v2582_v52 = vld [vmem:[%s7601_s4] sm:$0xff] }
 0x882   :  { %v1832_v54 = vld [vmem:[%s7581_s6 + $0x658] sm:$0xff]  ;;  %v2583_v17 = vld [vmem:[%s7601_s4 + $0x8] sm:$0xff] }
 0x883   :  { %6875 = vmatpush3.bf16.msra.mxu0 %v6874_v42  ;;  %6907 = vmatpush3.bf16.msra.mxu1 %v6906_v43  ;;  %v1857_v42 = vld [vmem:[%s7581_s6 + $0x720] sm:$0xff]  ;;  %v1858_v43 = vld [vmem:[%s7581_s6 + $0x728] sm:$0xff] }
 0x884   :  { %6909 = vmatprep.subr.bf16.mxu0 %v6908_v44  ;;  %6941 = vmatprep.subr.bf16.mxu1 %v6940_v53  ;;  %v1843_v44 = vld [vmem:[%s7581_s6 + $0x6b0] sm:$0xff]  ;;  %v6950_v62 = vpack.c.bf16 %v1858_v43, %v1857_v42  ;;  %v1833_v42 = vld [vmem:[%s7581_s6 + $0x660] sm:$0xff]  ;;  %v1834_v43 = vld [vmem:[%s7581_s6 + $0x668] sm:$0xff] }
 0x885   :  { %v1827_v53 = vld [vmem:[%s7581_s6 + $0x630] sm:$0xff]  ;;  %v6920_v24 = vpack.c.bf16 %v1844_v48, %v1843_v44  ;;  %v6932_v44 = vpack.c.bf16 %v1850_v32, %v1849_v47 }
 0x886   :  { %2257 = vmatmul.mubr.f32.vlgmr.msra.gmra.mrb[32].mxu0 %v1605_v13  ;;  %2332 = vmatmul.mubr.f32.vlgmr.msra.gmra.mrb[30].mxu1 %v1607_v10  ;;  %v6922_v13 = vpack.c.bf16 %v1828_v3, %v1827_v53  ;;  %v6954_v10 = vpack.c.bf16 %v1860_v45, %v1859_v4  ;;  %v1883_v53 = vld [vmem:[%s7581_s6 + $0x7f0] sm:$0xff]  ;;  %v1884_v3 = vld [vmem:[%s7581_s6 + $0x7f8] sm:$0xff]  ;;  %v6966_v4 = vpack.c.bf16 %v1866_v50, %v1865_v49 }
 0x887   :  { %2261 = vmatprep.mubr.f32.mxu0 %v1622_v16  ;;  %2336 = vmatprep.mubr.f32.mxu1 %v1624_v7  ;;  %v1861_v16 = vld [vmem:[%s7581_s6 + $0x740] sm:$0xff]  ;;  %v1862_v7 = vld [vmem:[%s7581_s6 + $0x748] sm:$0xff]  ;;  %v1835_v45 = vld [vmem:[%s7581_s6 + $0x670] sm:$0xff] }
 0x888   :  { %6911 = vmatpush3.bf16.msra.mxu0 %v6910_v40  ;;  %6943 = vmatpush3.bf16.msra.mxu1 %v6942_v12  ;;  %v1845_v40 = vld [vmem:[%s7581_s6 + $0x6c0] sm:$0xff]  ;;  %v1846_v12 = vld [vmem:[%s7581_s6 + $0x6c8] sm:$0xff]  ;;  %v6958_v1 = vpack.c.bf16 %v1862_v7, %v1861_v16 }
 0x889   :  { %6913 = vmatprep.subr.bf16.mxu0 %v6912_v8  ;;  %6945 = vmatprep.subr.bf16.mxu1 %v6944_v63  ;;  %v1877_v8 = vld [vmem:[%s7581_s6 + $0x7c0] sm:$0xff]  ;;  %v1878_v63 = vld [vmem:[%s7581_s6 + $0x7c8] sm:$0xff]  ;;  %v6924_v18 = vpack.c.bf16 %v1846_v12, %v1845_v40  ;;  %v954_v40 = vrot.slane %v8131_v31, %v8098_v35 }
 0x88a   :  { %2262 = vmatmul.mubr.f32.gmra.mrb[34].mxu0 %v1621_v57  ;;  %2337 = vmatmul.mubr.f32.gmra.mrb[32].mxu1 %v1623_v36  ;;  %v6956_v19 = vpack.c.bf16 %v1878_v63, %v1877_v8  ;;  %v6928_v57 = vpack.c.bf16 %v1848_v21, %v1847_v23  ;;  %v6960_v36 = vpack.c.bf16 %v1880_v5, %v1879_v22  ;;  %v1836_v63 = vld [vmem:[%s7581_s6 + $0x678] sm:$0xff]  ;;  %v2584_v22 = vld [vmem:[%s7601_s4 + $0x10] sm:$0xff] }
 0x88b   :  { %2406 = vmatprep.mubr.f32.mxu0 %v1610_v33  ;;  %2481 = vmatprep.mubr.f32.mxu1 %v1612_v34  ;;  %v1881_v33 = vld [vmem:[%s7581_s6 + $0x7e0] sm:$0xff]  ;;  %v1882_v34 = vld [vmem:[%s7581_s6 + $0x7e8] sm:$0xff]  ;;  %v6968_v8 = vpack.c.bf16 %v1884_v3, %v1883_v53  ;;  %v1587_v7 = vadd.f32 %v8093_v28, %v954_v40  ;;  %v1518_v23 = vadd.f32 %v8121_v6, %v8237_v30  ;;  %v2585_v5 = vld [vmem:[%s7601_s4 + $0x18] sm:$0xff]  ;;  %v9002_v28 = vmov 0.0   ;;  %s9016_s4 = sld [smem:[#allocation13_spill]] }
 0x88c   :  { %6915 = vmatpush3.bf16.msra.mxu0 %v6914_v37  ;;  %6947 = vmatpush3.bf16.msra.mxu1 %v6946_v46  ;;  %v1863_v37 = vld [vmem:[%s7581_s6 + $0x750] sm:$0xff]  ;;  %v1864_v46 = vld [vmem:[%s7581_s6 + $0x758] sm:$0xff]  ;;  %v6964_v48 = vpack.c.bf16 %v1882_v34, %v1881_v33  ;;  %v1595_v21 = vadd.f32 %v8123_v11, %v8241_v39  ;;  %v5735_v30 = vld [vmem:[%s7586_s12] ss:$0 sm:$0xff]  ;;  %s9015_s12 = sld [smem:[#allocation15_spill]] }
 0x88d   :  { %6917 = vmatprep.subr.bf16.mxu0 %v6916_v38  ;;  %6949 = vmatprep.subr.bf16.mxu1 %v6948_v41  ;;  %v6930_v38 = vpack.c.bf16 %v1832_v54, %v1831_v20  ;;  %v6962_v41 = vpack.c.bf16 %v1864_v46, %v1863_v37  ;;  %v1626_v54 = vmax.f32 %v1518_v23, 0.0 }
 0x890   :  { %6919 = vmatpush3.bf16.msra.mxu0 %v6918_v61  ;;  %6951 = vmatpush3.bf16.msra.mxu1 %v6950_v62  ;;  %v1851_v61 = vld [vmem:[%s7581_s6 + $0x6f0] sm:$0xff]  ;;  %v1852_v62 = vld [vmem:[%s7581_s6 + $0x6f8] sm:$0xff] }
 0x891   :  { %6921 = vmatprep.subr.bf16.mxu0 %v6920_v24  ;;  %6953 = vmatprep.subr.bf16.mxu1 %v6952_v29  ;;  %v946_v24 = vrot.slane %v8131_v31, %v8089_v26  ;;  %v6934_v29 = vpack.c.bf16 %v1834_v43, %v1833_v42  ;;  %v6936_v12 = vpack.c.bf16 %v1852_v62, %v1851_v61 }
 0x892   :  { %v6972_v31 = vpack.c.bf16 %v2583_v17, %v2582_v52 }
 0x893   :  { %v1510_v16 = vadd.f32 %v8091_v27, %v946_v24  ;;  %v1516_v20 = vadd.f32 %v8112_v51, %v946_v24  ;;  %v1593_v27 = vadd.f32 %v8114_v60, %v954_v40 }
 0x894   :  { %6923 = vmatpush3.bf16.msra.mxu0 %v6922_v13  ;;  %6955 = vmatpush3.bf16.msra.mxu1 %v6954_v10  ;;  %v1867_v13 = vld [vmem:[%s7581_s6 + $0x770] sm:$0xff]  ;;  %v1868_v10 = vld [vmem:[%s7581_s6 + $0x778] sm:$0xff]  ;;  %s9014_s6 = sld [smem:[#allocation19_spill]] }
 0x895   :  { %6925 = vmatprep.subr.bf16.mxu0 %v6924_v18  ;;  %6957 = vmatprep.subr.bf16.mxu1 %v6956_v19  ;;  %v6938_v18 = vpack.c.bf16 %v1836_v63, %v1835_v45  ;;  %v6970_v19 = vpack.c.bf16 %v1868_v10, %v1867_v13  ;;  %v1625_v6 = vmax.f32 %v1516_v20, 0.0  ;;  %v1627_v11 = vmax.f32 %v1593_v27, 0.0 }
 0x898   :  { %6927 = vmatpush3.bf16.msra.mxu0 %v6926_v0  ;;  %6959 = vmatpush3.bf16.msra.mxu1 %v6958_v1  ;;  %v1609_v0 = vmax.f32 %v1510_v16, 0.0  ;;  %v1611_v1 = vmax.f32 %v1587_v7, 0.0 }
 0x899   :  { %6929 = vmatprep.subr.bf16.mxu0 %v6928_v57  ;;  %6961 = vmatprep.subr.bf16.mxu1 %v6960_v36  ;;  %v1628_v57 = vmax.f32 %v1595_v21, 0.0  ;;  %v6976_v36 = vpack.c.bf16 %v2585_v5, %v2584_v22 }
 0x89c   :  { %6931 = vmatpush3.bf16.msra.mxu0 %v6930_v38  ;;  %6963 = vmatpush3.bf16.msra.mxu1 %v6962_v41 }
 0x89d   :  { %6933 = vmatprep.subr.bf16.mxu0 %v6932_v44  ;;  %6965 = vmatprep.subr.bf16.mxu1 %v6964_v48 }
 0x8a0   :  { %6935 = vmatpush3.bf16.msra.mxu0 %v6934_v29  ;;  %6967 = vmatpush3.bf16.msra.mxu1 %v6966_v4 }
 0x8a1   :  { %6937 = vmatprep.subr.bf16.mxu0 %v6936_v12  ;;  %6969 = vmatprep.subr.bf16.mxu1 %v6968_v8 }
 0x8a4   :  { %6939 = vmatpush3.bf16.msra.mxu0 %v6938_v18  ;;  %6971 = vmatpush3.bf16.msra.mxu1 %v6970_v19 }
 0x8a5   :  { %6973 = vmatprep.subr.bf16.mxu0 %v6972_v31  ;;  %6542 = vmatprep.subr.mxu1 %v9002_v28 }
 0x8a7   :  { %2407 = vmatmul.mubr.f32.vlgmr.msra.gmra.mrb[36].mxu0 %v1609_v0  ;;  %2482 = vmatmul.mubr.f32.vlgmr.msra.gmra.mrb[34].mxu1 %v1611_v1 }
 0x8a8   :  { %2411 = vmatprep.mubr.f32.mxu0 %v1626_v54  ;;  %2486 = vmatprep.mubr.f32.mxu1 %v1628_v57 }
 0x8a9   :  { %6975 = vmatpush3.bf16.msra.mxu0 %v6972_v31 }
 0x8aa   :  { %6977 = vmatprep.subr.bf16.mxu0 %v6976_v36 }
 0x8ab   :  { %2412 = vmatmul.mubr.f32.gmra.mrb[38].mxu0 %v1625_v6  ;;  %2487 = vmatmul.mubr.f32.gmra.mrb[36].mxu1 %v1627_v11 }
 0x8ac   :  { %6534 = vmatprep.mubr.msk.f32.mxu0 %vm275_vm1, %v7732_v14  ;;  %6544 = vmatprep.mubr.msk.f32.mxu1 %vm7503_vm2, %v9002_v28 }
 0x8ad   :  { %6979 = vmatpush3.bf16.msra.mxu0 %v6976_v36 }
 0x8ae   :  { %6537 = vmatprep.subr.mxu0 %v9002_v28 }
 0x8b0   :  { %6535 = vmatmul.mubr.msk.f32.vlgmr.msra.gmra.mrb[40].mxu0 %vm275_vm1, %v7734_v15 }
 0x8b1   :  { %6539 = vmatprep.mubr.msk.f32.mxu0 %vm7503_vm2, %v9002_v28 }
 0x918   :  { %v5850_v51 = vpop.f32.mrb[24].mxu0  ;;  %v5888_v60 = vpop.f32.mrb[22].mxu1 }
 0x919   :  { %v5851_v39 = vpop.f32.mrb[25].mxu0  ;;  %v5889_v37 = vpop.f32.mrb[23].mxu1 }
 0x91a   :  { %v5852_v46 = vadd.f32 %v5851_v39, %v5850_v51  ;;  %v5890_v47 = vadd.f32 %v5889_v37, %v5888_v60 }
 0x91c   :  { %v1959_v32 = vadd.f32 %v5852_v46, %v5735_v30  ;;  %v5853_v33 = vpop.f32.mrb[26].mxu0  ;;  %v5891_v34 = vpop.f32.mrb[24].mxu1 }
 0x91d   :  { %v5854_v38 = vpop.f32.mrb[27].mxu0  ;;  %v5892_v41 = vpop.f32.mrb[25].mxu1 }
 0x91e   :  { %v2034_v42 = vadd.f32 %v5890_v47, %v1959_v32  ;;  %v5855_v43 = vadd.f32 %v5854_v38, %v5853_v33  ;;  %v5893_v44 = vadd.f32 %v5892_v41, %v5891_v34  ;;  %v5740_v41 = vld [vmem:[%s9003_s9] ss:$0 sm:$0xff] }
 0x920   :  { %v1964_v48 = vadd.f32 %v5855_v43, %v5735_v30 }
 0x922   :  { %v2039_v49 = vadd.f32 %v5893_v44, %v1964_v48 }
 0x938   :  { %v5926_v50 = vpop.f32.mrb[28].mxu0  ;;  %v5964_v61 = vpop.f32.mrb[26].mxu1 }
 0x939   :  { %v5927_v62 = vpop.f32.mrb[29].mxu0  ;;  %v5965_v53 = vpop.f32.mrb[27].mxu1 }
 0x93a   :  { %v5928_v3 = vadd.f32 %v5927_v62, %v5926_v50  ;;  %v5966_v24 = vadd.f32 %v5965_v53, %v5964_v61 }
 0x93c   :  { %v2109_v29 = vadd.f32 %v5928_v3, %v2034_v42  ;;  %v5929_v4 = vpop.f32.mrb[30].mxu0  ;;  %v5967_v45 = vpop.f32.mrb[28].mxu1 }
 0x93d   :  { %v5930_v40 = vpop.f32.mrb[31].mxu0  ;;  %v5968_v12 = vpop.f32.mrb[29].mxu1 }
 0x93e   :  { %v2184_v8 = vadd.f32 %v5966_v24, %v2109_v29  ;;  %v5931_v63 = vadd.f32 %v5930_v40, %v5929_v4  ;;  %v5969_v13 = vadd.f32 %v5968_v12, %v5967_v45 }
 0x940   :  { %v2114_v10 = vadd.f32 %v5931_v63, %v2039_v49 }
 0x942   :  { %v2189_v52 = vadd.f32 %v5969_v13, %v2114_v10 }
 0x959   :  { %v6002_v17 = vpop.f32.mrb[32].mxu0  ;;  %v6040_v18 = vpop.f32.mrb[30].mxu1 }
 0x95a   :  { %v6003_v19 = vpop.f32.mrb[33].mxu0  ;;  %v6041_v16 = vpop.f32.mrb[31].mxu1 }
 0x95b   :  { %v6004_v7 = vadd.f32 %v6003_v19, %v6002_v17  ;;  %v6042_v31 = vadd.f32 %v6041_v16, %v6040_v18 }
 0x95d   :  { %v2259_v23 = vadd.f32 %v6004_v7, %v2184_v8  ;;  %v6005_v21 = vpop.f32.mrb[34].mxu0  ;;  %v6043_v22 = vpop.f32.mrb[32].mxu1 }
 0x95e   :  { %v6006_v5 = vpop.f32.mrb[35].mxu0  ;;  %v6044_v0 = vpop.f32.mrb[33].mxu1 }
 0x95f   :  { %v2334_v1 = vadd.f32 %v6042_v31, %v2259_v23  ;;  %v6007_v20 = vadd.f32 %v6006_v5, %v6005_v21  ;;  %v6045_v27 = vadd.f32 %v6044_v0, %v6043_v22  ;;  %v9004_v21 = vld [vmem:[#allocation29_spill] sm:$0xff] }
 0x961   :  { %v2264_v54 = vadd.f32 %v6007_v20, %v2189_v52 }
 0x963   :  { %v2339_v57 = vadd.f32 %v6045_v27, %v2264_v54 }
 0x97a   :  { %v6078_v36 = vpop.f32.mrb[36].mxu0  ;;  %v6116_v6 = vpop.f32.mrb[34].mxu1 }
 0x97b   :  { %v6079_v11 = vpop.f32.mrb[37].mxu0  ;;  %v6117_v51 = vpop.f32.mrb[35].mxu1 }
 0x97c   :  { %v6080_v60 = vadd.f32 %v6079_v11, %v6078_v36  ;;  %v6118_v30 = vadd.f32 %v6117_v51, %v6116_v6 }
 0x97e   :  { %v2409_v39 = vadd.f32 %v6080_v60, %v2334_v1  ;;  %v6081_v37 = vpop.f32.mrb[38].mxu0  ;;  %v6119_v46 = vpop.f32.mrb[36].mxu1 }
 0x97f   :  { %v6082_v47 = vpop.f32.mrb[39].mxu0  ;;  %v6120_v32 = vpop.f32.mrb[37].mxu1 }
 0x980   :  { %v2484_v33 = vadd.f32 %v6118_v30, %v2409_v39  ;;  %v6083_v34 = vadd.f32 %v6082_v47, %v6081_v37  ;;  %v6121_v38 = vadd.f32 %v6120_v32, %v6119_v46 }
 0x982   :  { %v2414_v42 = vadd.f32 %v6083_v34, %v2339_v57  ;;  %v2492_v22 = vadd.f32 %v2484_v33, %v9004_v21  ;;  %v2998_v33 = vld [vmem:[%s9005_s13] sm:$0xff]  ;;  %v2999_v34 = vld [vmem:[%s9005_s13 + $0x8] sm:$0xff] }
 0x983   :  { %v6536_v43 = vpop.f32.mrb[40].mxu0 }
 0x984   :  { %v2489_v44 = vadd.f32 %v6121_v38, %v2414_v42  ;;  %v2665_v48 = vadd.f32 %v6536_v43, %v5740_v41  ;;  %v2659_v49 = vpop.f32.mrb[41].mxu0  ;;  %v2494_v5 = vsel %vm275_vm1, %v2492_v22, 0.0  ;;  %v6980_v38 = vpack.c.bf16 %v2999_v34, %v2998_v33  ;;  %v3001_v42 = vld [vmem:[%s9005_s13 + $0x18] sm:$0xff] }
 0x985   :  { %v2660_v50 = vadd.f32 %v5740_v41, %v2659_v49  ;;  %v3000_v41 = vld [vmem:[%s9005_s13 + $0x10] sm:$0xff] }
 0x986   :  { %2746 = vrot.lane.b32.xlu1 %v2665_v48, %s7504_s0  ;;  %v2493_v8 = vadd.f32 %v2489_v44, %v7832_v25  ;;  %v6984_v43 = vpack.c.bf16 %v3001_v42, %v3000_v41 }
 0x987   :  { %2669 = vrot.lane.b32.xlu0 %v2660_v50, %s7504_s0 }
 0x988   :  { %v2497_v63 = vsel %vm275_vm1, %v2493_v8, 0.0 }
 0x9f8   :  { %v2747_v61 = vpop.permute.xlu1 %2746 }
 0x9f9   :  { %6543 = vmatpush3.xpose.msk.msra.mxu1 %vm275_vm1, %v2747_v61  ;;  %v2670_v62 = vpop.permute.xlu0 %2669 }
 0x9fa   :  { %6538 = vmatpush3.xpose.msk.msra.mxu0 %vm275_vm1, %v2670_v62  ;;  %6552 = vmatprep.subr.mxu1 %v9002_v28 }
 0x9fb   :  { %6547 = vmatprep.subr.mxu0 %v9002_v28 }
 0x9fc   :  { %6545 = vmatmul.mubr.msk.f32.vlgmr.msra.gmra.mrb[38].mxu1 %vm275_vm1, %v2665_v48 }
 0x9fd   :  { %6540 = vmatmul.mubr.msk.f32.vlgmr.msra.gmra.mrb[42].mxu0 %vm275_vm1, %v2660_v50  ;;  %6554 = vmatprep.mubr.msk.f32.mxu1 %vm7503_vm2, %v9002_v28 }
 0x9fe   :  { %6549 = vmatprep.mubr.msk.f32.mxu0 %vm7503_vm2, %v9002_v28 }
 0xacf   :  { %v2818_v53 = vpop.f32.mrb[38].mxu1 }
 0xad0   :  { %v2823_v3 = vmul.f32 0.17677669, %v2818_v53  ;;  %v2741_v24 = vpop.f32.mrb[42].mxu0  ;;  %v6546_v29 = vpop.f32.mrb[39].mxu1 }
 0xad1   :  { %v2822_v4 = vmul.f32 0.17677669, %v2741_v24  ;;  %v6541_v45 = vpop.f32.mrb[43].mxu0  ;;  %v5737_v29 = vld [vmem:[%s9007_s21] ss:$0 sm:$0xff] }
 0xad2   :  { %v2827_v40 = vsel %vm513_vm3, %v2823_v3, -inf }
 0xad3   :  { %2828 = vmax.xlane.f32.xlu1 %v2827_v40  ;;  %v2824_v12 = vsel %vm513_vm3, %v2822_v4, -inf }
 0xad4   :  { %2825 = vmax.xlane.f32.xlu0 %v2824_v12 }
 0xae4   :  { %2922 = vrot.lane.b32.xlu1 %v2665_v48, %s7505_s5 }
 0xb08   :  { %2498 = vadd.xlane.f32.xlu1 %v2497_v63 }
 0xb60   :  { %v2829_v13 = vpop.xlane.xlu1 %2828 }
 0xb61   :  { %v2831_v10 = vsub.f32 %v2823_v3, %v2829_v13  ;;  %v2826_v52 = vpop.xlane.xlu0 %2825  ;;  %v5736_v3 = vld [vmem:[%s9006_s17] ss:$0 sm:$0xff] }
 0xb62   :  { %v2830_v17 = vsub.f32 %v2822_v4, %v2826_v52 }
 0xb63   :  { %v2834_v18 = vmul.f32 1.442695, %v2831_v10 }
 0xb64   :  { %v2832_v19 = vmul.f32 1.442695, %v2830_v17  ;;  %v2923_v16 = vpop.permute.xlu1 %2922 }
 0xb65   :  { %7397 = vpow2.f32 %v2834_v18  ;;  %6553 = vmatpush3.msra.mxu1 %v2923_v16 }
 0xb66   :  { %7399 = vpow2.f32 %v2832_v19 }
 0xb6f   :  { %v7398_v7 = vpop.eup %7397 }
 0xb70   :  { %v2839_v31 = vsel %vm513_vm3, %v7398_v7, 0.0  ;;  %v7400_v23 = vpop.eup %7399 }
 0xb71   :  { %2840 = vadd.xlane.f32.xlu0 %v2839_v31  ;;  %v2836_v25 = vsel %vm513_vm3, %v7400_v23, 0.0 }
 0xb75   :  { %2837 = vadd.xlane.f32.xlu0 %v2836_v25  ;;  %v5749_v25 = vld [vmem:[%s9008_s25] ss:$0 sm:$0xff] }
 0xb8b   :  { %2846 = vrot.lane.b32.xlu0 %v2660_v50, %s7505_s5 }
 0xb95   :  { %v2499_v6 = vpop.xlane.xlu1 %2498 }
 0xb96   :  { %v2501_v11 = vmul.f32 0.03125, %v2499_v6 }
 0xb98   :  { %v2503_v30 = vsub.f32 %v2493_v8, %v2501_v11 }
 0xb9a   :  { %v2505_v47 = vmul.f32 %v2503_v30, %v2503_v30 }
 0xb9c   :  { %v2509_v32 = vsel %vm275_vm1, %v2505_v47, 0.0 }
 0xbaa   :  { %2495 = vadd.xlane.f32.xlu0 %v2494_v5 }
 0xbfe   :  { %v2841_v0 = vpop.xlane.xlu0 %2840 }
 0xbff   :  { %7401 = vrcp.f32 %v2841_v0 }
 0xc02   :  { %v2838_v1 = vpop.xlane.xlu0 %2837 }
 0xc03   :  { %7403 = vrcp.f32 %v2838_v1 }
 0xc06   :  { %v2847_v20 = vpop.permute.xlu0 %2846 }
 0xc07   :  { %6548 = vmatpush3.msra.mxu0 %v2847_v20 }
 0xc08   :  { %6981 = vmatprep.subr.bf16.mxu0 %v6980_v38 }
 0xc09   :  { %v7402_v27 = vpop.eup %7401 }
 0xc0a   :  { %v2845_v54 = vmul.f32 %v7402_v27, %v7398_v7 }
 0xc0c   :  { %6555 = vmatmul.mubr.msk.f32.vlgmr.msra.gmra.mrb[40].mxu1 %vm513_vm3, %v2845_v54 }
 0xc0d   :  { %v7404_v57 = vpop.eup %7403 }
 0xc0e   :  { %v2844_v36 = vmul.f32 %v7404_v57, %v7400_v23 }
 0xc10   :  { %6550 = vmatmul.mubr.msk.f32.vlgmr.msra.gmra.mrb[44].mxu0 %vm513_vm3, %v2844_v36 }
 0xc11   :  { %6983 = vmatpush3.bf16.msra.mxu0 %v6980_v38 }
 0xc12   :  { %6985 = vmatprep.subr.bf16.mxu0 %v6984_v43 }
 0xc15   :  { %6987 = vmatpush3.bf16.msra.mxu0 %v6984_v43 }
 0xc37   :  { %v2496_v51 = vpop.xlane.xlu0 %2495 }
 0xc38   :  { %v2500_v60 = vmul.f32 0.03125, %v2496_v51 }
 0xc3a   :  { %v2502_v39 = vsub.f32 %v2492_v22, %v2500_v60 }
 0xc3c   :  { %v2504_v37 = vmul.f32 %v2502_v39, %v2502_v39 }
 0xc3e   :  { %v2506_v46 = vsel %vm275_vm1, %v2504_v37, 0.0  ;;  %v3231_v37 = vld [vmem:[%s9009_s29 + $0x18] sm:$0xff] }
 0xc3f   :  { %2507 = vadd.xlane.f32.xlu0 %v2506_v46 }
 0xc43   :  { %2510 = vadd.xlane.f32.xlu0 %v2509_v32 }
 0xccc   :  { %v2508_v44 = vpop.xlane.xlu0 %2507 }
 0xccd   :  { %v2512_v48 = vmul.f32 0.03125, %v2508_v44 }
 0xccf   :  { %v2514_v49 = vadd.f32 1e-05, %v2512_v48 }
 0xcd0   :  { %v2511_v50 = vpop.xlane.xlu0 %2510 }
 0xcd1   :  { %7405 = vrsqrt.f32 %v2514_v49  ;;  %v2513_v61 = vmul.f32 0.03125, %v2511_v50 }
 0xcd3   :  { %v2515_v62 = vadd.f32 1e-05, %v2513_v61 }
 0xcd5   :  { %7407 = vrsqrt.f32 %v2515_v62 }
 0xcdb   :  { %v7406_v53 = vpop.eup %7405 }
 0xcdc   :  { %v2518_v24 = vmul.f32 %v7406_v53, %v2502_v39 }
 0xcde   :  { %v2527_v4 = vmul.f32 %v5736_v3, %v2518_v24 }
 0xcdf   :  { %v7408_v45 = vpop.eup %7407  ;;  %v2994_v40 = vpop.f32.mrb[40].mxu1 }
 0xce0   :  { %v6556_v12 = vpop.f32.mrb[41].mxu1  ;;  %v2536_v8 = vadd.f32 %v5737_v29, %v2527_v4  ;;  %v2519_v63 = vmul.f32 %v7408_v45, %v2503_v30  ;;  %v3228_v30 = vld [vmem:[%s9009_s29] sm:$0xff] }
 0xce2   :  { %v2538_v13 = vsel %vm275_vm1, %v2536_v8, 0.0  ;;  %v2528_v10 = vmul.f32 %v5736_v3, %v2519_v63 }
 0xce3   :  { %v2918_v52 = vpop.f32.mrb[44].mxu0  ;;  %2539 = vadd.xlane.f32.xlu0 %v2538_v13 }
 0xce4   :  { %v6551_v17 = vpop.f32.mrb[45].mxu0  ;;  %6565 = vmatprep.mubr.msk.f32.mxu0 %vm275_vm1, %v2918_v52  ;;  %v2537_v18 = vadd.f32 %v5737_v29, %v2528_v10  ;;  %v5738_v29 = vld [vmem:[%s9010_s3] ss:$0 sm:$0xff] }
 0xce5   :  { %6566 = vmatmul.mubr.msk.f32.vlgmr.msra.gmra.mrb[46].mxu0 %vm275_vm1, %v2994_v40  ;;  %v3136_v52 = vld [vmem:[%s9012_s24] sm:$0xff]  ;;  %v3137_v17 = vld [vmem:[%s9012_s24 + $0x8] sm:$0xff] }
 0xce6   :  { %v2541_v19 = vsel %vm275_vm1, %v2537_v18, 0.0 }
 0xce7   :  { %2542 = vadd.xlane.f32.xlu1 %v2541_v19  ;;  %v3138_v19 = vld [vmem:[%s9012_s24 + $0x10] sm:$0xff] }
 0xd70   :  { %v2540_v7 = vpop.xlane.xlu0 %2539 }
 0xd71   :  { %v2544_v23 = vmul.f32 0.03125, %v2540_v7 }
 0xd73   :  { %v2546_v1 = vsub.f32 %v2536_v8, %v2544_v23  ;;  %v5739_v8 = vld [vmem:[%s9011_s8] ss:$0 sm:$0xff] }
 0xd74   :  { %v2543_v16 = vpop.xlane.xlu1 %2542 }
 0xd75   :  { %v2545_v31 = vmul.f32 0.03125, %v2543_v16  ;;  %v2548_v11 = vmul.f32 %v2546_v1, %v2546_v1  ;;  %v3139_v16 = vld [vmem:[%s9012_s24 + $0x18] sm:$0xff] }
 0xd76   :  { %v6992_v7 = vpack.c.bf16 %v3139_v16, %v3138_v19 }
 0xd77   :  { %v2547_v22 = vsub.f32 %v2537_v18, %v2545_v31  ;;  %v2550_v60 = vsel %vm275_vm1, %v2548_v11, 0.0  ;;  %v6988_v18 = vpack.c.bf16 %v3137_v17, %v3136_v52 }
 0xd79   :  { %v2549_v36 = vmul.f32 %v2547_v22, %v2547_v22  ;;  %6989 = vmatprep.subr.bf16.mxu1 %v6988_v18 }
 0xd7a   :  { %6991 = vmatpush3.bf16.msra.mxu1 %v6988_v18 }
 0xd7b   :  { %v2553_v51 = vsel %vm275_vm1, %v2549_v36, 0.0  ;;  %6993 = vmatprep.subr.bf16.mxu1 %v6992_v7  ;;  %v5753_v36 = vld [vmem:[%s9014_s6] ss:$0 sm:$0xff] }
 0xd7e   :  { %6995 = vmatpush3.bf16.msra.mxu1 %v6992_v7 }
 0xd7f   :  { %6590 = vmatprep.subr.mxu1 %v9002_v28 }
 0xdb8   :  { %v6567_v21 = vpop.f32.mrb[46].mxu0 }
 0xdb9   :  { %v3087_v5 = vadd.f32 %v6567_v21, %v5749_v25  ;;  %v3081_v0 = vpop.f32.mrb[47].mxu0 }
 0xdba   :  { %v3082_v20 = vadd.f32 %v5749_v25, %v3081_v0 }
 0xdbb   :  { %v3091_v27 = vadd.f32 %v3087_v5, %v7734_v15  ;;  %v3229_v15 = vld [vmem:[%s9009_s29 + $0x8] sm:$0xff] }
 0xdbc   :  { %v3090_v54 = vadd.f32 %v3082_v20, %v7732_v14  ;;  %v6996_v39 = vpack.c.bf16 %v3229_v15, %v3228_v30  ;;  %v3230_v14 = vld [vmem:[%s9009_s29 + $0x10] sm:$0xff] }
 0xdbd   :  { %v3095_v57 = vsel %vm275_vm1, %v3091_v27, 0.0  ;;  %v7000_v46 = vpack.c.bf16 %v3231_v37, %v3230_v14  ;;  %v5754_v37 = vld [vmem:[%s9016_s4] ss:$0 sm:$0xff] }
 0xdbe   :  { %3096 = vadd.xlane.f32.xlu1 %v3095_v57  ;;  %v3092_v6 = vsel %vm275_vm1, %v3090_v54, 0.0  ;;  %6997 = vmatprep.subr.bf16.mxu0 %v6996_v39 }
 0xdbf   :  { %3093 = vadd.xlane.f32.xlu0 %v3092_v6  ;;  %6999 = vmatpush3.bf16.msra.mxu0 %v6996_v39 }
 0xdc0   :  { %7001 = vmatprep.subr.bf16.mxu0 %v7000_v46 }
 0xdc2   :  { %2554 = vadd.xlane.f32.xlu1 %v2553_v51 }
 0xdc3   :  { %2551 = vadd.xlane.f32.xlu0 %v2550_v60  ;;  %7003 = vmatpush3.bf16.msra.mxu0 %v7000_v46  ;;  %v5757_v60 = vld [vmem:[%s9015_s12] ss:$0 sm:$0xff] }
 0xdc4   :  { %6600 = vmatprep.subr.mxu0 %v9002_v28 }
 0xe4b   :  { %v3097_v47 = vpop.xlane.xlu1 %3096 }
 0xe4c   :  { %v3099_v32 = vmul.f32 0.03125, %v3097_v47  ;;  %v3094_v33 = vpop.xlane.xlu0 %3093 }
 0xe4d   :  { %v3098_v34 = vmul.f32 0.03125, %v3094_v33 }
 0xe4e   :  { %v3101_v38 = vsub.f32 %v3091_v27, %v3099_v32 }
 0xe4f   :  { %v3100_v41 = vsub.f32 %v3090_v54, %v3098_v34  ;;  %v2555_v42 = vpop.xlane.xlu1 %2554 }
 0xe50   :  { %v2557_v43 = vmul.f32 0.03125, %v2555_v42  ;;  %v2552_v44 = vpop.xlane.xlu0 %2551  ;;  %v3103_v48 = vmul.f32 %v3101_v38, %v3101_v38 }
 0xe51   :  { %v2556_v49 = vmul.f32 0.03125, %v2552_v44  ;;  %v3102_v50 = vmul.f32 %v3100_v41, %v3100_v41 }
 0xe52   :  { %v2559_v61 = vadd.f32 1e-05, %v2557_v43  ;;  %v3107_v62 = vsel %vm275_vm1, %v3103_v48, 0.0 }
 0xe53   :  { %v2558_v53 = vadd.f32 1e-05, %v2556_v49  ;;  %3108 = vadd.xlane.f32.xlu1 %v3107_v62  ;;  %v3104_v3 = vsel %vm275_vm1, %v3102_v50, 0.0 }
 0xe54   :  { %7409 = vrsqrt.f32 %v2559_v61  ;;  %3105 = vadd.xlane.f32.xlu0 %v3104_v3 }
 0xe55   :  { %7411 = vrsqrt.f32 %v2558_v53 }
 0xe5e   :  { %v7410_v24 = vpop.eup %7409 }
 0xe5f   :  { %v7412_v4 = vpop.eup %7411  ;;  %v2563_v45 = vmul.f32 %v7410_v24, %v2547_v22 }
 0xe60   :  { %v2562_v40 = vmul.f32 %v7412_v4, %v2546_v1  ;;  %v5752_v1 = vld [vmem:[%s9013_s30] ss:$0 sm:$0xff] }
 0xe61   :  { %v2572_v12 = vmul.f32 %v5738_v29, %v2563_v45 }
 0xe62   :  { %v2571_v63 = vmul.f32 %v5738_v29, %v2562_v40 }
 0xe63   :  { %v2581_v10 = vadd.f32 %v5739_v8, %v2572_v12  ;;  %v3648_v12 = vld [vmem:[%s9017_s7] sm:$0xff] }
 0xe64   :  { %v2580_v13 = vadd.f32 %v5739_v8, %v2571_v63  ;;  %v3649_v8 = vld [vmem:[%s9017_s7 + $0x8] sm:$0xff] }
 0xe66   :  { %6587 = vmatprep.mubr.msk.f32.mxu0 %vm275_vm1, %v2580_v13  ;;  %v7004_v13 = vpack.c.bf16 %v3649_v8, %v3648_v12  ;;  %v3834_v12 = vld [vmem:[%s9019_s11 + $0x180] sm:$0xff] }
 0xe67   :  { %6588 = vmatmul.mubr.msk.f32.vlgmr.msra.gmra.mrb[48].mxu0 %vm275_vm1, %v2581_v10 }
 0xe68   :  { %6602 = vmatprep.mubr.msk.f32.mxu0 %vm7503_vm2, %v9002_v28 }
 0xee0   :  { %v3109_v31 = vpop.xlane.xlu1 %3108 }
 0xee1   :  { %v3111_v23 = vmul.f32 0.03125, %v3109_v31  ;;  %v3106_v25 = vpop.xlane.xlu0 %3105  ;;  %v3650_v31 = vld [vmem:[%s9017_s7 + $0x10] sm:$0xff] }
 0xee2   :  { %v3110_v21 = vmul.f32 0.03125, %v3106_v25 }
 0xee3   :  { %v3113_v22 = vadd.f32 1e-05, %v3111_v23  ;;  %v3651_v23 = vld [vmem:[%s9017_s7 + $0x18] sm:$0xff] }
 0xee4   :  { %v3112_v5 = vadd.f32 1e-05, %v3110_v21  ;;  %v7008_v25 = vpack.c.bf16 %v3651_v23, %v3650_v31 }
 0xee5   :  { %7413 = vrsqrt.f32 %v3113_v22 }
 0xee6   :  { %7415 = vrsqrt.f32 %v3112_v5 }
 0xeef   :  { %v7414_v0 = vpop.eup %7413 }
 0xef0   :  { %v7416_v20 = vpop.eup %7415  ;;  %v3117_v27 = vmul.f32 %v7414_v0, %v3101_v38 }
 0xef1   :  { %v3116_v54 = vmul.f32 %v7416_v20, %v3100_v41 }
 0xef2   :  { %v3126_v57 = vmul.f32 %v5752_v1, %v3117_v27 }
 0xef3   :  { %v3125_v6 = vmul.f32 %v5752_v1, %v3116_v54  ;;  %v5766_v1 = vld [vmem:[%s9018_s10] ss:$0 sm:$0xff] }
 0xef4   :  { %v8394_v51 = vadd.f32 %v5753_v36, %v3126_v57 }
 0xef5   :  { %v8392_v11 = vadd.f32 %v5753_v36, %v3125_v6 }
 0xef7   :  { %6576 = vmatprep.mubr.msk.f32.mxu1 %vm275_vm1, %v8392_v11 }
 0xef8   :  { %6577 = vmatmul.mubr.msk.f32.vlgmr.msra.gmra.mrb[42].mxu1 %vm275_vm1, %v8394_v51 }
 0xef9   :  { %6592 = vmatprep.mubr.msk.f32.mxu1 %vm7503_vm2, %v9002_v28 }
 0xf3a   :  { %v6589_v30 = vpop.f32.mrb[48].mxu0 }
 0xf3b   :  { %v3317_v15 = vadd.f32 %v6589_v30, %v5757_v60  ;;  %v3311_v39 = vpop.f32.mrb[49].mxu0 }
 0xf3c   :  { %v3312_v14 = vadd.f32 %v5757_v60, %v3311_v39 }
 0xf3e   :  { %6591 = vmatpush3.xpose.msk.msra.mxu1 %vm275_vm1, %v3312_v14 }
 0xf3f   :  { %6595 = vmatprep.subr.mxu1 %v9002_v28 }
 0xfcb   :  { %v6578_v46 = vpop.f32.mrb[42].mxu1 }
 0xfcc   :  { %v3219_v47 = vpop.f32.mrb[43].mxu1  ;;  %v3225_v33 = vadd.f32 %v6578_v46, %v5754_v37 }
 0xfcd   :  { %v3220_v32 = vadd.f32 %v5754_v37, %v3219_v47 }
 0xfcf   :  { %6593 = vmatmul.mubr.msk.f32.vlgmr.msra.gmra.mrb[44].mxu1 %vm275_vm1, %v3220_v32 }
 0xfd0   :  { %6596 = vmatpush3.xpose.msk.msra.mxu1 %vm275_vm1, %v3317_v15  ;;  %6597 = vmatprep.mubr.msk.f32.mxu1 %vm7503_vm2, %v9002_v28 }
 0xfd1   :  { %6605 = vmatprep.subr.mxu1 %v9002_v28 }
 0xfd3   :  { %6598 = vmatmul.mubr.msk.f32.vlgmr.msra.gmra.mrb[46].mxu1 %vm275_vm1, %v3225_v33 }
 0xfd4   :  { %6607 = vmatprep.mubr.msk.f32.mxu1 %vm7503_vm2, %v9002_v28 }
0x10a2   :  { %v3392_v34 = vpop.f32.mrb[44].mxu1 }
0x10a3   :  { %v3472_v38 = vmul.f32 0.17677669, %v3392_v34  ;;  %v6594_v41 = vpop.f32.mrb[45].mxu1  ;;  %v3787_v34 = vld [vmem:[%s9019_s11 + $0x8] sm:$0xff] }
0x10a4   :  { %v3789_v41 = vld [vmem:[%s9019_s11 + $0x18] sm:$0xff] }
0x10a5   :  { %v3474_v42 = vsel %vm513_vm3, %v3472_v38, -inf }
0x10a6   :  { %3475 = vmax.xlane.f32.xlu0 %v3474_v42  ;;  %v3468_v43 = vpop.f32.mrb[46].mxu1 }
0x10a7   :  { %v3473_v44 = vmul.f32 0.17677669, %v3468_v43  ;;  %v6599_v48 = vpop.f32.mrb[47].mxu1  ;;  %v3805_v43 = vld [vmem:[%s9019_s11 + $0x98] sm:$0xff] }
0x10a8   :  { %v3802_v48 = vld [vmem:[%s9019_s11 + $0x80] sm:$0xff] }
0x10a9   :  { %v3477_v49 = vsel %vm513_vm3, %v3473_v44, -inf }
0x10aa   :  { %3478 = vmax.xlane.f32.xlu1 %v3477_v49  ;;  %v7020_v49 = vpack.c.bf16 %v3805_v43, %v3789_v41  ;;  %v3824_v41 = vld [vmem:[%s9019_s11 + $0x130] sm:$0xff] }
0x1133   :  { %v3476_v50 = vpop.xlane.xlu0 %3475 }
0x1134   :  { %v3480_v61 = vsub.f32 %v3472_v38, %v3476_v50  ;;  %v3803_v38 = vld [vmem:[%s9019_s11 + $0x88] sm:$0xff] }
0x1135   :  { %v7012_v42 = vpack.c.bf16 %v3803_v38, %v3787_v34  ;;  %v3838_v38 = vld [vmem:[%s9019_s11 + $0x1a0] sm:$0xff] }
0x1136   :  { %v3482_v62 = vmul.f32 1.442695, %v3480_v61  ;;  %v3788_v61 = vld [vmem:[%s9019_s11 + $0x10] sm:$0xff] }
0x1137   :  { %v3479_v53 = vpop.xlane.xlu1 %3478 }
0x1138   :  { %7417 = vpow2.f32 %v3482_v62  ;;  %v3481_v3 = vsub.f32 %v3473_v44, %v3479_v53  ;;  %v3786_v44 = vld [vmem:[%s9019_s11] sm:$0xff]  ;;  %v3804_v62 = vld [vmem:[%s9019_s11 + $0x90] sm:$0xff] }
0x1139   :  { %v7014_v50 = vpack.c.bf16 %v3802_v48, %v3786_v44  ;;  %v7022_v53 = vpack.c.bf16 %v3804_v62, %v3788_v61  ;;  %v3795_v48 = vld [vmem:[%s9019_s11 + $0x48] sm:$0xff]  ;;  %v3813_v61 = vld [vmem:[%s9019_s11 + $0xd8] sm:$0xff] }
0x113a   :  { %v3484_v24 = vmul.f32 1.442695, %v3481_v3  ;;  %v3819_v3 = vld [vmem:[%s9019_s11 + $0x108] sm:$0xff] }
0x113c   :  { %7419 = vpow2.f32 %v3484_v24  ;;  %v3835_v24 = vld [vmem:[%s9019_s11 + $0x188] sm:$0xff] }
0x1142   :  { %v7418_v29 = vpop.eup %7417 }
0x1143   :  { %v3486_v4 = vsel %vm513_vm3, %v7418_v29, 0.0 }
0x1144   :  { %3487 = vadd.xlane.f32.xlu0 %v3486_v4  ;;  %v7016_v4 = vpack.c.bf16 %v3835_v24, %v3819_v3  ;;  %v3794_v3 = vld [vmem:[%s9019_s11 + $0x40] sm:$0xff] }
0x1146   :  { %v7420_v45 = vpop.eup %7419 }
0x1147   :  { %v3489_v40 = vsel %vm513_vm3, %v7420_v45, 0.0 }
0x1148   :  { %3490 = vadd.xlane.f32.xlu1 %v3489_v40  ;;  %v3818_v40 = vld [vmem:[%s9019_s11 + $0x100] sm:$0xff] }
0x1159   :  { %3572 = vrot.lane.b32.xlu1 %v3317_v15, %s7504_s0 }
0x115a   :  { %3496 = vrot.lane.b32.xlu0 %v3312_v14, %s7504_s0 }
0x11d1   :  { %v3488_v63 = vpop.xlane.xlu0 %3487 }
0x11d2   :  { %7421 = vrcp.f32 %v3488_v63  ;;  %v7018_v63 = vpack.c.bf16 %v3834_v12, %v3818_v40 }
0x11d5   :  { %v3497_v10 = vpop.permute.xlu0 %3496  ;;  %v3491_v52 = vpop.xlane.xlu1 %3490 }
0x11d6   :  { %7423 = vrcp.f32 %v3491_v52  ;;  %6601 = vmatpush3.msra.mxu0 %v3497_v10  ;;  %v3836_v10 = vld [vmem:[%s9019_s11 + $0x190] sm:$0xff] }
0x11d7   :  { %7005 = vmatprep.subr.bf16.mxu0 %v7004_v13 }
0x11d9   :  { %v3573_v17 = vpop.permute.xlu1 %3572 }
0x11da   :  { %6606 = vmatpush3.msra.mxu1 %v3573_v17  ;;  %v3791_v17 = vld [vmem:[%s9019_s11 + $0x28] sm:$0xff] }
0x11db   :  { %7013 = vmatprep.subr.bf16.mxu1 %v7012_v42  ;;  %v3840_v42 = vld [vmem:[%s9019_s11 + $0x1b0] sm:$0xff] }
0x11dc   :  { %v7422_v18 = vpop.eup %7421 }
0x11dd   :  { %v3494_v19 = vmul.f32 %v7422_v18, %v7418_v29  ;;  %v3821_v29 = vld [vmem:[%s9019_s11 + $0x118] sm:$0xff]  ;;  %v3807_v18 = vld [vmem:[%s9019_s11 + $0xa8] sm:$0xff] }
0x11df   :  { %6603 = vmatmul.mubr.msk.f32.vlgmr.msra.gmra.mrb[50].mxu0 %vm513_vm3, %v3494_v19  ;;  %v3793_v19 = vld [vmem:[%s9019_s11 + $0x38] sm:$0xff] }
0x11e0   :  { %v7424_v16 = vpop.eup %7423  ;;  %7007 = vmatpush3.bf16.msra.mxu0 %v7004_v13  ;;  %v3820_v13 = vld [vmem:[%s9019_s11 + $0x110] sm:$0xff] }
0x11e1   :  { %v3495_v7 = vmul.f32 %v7424_v16, %v7420_v45  ;;  %7009 = vmatprep.subr.bf16.mxu0 %v7008_v25  ;;  %v3837_v45 = vld [vmem:[%s9019_s11 + $0x198] sm:$0xff]  ;;  %v7026_v52 = vpack.c.bf16 %v3836_v10, %v3820_v13  ;;  %v7028_v16 = vpack.c.bf16 %v3807_v18, %v3791_v17  ;;  %v3826_v18 = vld [vmem:[%s9019_s11 + $0x140] sm:$0xff] }
0x11e2   :  { %v7024_v8 = vpack.c.bf16 %v3837_v45, %v3821_v29  ;;  %v3810_v29 = vld [vmem:[%s9019_s11 + $0xc0] sm:$0xff]  ;;  %v3812_v45 = vld [vmem:[%s9019_s11 + $0xd0] sm:$0xff]  ;;  %v3829_v13 = vld [vmem:[%s9019_s11 + $0x158] sm:$0xff] }
0x11e3   :  { %6608 = vmatmul.mubr.msk.f32.vlgmr.msra.gmra.mrb[48].mxu1 %vm513_vm3, %v3495_v7  ;;  %v3809_v7 = vld [vmem:[%s9019_s11 + $0xb8] sm:$0xff] }
0x11e4   :  { %4004 = vmatprep.mubr.f32.mxu1 %v9002_v28  ;;  %7011 = vmatpush3.bf16.msra.mxu0 %v7008_v25  ;;  %v7036_v31 = vpack.c.bf16 %v3809_v7, %v3793_v19  ;;  %v3845_v10 = vld [vmem:[%s9019_s11 + $0x1d8] sm:$0xff]  ;;  %v3842_v19 = vld [vmem:[%s9019_s11 + $0x1c0] sm:$0xff]  ;;  %v3844_v7 = vld [vmem:[%s9019_s11 + $0x1d0] sm:$0xff] }
0x11e5   :  { %7021 = vmatprep.subr.bf16.mxu0 %v7020_v49  ;;  %7015 = vmatpush1.bf16.msra.mxu1 %v7014_v50  ;;  %v3811_v49 = vld [vmem:[%s9019_s11 + $0xc8] sm:$0xff]  ;;  %v3797_v50 = vld [vmem:[%s9019_s11 + $0x58] sm:$0xff] }
0x11e6   :  { %7017 = vmatprep.subr.bf16.mxu1 %v7016_v4  ;;  %v3796_v4 = vld [vmem:[%s9019_s11 + $0x50] sm:$0xff]  ;;  %v7044_v40 = vpack.c.bf16 %v3811_v49, %v3795_v48  ;;  %v7052_v12 = vpack.c.bf16 %v3813_v61, %v3797_v50  ;;  %v4588_v49 = vld [vmem:[%s9022_s18] sm:$0xff]  ;;  %v4589_v50 = vld [vmem:[%s9022_s18 + $0x8] sm:$0xff] }
0x11e7   :  { %v7054_v17 = vpack.c.bf16 %v3812_v45, %v3796_v4  ;;  %v4607_v4 = vld [vmem:[%s9022_s18 + $0x98] sm:$0xff]  ;;  %v4638_v45 = vld [vmem:[%s9022_s18 + $0x190] sm:$0xff] }
0x11e9   :  { %7019 = vmatpush1.bf16.msra.mxu1 %v7018_v63  ;;  %v3843_v63 = vld [vmem:[%s9019_s11 + $0x1c8] sm:$0xff] }
0x11ea   :  { %7029 = vmatprep.subr.bf16.mxu1 %v7028_v16  ;;  %v3828_v16 = vld [vmem:[%s9019_s11 + $0x150] sm:$0xff] }
0x12b2   :  { %v3568_v21 = vpop.f32.mrb[50].mxu0 }
0x12b3   :  { %v6604_v22 = vpop.f32.mrb[51].mxu0  ;;  %6618 = vmatprep.mubr.msk.f32.mxu0 %vm275_vm1, %v3568_v21 }
0x12b6   :  { %v3644_v5 = vpop.f32.mrb[48].mxu1 }
0x12b7   :  { %v6609_v0 = vpop.f32.mrb[49].mxu1  ;;  %6619 = vmatmul.mubr.msk.f32.vlgmr.msra.gmra.mrb[52].mxu0 %vm275_vm1, %v3644_v5 }
0x12b8   :  { %4081 = vmatprep.mubr.f32.mxu0 %v9002_v28  ;;  %7023 = vmatpush1.bf16.msra.mxu0 %v7022_v53  ;;  %v7042_v53 = vpack.c.bf16 %v3840_v42, %v3824_v41  ;;  %v4605_v41 = vld [vmem:[%s9022_s18 + $0x88] sm:$0xff]  ;;  %v4636_v42 = vld [vmem:[%s9022_s18 + $0x180] sm:$0xff] }
0x12b9   :  { %7025 = vmatprep.subr.bf16.mxu0 %v7024_v8  ;;  %v3827_v8 = vld [vmem:[%s9019_s11 + $0x148] sm:$0xff] }
0x12bc   :  { %7027 = vmatpush1.bf16.msra.mxu0 %v7026_v52  ;;  %v7046_v52 = vpack.c.bf16 %v3810_v29, %v3794_v3  ;;  %v4621_v3 = vld [vmem:[%s9022_s18 + $0x108] sm:$0xff]  ;;  %v4606_v29 = vld [vmem:[%s9022_s18 + $0x90] sm:$0xff] }
0x12bd   :  { %7037 = vmatprep.subr.bf16.mxu0 %v7036_v31  ;;  %v7048_v31 = vpack.c.bf16 %v3843_v63, %v3827_v8  ;;  %v4590_v63 = vld [vmem:[%s9022_s18 + $0x10] sm:$0xff] }
0x138a   :  { %v6620_v20 = vpop.f32.mrb[52].mxu0 }
0x138b   :  { %v3737_v27 = vadd.f32 %v6620_v20, %v5766_v1  ;;  %v3731_v54 = vpop.f32.mrb[53].mxu0 }
0x138c   :  { %v3732_v57 = vadd.f32 %v5766_v1, %v3731_v54  ;;  %v3790_v54 = vld [vmem:[%s9019_s11 + $0x20] sm:$0xff] }
0x138d   :  { %v3741_v36 = vadd.f32 %v3737_v27, %v8394_v51  ;;  %v5769_v27 = vld [vmem:[%s9020_s15] ss:$0 sm:$0xff] }
0x138e   :  { %v3740_v6 = vadd.f32 %v3732_v57, %v8392_v11 }
0x138f   :  { %v3745_v60 = vsel %vm275_vm1, %v3741_v36, 0.0 }
0x1390   :  { %3746 = vadd.xlane.f32.xlu0 %v3745_v60  ;;  %v3742_v30 = vsel %vm275_vm1, %v3740_v6, 0.0  ;;  %v3792_v60 = vld [vmem:[%s9019_s11 + $0x30] sm:$0xff] }
0x1391   :  { %3743 = vadd.xlane.f32.xlu1 %v3742_v30  ;;  %v3808_v30 = vld [vmem:[%s9019_s11 + $0xb0] sm:$0xff] }
0x141d   :  { %v3747_v15 = vpop.xlane.xlu0 %3746 }
0x141e   :  { %v3749_v39 = vmul.f32 0.03125, %v3747_v15  ;;  %v3744_v14 = vpop.xlane.xlu1 %3743  ;;  %v5770_v15 = vld [vmem:[%s9021_s16] ss:$0 sm:$0xff] }
0x141f   :  { %v3748_v37 = vmul.f32 0.03125, %v3744_v14 }
0x1420   :  { %v3751_v46 = vsub.f32 %v3741_v36, %v3749_v39  ;;  %v3823_v39 = vld [vmem:[%s9019_s11 + $0x128] sm:$0xff] }
0x1421   :  { %v3750_v51 = vsub.f32 %v3740_v6, %v3748_v37  ;;  %v3806_v6 = vld [vmem:[%s9019_s11 + $0xa0] sm:$0xff]  ;;  %v3839_v37 = vld [vmem:[%s9019_s11 + $0x1a8] sm:$0xff] }
0x1422   :  { %v3753_v11 = vmul.f32 %v3751_v46, %v3751_v46  ;;  %v7032_v43 = vpack.c.bf16 %v3839_v37, %v3823_v39  ;;  %v3849_v39 = vld [vmem:[%s9019_s11 + $0x1f8] sm:$0xff] }
0x1423   :  { %v3752_v47 = vmul.f32 %v3750_v51, %v3750_v51 }
0x1424   :  { %v3757_v32 = vsel %vm275_vm1, %v3753_v11, 0.0  ;;  %v3825_v11 = vld [vmem:[%s9019_s11 + $0x138] sm:$0xff] }
0x1425   :  { %3758 = vadd.xlane.f32.xlu1 %v3757_v32  ;;  %v3754_v33 = vsel %vm275_vm1, %v3752_v47, 0.0  ;;  %v3841_v47 = vld [vmem:[%s9019_s11 + $0x1b8] sm:$0xff]  ;;  %v7030_v32 = vpack.c.bf16 %v3806_v6, %v3790_v54  ;;  %v3800_v54 = vld [vmem:[%s9019_s11 + $0x70] sm:$0xff] }
0x1426   :  { %3755 = vadd.xlane.f32.xlu0 %v3754_v33  ;;  %v7038_v33 = vpack.c.bf16 %v3808_v30, %v3792_v60  ;;  %v7040_v44 = vpack.c.bf16 %v3841_v47, %v3825_v11  ;;  %v3831_v60 = vld [vmem:[%s9019_s11 + $0x168] sm:$0xff]  ;;  %v3830_v11 = vld [vmem:[%s9019_s11 + $0x160] sm:$0xff] }
0x1427   :  { %v3847_v30 = vld [vmem:[%s9019_s11 + $0x1e8] sm:$0xff]  ;;  %v3846_v47 = vld [vmem:[%s9019_s11 + $0x1e0] sm:$0xff] }
0x14b2   :  { %v3759_v23 = vpop.xlane.xlu1 %3758 }
0x14b3   :  { %v3761_v25 = vmul.f32 0.03125, %v3759_v23  ;;  %v3756_v21 = vpop.xlane.xlu0 %3755  ;;  %v7056_v23 = vpack.c.bf16 %v3845_v10, %v3829_v13  ;;  %v4591_v13 = vld [vmem:[%s9022_s18 + $0x18] sm:$0xff]  ;;  %v7080_v10 = vpack.c.bf16 %v4607_v4, %v4606_v29  ;;  %v4598_v4 = vld [vmem:[%s9022_s18 + $0x50] sm:$0xff] }
0x14b4   :  { %v3760_v22 = vmul.f32 0.03125, %v3756_v21  ;;  %v3815_v21 = vld [vmem:[%s9019_s11 + $0xe8] sm:$0xff] }
0x14b5   :  { %v3763_v5 = vadd.f32 1e-05, %v3761_v25  ;;  %v3799_v25 = vld [vmem:[%s9019_s11 + $0x68] sm:$0xff] }
0x14b6   :  { %v3762_v0 = vadd.f32 1e-05, %v3760_v22  ;;  %v3801_v22 = vld [vmem:[%s9019_s11 + $0x78] sm:$0xff] }
0x14b7   :  { %7425 = vrsqrt.f32 %v3763_v5  ;;  %v3817_v5 = vld [vmem:[%s9019_s11 + $0xf8] sm:$0xff] }
0x14b8   :  { %7427 = vrsqrt.f32 %v3762_v0  ;;  %v7050_v0 = vpack.c.bf16 %v3842_v19, %v3826_v18  ;;  %v7068_v6 = vpack.c.bf16 %v3817_v5, %v3801_v22  ;;  %v4623_v18 = vld [vmem:[%s9022_s18 + $0x118] sm:$0xff]  ;;  %v4608_v19 = vld [vmem:[%s9022_s18 + $0xa0] sm:$0xff]  ;;  %v4593_v22 = vld [vmem:[%s9022_s18 + $0x28] sm:$0xff] }
0x14c1   :  { %v7426_v1 = vpop.eup %7425 }
0x14c2   :  { %v7428_v20 = vpop.eup %7427  ;;  %v3767_v57 = vmul.f32 %v7426_v1, %v3751_v46  ;;  %v3822_v46 = vld [vmem:[%s9019_s11 + $0x120] sm:$0xff]  ;;  %v7058_v1 = vpack.c.bf16 %v3844_v7, %v3828_v16  ;;  %v4609_v16 = vld [vmem:[%s9022_s18 + $0xa8] sm:$0xff] }
0x14c3   :  { %v3766_v36 = vmul.f32 %v7428_v20, %v3750_v51  ;;  %v7034_v62 = vpack.c.bf16 %v3838_v38, %v3822_v46  ;;  %v3798_v20 = vld [vmem:[%s9019_s11 + $0x60] sm:$0xff]  ;;  %v7064_v46 = vpack.c.bf16 %v3847_v30, %v3831_v60  ;;  %v7084_v5 = vpack.c.bf16 %v4609_v16, %v4608_v19  ;;  %v4594_v30 = vld [vmem:[%s9022_s18 + $0x30] sm:$0xff] }
0x14c4   :  { %v3776_v34 = vmul.f32 %v5769_v27, %v3767_v57  ;;  %v3816_v57 = vld [vmem:[%s9019_s11 + $0xf0] sm:$0xff]  ;;  %v4604_v38 = vld [vmem:[%s9022_s18 + $0x80] sm:$0xff] }
0x14c5   :  { %v3775_v14 = vmul.f32 %v5769_v27, %v3766_v36  ;;  %v3814_v27 = vld [vmem:[%s9019_s11 + $0xe0] sm:$0xff]  ;;  %v7060_v36 = vpack.c.bf16 %v3815_v21, %v3799_v25  ;;  %v7070_v37 = vpack.c.bf16 %v3816_v57, %v3800_v54  ;;  %v7076_v61 = vpack.c.bf16 %v4605_v41, %v4604_v38  ;;  %v4611_v54 = vld [vmem:[%s9022_s18 + $0xb8] sm:$0xff]  ;;  %v4642_v57 = vld [vmem:[%s9022_s18 + $0x1b0] sm:$0xff] }
0x14c6   :  { %v8482_v24 = vadd.f32 %v5770_v15, %v3776_v34  ;;  %v4640_v7 = vld [vmem:[%s9022_s18 + $0x1a0] sm:$0xff] }
0x14c7   :  { %v8468_v51 = vadd.f32 %v5770_v15, %v3775_v14  ;;  %v3833_v15 = vld [vmem:[%s9019_s11 + $0x178] sm:$0xff]  ;;  %v7062_v14 = vpack.c.bf16 %v3814_v27, %v3798_v20  ;;  %v4592_v21 = vld [vmem:[%s9022_s18 + $0x20] sm:$0xff]  ;;  %v4625_v20 = vld [vmem:[%s9022_s18 + $0x128] sm:$0xff] }
0x14c8   :  { %v7072_v34 = vpack.c.bf16 %v3849_v39, %v3833_v15  ;;  %v4610_v27 = vld [vmem:[%s9022_s18 + $0xb0] sm:$0xff]  ;;  %v4595_v15 = vld [vmem:[%s9022_s18 + $0x38] sm:$0xff]  ;;  %v4596_v41 = vld [vmem:[%s9022_s18 + $0x40] sm:$0xff] }
0x14c9   :  { %5771 = vmatmul.mubr.msk.f32.vlgmr.msra.gmra.mrb[50].mxu1 %vm275_vm1, %v8468_v51  ;;  %5773 = vmatmul.mubr.msk.f32.vlgmr.msra.gmra.mrb[54].mxu0 %vm275_vm1, %v8468_v51  ;;  %v7088_v39 = vpack.c.bf16 %v4611_v54, %v4610_v27  ;;  %v4600_v16 = vld [vmem:[%s9022_s18 + $0x60] sm:$0xff]  ;;  %v4651_v54 = vld [vmem:[%s9022_s18 + $0x1f8] sm:$0xff] }
0x14ca   :  { %7031 = vmatpush1.bf16.msra.mxu1 %v7030_v32  ;;  %7039 = vmatpush1.bf16.msra.mxu0 %v7038_v33  ;;  %v3832_v32 = vld [vmem:[%s9019_s11 + $0x170] sm:$0xff] }
0x14cb   :  { %4010 = vmatprep.mubr.f32.mxu1 %v9002_v28  ;;  %4087 = vmatprep.mubr.f32.mxu0 %v9002_v28  ;;  %v3848_v33 = vld [vmem:[%s9019_s11 + $0x1f0] sm:$0xff] }
0x14cc   :  { %7033 = vmatprep.subr.bf16.mxu1 %v7032_v43  ;;  %7041 = vmatprep.subr.bf16.mxu0 %v7040_v44  ;;  %v4637_v43 = vld [vmem:[%s9022_s18 + $0x188] sm:$0xff]  ;;  %v7066_v44 = vpack.c.bf16 %v3846_v47, %v3830_v11  ;;  %v7074_v48 = vpack.c.bf16 %v3848_v33, %v3832_v32  ;;  %v4627_v11 = vld [vmem:[%s9022_s18 + $0x138] sm:$0xff]  ;;  %v4612_v47 = vld [vmem:[%s9022_s18 + $0xc0] sm:$0xff] }
0x14cd   :  { %5772 = vmatmul.mubr.msk.f32.gmra.mrb[52].mxu1 %vm275_vm1, %v8482_v24  ;;  %5774 = vmatmul.mubr.msk.f32.gmra.mrb[56].mxu0 %vm275_vm1, %v8482_v24  ;;  %v4613_v32 = vld [vmem:[%s9022_s18 + $0xc8] sm:$0xff]  ;;  %v4644_v33 = vld [vmem:[%s9022_s18 + $0x1c0] sm:$0xff] }
0x14ce   :  { %7035 = vmatpush1.bf16.msra.mxu1 %v7034_v62  ;;  %7043 = vmatpush1.bf16.msra.mxu0 %v7042_v53  ;;  %v7108_v62 = vpack.c.bf16 %v4637_v43, %v4636_v42  ;;  %v4620_v53 = vld [vmem:[%s9022_s18 + $0x100] sm:$0xff]  ;;  %v4597_v42 = vld [vmem:[%s9022_s18 + $0x48] sm:$0xff]  ;;  %v7092_v43 = vpack.c.bf16 %v4613_v32, %v4612_v47 }
0x14cf   :  { %4158 = vmatprep.mubr.f32.mxu1 %v9002_v28  ;;  %4235 = vmatprep.mubr.f32.mxu0 %v9002_v28  ;;  %v7110_v8 = vpack.c.bf16 %v4621_v3, %v4620_v53  ;;  %v4647_v53 = vld [vmem:[%s9022_s18 + $0x1d8] sm:$0xff]  ;;  %v7094_v3 = vpack.c.bf16 %v4597_v42, %v4596_v41  ;;  %v4701_v32 = vld [vmem:[%s9022_s18 + $0x388] sm:$0xff] }
0x14d0   :  { %7045 = vmatprep.subr.bf16.mxu1 %v7044_v40  ;;  %7053 = vmatprep.subr.bf16.mxu0 %v7052_v12  ;;  %v4639_v40 = vld [vmem:[%s9022_s18 + $0x198] sm:$0xff]  ;;  %v7078_v12 = vpack.c.bf16 %v4589_v50, %v4588_v49  ;;  %v4629_v49 = vld [vmem:[%s9022_s18 + $0x148] sm:$0xff]  ;;  %v4614_v50 = vld [vmem:[%s9022_s18 + $0xd0] sm:$0xff] }
0x14d1   :  { %5775 = vmatmul.mubr.msk.f32.vlgmr.msra.gmra.mrb[54].mxu1 %vm275_vm1, %v8468_v51  ;;  %5777 = vmatmul.mubr.msk.f32.vlgmr.msra.gmra.mrb[58].mxu0 %vm275_vm1, %v8468_v51 }
0x14d2   :  { %7047 = vmatpush1.bf16.msra.mxu1 %v7046_v52  ;;  %7055 = vmatpush1.bf16.msra.mxu0 %v7054_v17  ;;  %v7112_v52 = vpack.c.bf16 %v4639_v40, %v4638_v45  ;;  %v4622_v17 = vld [vmem:[%s9022_s18 + $0x110] sm:$0xff]  ;;  %v4599_v45 = vld [vmem:[%s9022_s18 + $0x58] sm:$0xff] }
0x14d3   :  { %4164 = vmatprep.mubr.f32.mxu1 %v9002_v28  ;;  %4241 = vmatprep.mubr.f32.mxu0 %v9002_v28  ;;  %v7114_v25 = vpack.c.bf16 %v4623_v18, %v4622_v17  ;;  %v4649_v17 = vld [vmem:[%s9022_s18 + $0x1e8] sm:$0xff]  ;;  %v7098_v18 = vpack.c.bf16 %v4599_v45, %v4598_v4  ;;  %v4671_v45 = vld [vmem:[%s9022_s18 + $0x298] sm:$0xff] }
0x14d4   :  { %7049 = vmatprep.subr.bf16.mxu1 %v7048_v31  ;;  %7057 = vmatprep.subr.bf16.mxu0 %v7056_v23  ;;  %v4641_v31 = vld [vmem:[%s9022_s18 + $0x1a8] sm:$0xff]  ;;  %v7082_v23 = vpack.c.bf16 %v4591_v13, %v4590_v63  ;;  %v4631_v63 = vld [vmem:[%s9022_s18 + $0x158] sm:$0xff]  ;;  %v4616_v13 = vld [vmem:[%s9022_s18 + $0xe0] sm:$0xff] }
0x14d5   :  { %5776 = vmatmul.mubr.msk.f32.gmra.mrb[56].mxu1 %vm275_vm1, %v8482_v24  ;;  %5778 = vmatmul.mubr.msk.f32.gmra.mrb[60].mxu0 %vm275_vm1, %v8482_v24 }
0x14d6   :  { %7051 = vmatpush1.bf16.msra.mxu1 %v7050_v0  ;;  %7059 = vmatpush1.bf16.msra.mxu0 %v7058_v1  ;;  %v7116_v0 = vpack.c.bf16 %v4641_v31, %v4640_v7  ;;  %v4624_v1 = vld [vmem:[%s9022_s18 + $0x120] sm:$0xff] }
0x14d7   :  { %4312 = vmatprep.mubr.f32.mxu1 %v9002_v28  ;;  %4389 = vmatprep.mubr.f32.mxu0 %v9002_v28  ;;  %v7118_v60 = vpack.c.bf16 %v4625_v20, %v4624_v1  ;;  %v4619_v1 = vld [vmem:[%s9022_s18 + $0xf8] sm:$0xff]  ;;  %v4650_v20 = vld [vmem:[%s9022_s18 + $0x1f0] sm:$0xff] }
0x14d8   :  { %7061 = vmatprep.subr.bf16.mxu1 %v7060_v36  ;;  %7069 = vmatprep.subr.bf16.mxu0 %v7068_v6  ;;  %v4643_v36 = vld [vmem:[%s9022_s18 + $0x1b8] sm:$0xff]  ;;  %v7086_v6 = vpack.c.bf16 %v4593_v22, %v4592_v21  ;;  %v4633_v21 = vld [vmem:[%s9022_s18 + $0x168] sm:$0xff] }
0x14d9   :  { %5779 = vmatmul.mubr.msk.f32.vlgmr.msra.gmra.mrb[58].mxu1 %vm275_vm1, %v8468_v51  ;;  %5781 = vmatmul.mubr.msk.f32.vlgmr.msra.gmra.mrb[62].mxu0 %vm275_vm1, %v8468_v51 }
0x14da   :  { %7063 = vmatpush1.bf16.msra.mxu1 %v7062_v14  ;;  %7071 = vmatpush1.bf16.msra.mxu0 %v7070_v37  ;;  %v7120_v14 = vpack.c.bf16 %v4643_v36, %v4642_v57  ;;  %v4626_v37 = vld [vmem:[%s9022_s18 + $0x130] sm:$0xff]  ;;  %v4603_v36 = vld [vmem:[%s9022_s18 + $0x78] sm:$0xff] }
0x14db   :  { %4318 = vmatprep.mubr.f32.mxu1 %v9002_v28  ;;  %4395 = vmatprep.mubr.f32.mxu0 %v9002_v28  ;;  %v7122_v38 = vpack.c.bf16 %v4627_v11, %v4626_v37  ;;  %v4602_v57 = vld [vmem:[%s9022_s18 + $0x70] sm:$0xff]  ;;  %v4669_v37 = vld [vmem:[%s9022_s18 + $0x288] sm:$0xff]  ;;  %v4700_v11 = vld [vmem:[%s9022_s18 + $0x380] sm:$0xff] }
0x14dc   :  { %7065 = vmatprep.subr.bf16.mxu1 %v7064_v46  ;;  %7073 = vmatprep.subr.bf16.mxu0 %v7072_v34  ;;  %v4645_v46 = vld [vmem:[%s9022_s18 + $0x1c8] sm:$0xff]  ;;  %v7090_v34 = vpack.c.bf16 %v4595_v15, %v4594_v30  ;;  %v4634_v30 = vld [vmem:[%s9022_s18 + $0x170] sm:$0xff]  ;;  %v4635_v15 = vld [vmem:[%s9022_s18 + $0x178] sm:$0xff] }
0x14dd   :  { %5780 = vmatmul.mubr.msk.f32.gmra.mrb[60].mxu1 %vm275_vm1, %v8482_v24  ;;  %5782 = vmatmul.mubr.msk.f32.gmra.mrb[64].mxu0 %vm275_vm1, %v8482_v24 }
0x14de   :  { %7067 = vmatpush1.bf16.msra.mxu1 %v7066_v44  ;;  %7075 = vmatpush1.bf16.msra.mxu0 %v7074_v48  ;;  %v7124_v44 = vpack.c.bf16 %v4645_v46, %v4644_v33  ;;  %v4628_v48 = vld [vmem:[%s9022_s18 + $0x140] sm:$0xff]  ;;  %v7172_v33 = vpack.c.bf16 %v4701_v32, %v4700_v11 }
0x14df   :  { %4466 = vmatprep.mubr.f32.mxu1 %v9002_v28  ;;  %4543 = vmatprep.mubr.f32.mxu0 %v9002_v28  ;;  %v7126_v29 = vpack.c.bf16 %v4629_v49, %v4628_v48  ;;  %v8622_v46 = vld [vmem:[%s9023_s22] sm:$0xff] }
0x14e0   :  { %7077 = vmatprep.subr.bf16.mxu1 %v7076_v61  ;;  %7109 = vmatprep.subr.bf16.mxu0 %v7108_v62  ;;  %v4615_v61 = vld [vmem:[%s9022_s18 + $0xd8] sm:$0xff]  ;;  %v4646_v62 = vld [vmem:[%s9022_s18 + $0x1d0] sm:$0xff]  ;;  %v3861_v41 = vrot.slane %v8622_v46, %v7983_v58  ;;  %v3869_v42 = vrot.slane %v8622_v46, %v7986_v59 }
0x14e1   :  { %5783 = vmatmul.mubr.msk.f32.vlgmr.msra.gmra.mrb[62].mxu1 %vm275_vm1, %v8468_v51  ;;  %5785 = vmatmul.mubr.msk.f32.vlgmr.msra.gmra.mrb[66].mxu0 %vm275_vm1, %v8468_v51  ;;  %v7096_v40 = vpack.c.bf16 %v4615_v61, %v4614_v50  ;;  %v4684_v50 = vld [vmem:[%s9022_s18 + $0x300] sm:$0xff]  ;;  %v4685_v61 = vld [vmem:[%s9022_s18 + $0x308] sm:$0xff] }
0x14e2   :  { %4472 = vmatprep.mubr.f32.mxu1 %v9002_v28  ;;  %4549 = vmatprep.mubr.f32.mxu0 %v9002_v28 }
0x14e3   :  { %7079 = vmatpush3.bf16.msra.mxu1 %v7078_v12  ;;  %7111 = vmatpush3.bf16.msra.mxu0 %v7110_v8  ;;  %v7128_v12 = vpack.c.bf16 %v4647_v53, %v4646_v62  ;;  %v4630_v8 = vld [vmem:[%s9022_s18 + $0x150] sm:$0xff] }
0x14e4   :  { %7081 = vmatprep.subr.bf16.mxu1 %v7080_v10  ;;  %7113 = vmatprep.subr.bf16.mxu0 %v7112_v52  ;;  %v4617_v10 = vld [vmem:[%s9022_s18 + $0xe8] sm:$0xff]  ;;  %v4648_v52 = vld [vmem:[%s9022_s18 + $0x1e0] sm:$0xff]  ;;  %v7130_v19 = vpack.c.bf16 %v4631_v63, %v4630_v8  ;;  %v4670_v62 = vld [vmem:[%s9022_s18 + $0x290] sm:$0xff] }
0x14e5   :  { %5784 = vmatmul.mubr.msk.f32.gmra.mrb[64].mxu1 %vm275_vm1, %v8482_v24  ;;  %5786 = vmatmul.mubr.msk.f32.gmra.mrb[68].mxu0 %vm275_vm1, %v8482_v24  ;;  %v7100_v7 = vpack.c.bf16 %v4617_v10, %v4616_v13  ;;  %v7132_v31 = vpack.c.bf16 %v4649_v17, %v4648_v52  ;;  %v7174_v10 = vpack.c.bf16 %v4685_v61, %v4684_v50  ;;  %v4654_v17 = vld [vmem:[%s9022_s18 + $0x210] sm:$0xff]  ;;  %v4689_v61 = vld [vmem:[%s9022_s18 + $0x328] sm:$0xff] }
0x14e6   :  { %v8642_v52 = vrot.slane %v8622_v46, %v7999_v2 }
0x14e7   :  { %7083 = vmatpush3.bf16.msra.mxu1 %v7082_v23  ;;  %7115 = vmatpush3.bf16.msra.mxu0 %v7114_v25  ;;  %v4601_v23 = vld [vmem:[%s9022_s18 + $0x68] sm:$0xff]  ;;  %v4632_v25 = vld [vmem:[%s9022_s18 + $0x160] sm:$0xff] }
0x14e8   :  { %7085 = vmatprep.subr.bf16.mxu1 %v7084_v5  ;;  %7117 = vmatprep.subr.bf16.mxu0 %v7116_v0  ;;  %v7102_v22 = vpack.c.bf16 %v4601_v23, %v4600_v16  ;;  %v7134_v5 = vpack.c.bf16 %v4633_v21, %v4632_v25  ;;  %v4618_v0 = vld [vmem:[%s9022_s18 + $0xf0] sm:$0xff]  ;;  %v4655_v25 = vld [vmem:[%s9022_s18 + $0x218] sm:$0xff] }
0x14e9   :  { %v7104_v27 = vpack.c.bf16 %v4619_v1, %v4618_v0  ;;  %v4686_v21 = vld [vmem:[%s9022_s18 + $0x310] sm:$0xff] }
0x14eb   :  { %7087 = vmatpush3.bf16.msra.mxu1 %v7086_v6  ;;  %7119 = vmatpush3.bf16.msra.mxu0 %v7118_v60  ;;  %v7136_v6 = vpack.c.bf16 %v4651_v54, %v4650_v20  ;;  %v7106_v60 = vpack.c.bf16 %v4603_v36, %v4602_v57  ;;  %v4687_v54 = vld [vmem:[%s9022_s18 + $0x318] sm:$0xff]  ;;  %v4672_v57 = vld [vmem:[%s9022_s18 + $0x2a0] sm:$0xff] }
0x14ec   :  { %7089 = vmatprep.subr.bf16.mxu1 %v7088_v39  ;;  %7121 = vmatprep.subr.bf16.mxu0 %v7120_v14  ;;  %v7138_v39 = vpack.c.bf16 %v4635_v15, %v4634_v30  ;;  %v4668_v14 = vld [vmem:[%s9022_s18 + $0x280] sm:$0xff]  ;;  %v4673_v30 = vld [vmem:[%s9022_s18 + $0x2a8] sm:$0xff] }
0x14ed   :  { %v7140_v47 = vpack.c.bf16 %v4669_v37, %v4668_v14  ;;  %v4704_v15 = vld [vmem:[%s9022_s18 + $0x3a0] sm:$0xff] }
0x14ee   :  { %v4656_v14 = vld [vmem:[%s9022_s18 + $0x220] sm:$0xff] }
0x14ef   :  { %7091 = vmatpush3.bf16.msra.mxu1 %v7090_v34  ;;  %7123 = vmatpush3.bf16.msra.mxu0 %v7122_v38  ;;  %v3857_v34 = vrot.slane %v8622_v46, %v7974_v55  ;;  %v3865_v38 = vrot.slane %v8622_v46, %v7977_v56 }
0x14f0   :  { %7093 = vmatprep.subr.bf16.mxu1 %v7092_v43  ;;  %7125 = vmatprep.subr.bf16.mxu0 %v7124_v44  ;;  %v4652_v43 = vld [vmem:[%s9022_s18 + $0x200] sm:$0xff]  ;;  %v4653_v44 = vld [vmem:[%s9022_s18 + $0x208] sm:$0xff] }
0x14f1   :  { %v7142_v13 = vpack.c.bf16 %v4653_v44, %v4652_v43 }
0x14f3   :  { %7095 = vmatpush3.bf16.msra.mxu1 %v7094_v3  ;;  %7127 = vmatpush3.bf16.msra.mxu0 %v7126_v29 }
0x14f4   :  { %7097 = vmatprep.subr.bf16.mxu1 %v7096_v40  ;;  %7129 = vmatprep.subr.bf16.mxu0 %v7128_v12  ;;  %v4702_v40 = vld [vmem:[%s9022_s18 + $0x390] sm:$0xff]  ;;  %v4703_v12 = vld [vmem:[%s9022_s18 + $0x398] sm:$0xff] }
0x14f5   :  { %v7176_v23 = vpack.c.bf16 %v4703_v12, %v4702_v40 }
0x14f7   :  { %7099 = vmatpush3.bf16.msra.mxu1 %v7098_v18  ;;  %7131 = vmatpush3.bf16.msra.mxu0 %v7130_v19 }
0x14f8   :  { %7101 = vmatprep.subr.bf16.mxu1 %v7100_v7  ;;  %7133 = vmatprep.subr.bf16.mxu0 %v7132_v31  ;;  %v7144_v31 = vpack.c.bf16 %v4671_v45, %v4670_v62  ;;  %v4674_v62 = vld [vmem:[%s9022_s18 + $0x2b0] sm:$0xff]  ;;  %v4707_v45 = vld [vmem:[%s9022_s18 + $0x3b8] sm:$0xff] }
0x14fb   :  { %7103 = vmatpush3.bf16.msra.mxu1 %v7102_v22  ;;  %7135 = vmatpush3.bf16.msra.mxu0 %v7134_v5 }
0x14fc   :  { %7105 = vmatprep.subr.bf16.mxu1 %v7104_v27  ;;  %7137 = vmatprep.subr.bf16.mxu0 %v7136_v6 }
0x14ff   :  { %7107 = vmatpush3.bf16.msra.mxu1 %v7106_v60  ;;  %7139 = vmatpush3.bf16.msra.mxu0 %v7138_v39  ;;  %v8651_v60 = vrot.slane %v8622_v46, %v8008_v9  ;;  %v4705_v39 = vld [vmem:[%s9022_s18 + $0x3a8] sm:$0xff] }
0x1500   :  { %7141 = vmatprep.subr.bf16.mxu1 %v7140_v47  ;;  %7173 = vmatprep.subr.bf16.mxu0 %v7172_v33  ;;  %v7146_v33 = vpack.c.bf16 %v4655_v25, %v4654_v17  ;;  %v7180_v50 = vpack.c.bf16 %v4705_v39, %v4704_v15  ;;  %v4658_v17 = vld [vmem:[%s9022_s18 + $0x230] sm:$0xff]  ;;  %v4691_v25 = vld [vmem:[%s9022_s18 + $0x338] sm:$0xff] }
0x159c   :  { %v4006_v48 = vpop.f32.mrb[50].mxu1  ;;  %v4083_v49 = vpop.f32.mrb[54].mxu0 }
0x159d   :  { %v4007_v53 = vadd.f32 %v4006_v48, %v3857_v34  ;;  %v4084_v3 = vadd.f32 %v4083_v49, %v3865_v38  ;;  %v4008_v29 = vpop.f32.mrb[51].mxu1  ;;  %v4085_v4 = vpop.f32.mrb[55].mxu0  ;;  %v7148_v49 = vpack.c.bf16 %v4673_v30, %v4672_v57  ;;  %v4660_v57 = vld [vmem:[%s9022_s18 + $0x240] sm:$0xff] }
0x159e   :  { %v4009_v8 = vadd.f32 %v4008_v29, %v3861_v41  ;;  %v4086_v63 = vadd.f32 %v4085_v4, %v3869_v42  ;;  %v4675_v29 = vld [vmem:[%s9022_s18 + $0x2b8] sm:$0xff]  ;;  %v4706_v4 = vld [vmem:[%s9022_s18 + $0x3b0] sm:$0xff] }
0x159f   :  { %v4556_v22 = vmax.f32 %v4007_v53, 0.0  ;;  %v4558_v5 = vmax.f32 %v4084_v3, 0.0 }
0x15a0   :  { %v4557_v18 = vmax.f32 %v4009_v8, 0.0  ;;  %v4559_v19 = vmax.f32 %v4086_v63, 0.0  ;;  %v4012_v16 = vpop.f32.mrb[52].mxu1  ;;  %v4089_v7 = vpop.f32.mrb[56].mxu0 }
0x15a1   :  { %v4013_v0 = vadd.f32 %v4012_v16, %v3857_v34  ;;  %v4090_v1 = vadd.f32 %v4089_v7, %v3865_v38  ;;  %v4014_v20 = vpop.f32.mrb[53].mxu1  ;;  %v4091_v27 = vpop.f32.mrb[57].mxu0  ;;  %v7178_v34 = vpack.c.bf16 %v4687_v54, %v4686_v21  ;;  %v4657_v38 = vld [vmem:[%s9022_s18 + $0x228] sm:$0xff]  ;;  %v7152_v7 = vpack.c.bf16 %v4675_v29, %v4674_v62  ;;  %v4676_v21 = vld [vmem:[%s9022_s18 + $0x2c0] sm:$0xff]  ;;  %v4695_v29 = vld [vmem:[%s9022_s18 + $0x358] sm:$0xff] }
0x15a2   :  { %v4015_v36 = vadd.f32 %v4014_v20, %v3861_v41  ;;  %v4092_v6 = vadd.f32 %v4091_v27, %v3869_v42  ;;  %4915 = vmatprep.mubr.f32.mxu1 %v4557_v18  ;;  %4990 = vmatprep.mubr.f32.mxu0 %v4559_v19  ;;  %v4688_v41 = vld [vmem:[%s9022_s18 + $0x320] sm:$0xff]  ;;  %v4659_v18 = vld [vmem:[%s9022_s18 + $0x238] sm:$0xff] }
0x15a3   :  { %4916 = vmatmul.mubr.f32.vlgmr.msra.gmra.mrb[66].mxu1 %v4556_v22  ;;  %4991 = vmatmul.mubr.f32.vlgmr.msra.gmra.mrb[70].mxu0 %v4558_v5  ;;  %v4572_v42 = vmax.f32 %v4013_v0, 0.0  ;;  %v4574_v43 = vmax.f32 %v4090_v1, 0.0  ;;  %v4677_v22 = vld [vmem:[%s9022_s18 + $0x2c8] sm:$0xff]  ;;  %v4708_v5 = vld [vmem:[%s9022_s18 + $0x3c0] sm:$0xff]  ;;  %v7154_v27 = vpack.c.bf16 %v4659_v18, %v4658_v17 }
0x15a4   :  { %v4573_v37 = vmax.f32 %v4015_v36, 0.0  ;;  %v4575_v11 = vmax.f32 %v4092_v6, 0.0  ;;  %7143 = vmatpush3.bf16.msra.mxu1 %v7142_v13  ;;  %7175 = vmatpush3.bf16.msra.mxu0 %v7174_v10  ;;  %v8657_v47 = vpop.f32.mrb[54].mxu1  ;;  %v8659_v32 = vpop.f32.mrb[58].mxu0  ;;  %v7150_v13 = vpack.c.bf16 %v4657_v38, %v4656_v14  ;;  %v7182_v10 = vpack.c.bf16 %v4689_v61, %v4688_v41  ;;  %v4709_v0 = vld [vmem:[%s9022_s18 + $0x3c8] sm:$0xff]  ;;  %v4692_v14 = vld [vmem:[%s9022_s18 + $0x340] sm:$0xff] }
0x15a5   :  { %v4162_v44 = vpop.f32.mrb[55].mxu1  ;;  %v4239_v48 = vpop.f32.mrb[59].mxu0  ;;  %7145 = vmatprep.subr.bf16.mxu1 %v7144_v31  ;;  %7177 = vmatprep.subr.bf16.mxu0 %v7176_v23  ;;  %v7184_v31 = vpack.c.bf16 %v4707_v45, %v4706_v4  ;;  %v4690_v23 = vld [vmem:[%s9022_s18 + $0x330] sm:$0xff]  ;;  %v4661_v36 = vld [vmem:[%s9022_s18 + $0x248] sm:$0xff]  ;;  %v7156_v15 = vpack.c.bf16 %v4677_v22, %v4676_v21  ;;  %v7188_v39 = vpack.c.bf16 %v4709_v0, %v4708_v5  ;;  %v4711_v38 = vld [vmem:[%s9022_s18 + $0x3d8] sm:$0xff] }
0x15a6   :  { %v4163_v53 = vadd.f32 %v4162_v44, %v8642_v52  ;;  %v4240_v3 = vadd.f32 %v4239_v48, %v8651_v60  ;;  %4920 = vmatprep.mubr.f32.mxu1 %v4573_v37  ;;  %4995 = vmatprep.mubr.f32.mxu0 %v4575_v11  ;;  %v7186_v54 = vpack.c.bf16 %v4691_v25, %v4690_v23  ;;  %v4693_v37 = vld [vmem:[%s9022_s18 + $0x348] sm:$0xff]  ;;  %v4678_v11 = vld [vmem:[%s9022_s18 + $0x2d0] sm:$0xff]  ;;  %v4680_v4 = vld [vmem:[%s9022_s18 + $0x2e0] sm:$0xff] }
0x15a7   :  { %4921 = vmatmul.mubr.f32.gmra.mrb[68].mxu1 %v4572_v42  ;;  %4996 = vmatmul.mubr.f32.gmra.mrb[72].mxu0 %v4574_v43  ;;  %v7158_v43 = vpack.c.bf16 %v4661_v36, %v4660_v57  ;;  %v7190_v44 = vpack.c.bf16 %v4693_v37, %v4692_v14  ;;  %v4662_v48 = vld [vmem:[%s9022_s18 + $0x250] sm:$0xff]  ;;  %v4681_v45 = vld [vmem:[%s9022_s18 + $0x2e8] sm:$0xff]  ;;  %v4696_v5 = vld [vmem:[%s9022_s18 + $0x360] sm:$0xff] }
0x15a8   :  { %v4561_v40 = vmax.f32 %v4163_v53, 0.0  ;;  %v4563_v12 = vmax.f32 %v4240_v3, 0.0  ;;  %7147 = vmatpush3.bf16.msra.mxu1 %v7146_v33  ;;  %7179 = vmatpush3.bf16.msra.mxu0 %v7178_v34  ;;  %v8670_v8 = vpop.f32.mrb[56].mxu1  ;;  %v8672_v63 = vpop.f32.mrb[60].mxu0  ;;  %v4679_v33 = vld [vmem:[%s9022_s18 + $0x2d8] sm:$0xff]  ;;  %v4710_v34 = vld [vmem:[%s9022_s18 + $0x3d0] sm:$0xff]  ;;  %v7164_v21 = vpack.c.bf16 %v4681_v45, %v4680_v4 }
0x15a9   :  { %v8676_v19 = vpop.f32.mrb[57].mxu1  ;;  %v8678_v16 = vpop.f32.mrb[61].mxu0  ;;  %7149 = vmatprep.subr.bf16.mxu1 %v7148_v49  ;;  %7181 = vmatprep.subr.bf16.mxu0 %v7180_v50  ;;  %v4663_v49 = vld [vmem:[%s9022_s18 + $0x258] sm:$0xff]  ;;  %v7160_v62 = vpack.c.bf16 %v4679_v33, %v4678_v11  ;;  %v7192_v53 = vpack.c.bf16 %v4711_v38, %v4710_v34  ;;  %v4694_v3 = vld [vmem:[%s9022_s18 + $0x350] sm:$0xff]  ;;  %v4697_v0 = vld [vmem:[%s9022_s18 + $0x368] sm:$0xff] }
0x15aa   :  { %5065 = vmatprep.mubr.f32.mxu1 %v4561_v40  ;;  %5140 = vmatprep.mubr.f32.mxu0 %v4563_v12  ;;  %v4712_v40 = vld [vmem:[%s9022_s18 + $0x3e0] sm:$0xff]  ;;  %v4713_v12 = vld [vmem:[%s9022_s18 + $0x3e8] sm:$0xff]  ;;  %v7162_v17 = vpack.c.bf16 %v4663_v49, %v4662_v48  ;;  %v7194_v18 = vpack.c.bf16 %v4695_v29, %v4694_v3  ;;  %v4714_v57 = vld [vmem:[%s9022_s18 + $0x3f0] sm:$0xff]  ;;  %v7198_v11 = vpack.c.bf16 %v4697_v0, %v4696_v5 }
0x15ab   :  { %v7196_v22 = vpack.c.bf16 %v4713_v12, %v4712_v40  ;;  %v4715_v36 = vld [vmem:[%s9022_s18 + $0x3f8] sm:$0xff]  ;;  %v4666_v33 = vld [vmem:[%s9022_s18 + $0x270] sm:$0xff]  ;;  %v4732_v3 = vld [vmem:[%s9022_s18 + $0x480] sm:$0xff] }
0x15ac   :  { %7151 = vmatpush3.bf16.msra.mxu1 %v7150_v13  ;;  %7183 = vmatpush3.bf16.msra.mxu0 %v7182_v10  ;;  %v8686_v1 = vpop.f32.mrb[58].mxu1  ;;  %v8688_v20 = vpop.f32.mrb[62].mxu0  ;;  %v4667_v34 = vld [vmem:[%s9022_s18 + $0x278] sm:$0xff]  ;;  %v4698_v38 = vld [vmem:[%s9022_s18 + $0x370] sm:$0xff]  ;;  %v4733_v29 = vld [vmem:[%s9022_s18 + $0x488] sm:$0xff] }
0x15ad   :  { %v8692_v6 = vpop.f32.mrb[59].mxu1  ;;  %v8694_v30 = vpop.f32.mrb[63].mxu0  ;;  %7153 = vmatprep.subr.bf16.mxu1 %v7152_v7  ;;  %7185 = vmatprep.subr.bf16.mxu0 %v7184_v31  ;;  %v4664_v7 = vld [vmem:[%s9022_s18 + $0x260] sm:$0xff]  ;;  %v4665_v31 = vld [vmem:[%s9022_s18 + $0x268] sm:$0xff] }
0x15ae   :  { %v7166_v37 = vpack.c.bf16 %v4665_v31, %v4664_v7  ;;  %v4764_v4 = vld [vmem:[%s9022_s18 + $0x580] sm:$0xff]  ;;  %v4765_v45 = vld [vmem:[%s9022_s18 + $0x588] sm:$0xff]  ;;  %v7204_v7 = vpack.c.bf16 %v4733_v29, %v4732_v3 }
0x15af   :  { %v8755_v40 = vld [vmem:[%s9023_s22 + $0x8] sm:$0xff]  ;;  %v4748_v31 = vld [vmem:[%s9022_s18 + $0x500] sm:$0xff] }
0x15b0   :  { %7155 = vmatpush3.bf16.msra.mxu1 %v7154_v27  ;;  %7187 = vmatpush3.bf16.msra.mxu0 %v7186_v54  ;;  %v8702_v41 = vpop.f32.mrb[60].mxu1  ;;  %v8704_v42 = vpop.f32.mrb[64].mxu0  ;;  %v4682_v27 = vld [vmem:[%s9022_s18 + $0x2f0] sm:$0xff]  ;;  %v4683_v54 = vld [vmem:[%s9022_s18 + $0x2f8] sm:$0xff]  ;;  %v4717_v12 = vld [vmem:[%s9022_s18 + $0x408] sm:$0xff] }
0x15b1   :  { %v8708_v50 = vpop.f32.mrb[61].mxu1  ;;  %v8710_v61 = vpop.f32.mrb[65].mxu0  ;;  %7157 = vmatprep.subr.bf16.mxu1 %v7156_v15  ;;  %7189 = vmatprep.subr.bf16.mxu0 %v7188_v39  ;;  %v3873_v15 = vrot.slane %v8622_v46, %v8089_v26  ;;  %v7168_v49 = vpack.c.bf16 %v4683_v54, %v4682_v27  ;;  %v7236_v27 = vpack.c.bf16 %v4765_v45, %v4764_v4  ;;  %v4735_v54 = vld [vmem:[%s9022_s18 + $0x498] sm:$0xff]  ;;  %v4750_v4 = vld [vmem:[%s9022_s18 + $0x510] sm:$0xff] }
0x15b2   :  { %v4751_v45 = vld [vmem:[%s9022_s18 + $0x518] sm:$0xff] }
0x15b3   :  { %v4161_v5 = vadd.f32 %v8657_v47, %v3873_v15  ;;  %v8777_v47 = vrot.slane %v8755_v40, %v7986_v59  ;;  %v4718_v59 = vld [vmem:[%s9022_s18 + $0x410] sm:$0xff] }
0x15b4   :  { %7159 = vmatpush3.bf16.msra.mxu1 %v7158_v43  ;;  %7191 = vmatpush3.bf16.msra.mxu0 %v7190_v44  ;;  %v8718_v13 = vpop.f32.mrb[62].mxu1  ;;  %v8720_v10 = vpop.f32.mrb[66].mxu0  ;;  %v3881_v43 = vrot.slane %v8622_v46, %v8098_v35  ;;  %v4716_v46 = vld [vmem:[%s9022_s18 + $0x400] sm:$0xff] }
0x15b5   :  { %v8724_v23 = vpop.f32.mrb[63].mxu1  ;;  %v8726_v25 = vpop.f32.mrb[67].mxu0  ;;  %7161 = vmatprep.subr.bf16.mxu1 %v7160_v62  ;;  %7193 = vmatprep.subr.bf16.mxu0 %v7192_v53  ;;  %v7200_v62 = vpack.c.bf16 %v4715_v36, %v4714_v57  ;;  %v4699_v53 = vld [vmem:[%s9022_s18 + $0x378] sm:$0xff]  ;;  %v4766_v57 = vld [vmem:[%s9022_s18 + $0x590] sm:$0xff]  ;;  %v4394_v29 = vadd.f32 %v8694_v30, %v8777_v47 }
0x15b6   :  { %v4238_v0 = vadd.f32 %v8659_v32, %v3881_v43  ;;  %v4767_v36 = vld [vmem:[%s9022_s18 + $0x598] sm:$0xff]  ;;  %v7206_v32 = vpack.c.bf16 %v4717_v12, %v4716_v46  ;;  %v7242_v12 = vpack.c.bf16 %v4751_v45, %v4750_v4 }
0x15b8   :  { %7163 = vmatpush3.bf16.msra.mxu1 %v7162_v17  ;;  %7195 = vmatpush3.bf16.msra.mxu0 %v7194_v18  ;;  %v8736_v39 = vpop.f32.mrb[64].mxu1  ;;  %v8738_v14 = vpop.f32.mrb[68].mxu0  ;;  %v7170_v17 = vpack.c.bf16 %v4667_v34, %v4666_v33  ;;  %v7202_v18 = vpack.c.bf16 %v4699_v53, %v4698_v38  ;;  %v8773_v33 = vrot.slane %v8755_v40, %v7983_v58  ;;  %v4560_v38 = vmax.f32 %v4161_v5, 0.0  ;;  %v4752_v5 = vld [vmem:[%s9022_s18 + $0x520] sm:$0xff] }
0x15b9   :  { %v8745_v44 = vpop.f32.mrb[65].mxu1  ;;  %v8747_v48 = vpop.f32.mrb[69].mxu0  ;;  %7165 = vmatprep.subr.bf16.mxu1 %v7164_v21  ;;  %7197 = vmatprep.subr.bf16.mxu0 %v7196_v22  ;;  %v4749_v21 = vld [vmem:[%s9022_s18 + $0x508] sm:$0xff]  ;;  %v4734_v22 = vld [vmem:[%s9022_s18 + $0x490] sm:$0xff]  ;;  %v4244_v58 = vadd.f32 %v8672_v63, %v3881_v43 }
0x15ba   :  { %v7238_v34 = vpack.c.bf16 %v4749_v21, %v4748_v31  ;;  %v4317_v3 = vadd.f32 %v8692_v6, %v8773_v33  ;;  %v4737_v63 = vld [vmem:[%s9022_s18 + $0x4a8] sm:$0xff]  ;;  %v4567_v31 = vmax.f32 %v4394_v29, 0.0 }
0x15bb   :  { %v4769_v43 = vld [vmem:[%s9022_s18 + $0x5a8] sm:$0xff]  ;;  %v4578_v6 = vmax.f32 %v4244_v58, 0.0 }
0x15bc   :  { %7167 = vmatpush3.bf16.msra.mxu1 %v7166_v37  ;;  %7199 = vmatpush3.bf16.msra.mxu0 %v7198_v11  ;;  %v4169_v37 = vadd.f32 %v8676_v19, %v8642_v52  ;;  %v4246_v11 = vadd.f32 %v8678_v16, %v8651_v60  ;;  %v7208_v52 = vpack.c.bf16 %v4735_v54, %v4734_v22  ;;  %v4562_v60 = vmax.f32 %v4238_v0, 0.0  ;;  %v4753_v0 = vld [vmem:[%s9022_s18 + $0x528] sm:$0xff]  ;;  %v4739_v54 = vld [vmem:[%s9022_s18 + $0x4b8] sm:$0xff] }
0x15bd   :  { %7169 = vmatprep.subr.bf16.mxu1 %v7168_v49  ;;  %7201 = vmatprep.subr.bf16.mxu0 %v7200_v62  ;;  %v7240_v19 = vpack.c.bf16 %v4767_v36, %v4766_v57  ;;  %v4167_v16 = vadd.f32 %v8670_v8, %v3873_v15  ;;  %v4719_v49 = vld [vmem:[%s9022_s18 + $0x418] sm:$0xff]  ;;  %v4736_v8 = vld [vmem:[%s9022_s18 + $0x4a0] sm:$0xff]  ;;  %v4770_v57 = vld [vmem:[%s9022_s18 + $0x5b0] sm:$0xff] }
0x15be   :  { %v4577_v62 = vmax.f32 %v4169_v37, 0.0  ;;  %v4579_v53 = vmax.f32 %v4246_v11, 0.0  ;;  %v4768_v15 = vld [vmem:[%s9022_s18 + $0x5a0] sm:$0xff]  ;;  %v7210_v30 = vpack.c.bf16 %v4719_v49, %v4718_v59  ;;  %v7212_v21 = vpack.c.bf16 %v4737_v63, %v4736_v8  ;;  %v4771_v36 = vld [vmem:[%s9022_s18 + $0x5b8] sm:$0xff]  ;;  %v4741_v58 = vld [vmem:[%s9022_s18 + $0x4c8] sm:$0xff] }
0x15bf   :  { %v4576_v46 = vmax.f32 %v4167_v16, 0.0  ;;  %v7244_v22 = vpack.c.bf16 %v4769_v43, %v4768_v15  ;;  %v7246_v11 = vpack.c.bf16 %v4753_v0, %v4752_v5  ;;  %v4740_v16 = vld [vmem:[%s9022_s18 + $0x4c0] sm:$0xff]  ;;  %v4773_v49 = vld [vmem:[%s9022_s18 + $0x5c8] sm:$0xff]  ;;  %v4742_v15 = vld [vmem:[%s9022_s18 + $0x4d0] sm:$0xff] }
0x15c0   :  { %7171 = vmatpush3.bf16.msra.mxu1 %v7170_v17  ;;  %7203 = vmatpush3.bf16.msra.mxu0 %v7202_v18  ;;  %v4720_v17 = vld [vmem:[%s9022_s18 + $0x420] sm:$0xff]  ;;  %v4721_v18 = vld [vmem:[%s9022_s18 + $0x428] sm:$0xff]  ;;  %v7220_v4 = vpack.c.bf16 %v4741_v58, %v4740_v16  ;;  %v4743_v43 = vld [vmem:[%s9022_s18 + $0x4d8] sm:$0xff] }
0x15c1   :  { %7205 = vmatprep.subr.bf16.mxu1 %v7204_v7  ;;  %7237 = vmatprep.subr.bf16.mxu0 %v7236_v27  ;;  %v4565_v7 = vmax.f32 %v4317_v3, 0.0  ;;  %v4738_v27 = vld [vmem:[%s9022_s18 + $0x4b0] sm:$0xff]  ;;  %v7214_v37 = vpack.c.bf16 %v4721_v18, %v4720_v17  ;;  %v4772_v59 = vld [vmem:[%s9022_s18 + $0x5c0] sm:$0xff]  ;;  %v4725_v29 = vld [vmem:[%s9022_s18 + $0x448] sm:$0xff] }
0x15c2   :  { %v4724_v3 = vld [vmem:[%s9022_s18 + $0x440] sm:$0xff]  ;;  %v7252_v45 = vpack.c.bf16 %v4773_v49, %v4772_v59  ;;  %v4757_v63 = vld [vmem:[%s9022_s18 + $0x548] sm:$0xff]  ;;  %v4726_v17 = vld [vmem:[%s9022_s18 + $0x450] sm:$0xff]  ;;  %v3889_v59 = vrot.slane %v8755_v40, %v7974_v55 }
0x15c3   :  { %5066 = vmatmul.mubr.f32.vlgmr.msra.gmra.mrb[70].mxu1 %v4560_v38  ;;  %5141 = vmatmul.mubr.f32.vlgmr.msra.gmra.mrb[74].mxu0 %v4562_v60  ;;  %v4754_v38 = vld [vmem:[%s9022_s18 + $0x530] sm:$0xff]  ;;  %v4755_v60 = vld [vmem:[%s9022_s18 + $0x538] sm:$0xff]  ;;  %v4756_v8 = vld [vmem:[%s9022_s18 + $0x540] sm:$0xff] }
0x15c4   :  { %5070 = vmatprep.mubr.f32.mxu1 %v4577_v62  ;;  %5145 = vmatprep.mubr.f32.mxu0 %v4579_v53  ;;  %v7250_v53 = vpack.c.bf16 %v4755_v60, %v4754_v38  ;;  %v4727_v18 = vld [vmem:[%s9022_s18 + $0x458] sm:$0xff]  ;;  %v4744_v5 = vld [vmem:[%s9022_s18 + $0x4e0] sm:$0xff]  ;;  %v4745_v0 = vld [vmem:[%s9022_s18 + $0x4e8] sm:$0xff] }
0x15c5   :  { %7207 = vmatpush3.bf16.msra.mxu1 %v7206_v32  ;;  %7239 = vmatpush3.bf16.msra.mxu0 %v7238_v34  ;;  %v4722_v32 = vld [vmem:[%s9022_s18 + $0x430] sm:$0xff]  ;;  %v4723_v34 = vld [vmem:[%s9022_s18 + $0x438] sm:$0xff] }
0x15c6   :  { %7209 = vmatprep.subr.bf16.mxu1 %v7208_v52  ;;  %7241 = vmatprep.subr.bf16.mxu0 %v7240_v19  ;;  %v7216_v52 = vpack.c.bf16 %v4739_v54, %v4738_v27  ;;  %v7248_v19 = vpack.c.bf16 %v4771_v36, %v4770_v57  ;;  %v7218_v62 = vpack.c.bf16 %v4723_v34, %v4722_v32  ;;  %v4776_v27 = vld [vmem:[%s9022_s18 + $0x5e0] sm:$0xff]  ;;  %v4777_v54 = vld [vmem:[%s9022_s18 + $0x5e8] sm:$0xff]  ;;  %v4746_v38 = vld [vmem:[%s9022_s18 + $0x4f0] sm:$0xff] }
0x15c7   :  { %5071 = vmatmul.mubr.f32.gmra.mrb[72].mxu1 %v4576_v46  ;;  %5146 = vmatmul.mubr.f32.gmra.mrb[76].mxu0 %v4578_v6  ;;  %v4774_v46 = vld [vmem:[%s9022_s18 + $0x5d0] sm:$0xff]  ;;  %v4775_v6 = vld [vmem:[%s9022_s18 + $0x5d8] sm:$0xff]  ;;  %v7226_v57 = vpack.c.bf16 %v4727_v18, %v4726_v17  ;;  %v7228_v32 = vpack.c.bf16 %v4745_v0, %v4744_v5  ;;  %v7260_v34 = vpack.c.bf16 %v4777_v54, %v4776_v27  ;;  %v4812_v18 = vld [vmem:[%s9022_s18 + $0x700] sm:$0xff] }
0x15c8   :  { %5215 = vmatprep.mubr.f32.mxu1 %v4565_v7  ;;  %5290 = vmatprep.mubr.f32.mxu0 %v4567_v31  ;;  %v7224_v7 = vpack.c.bf16 %v4743_v43, %v4742_v15  ;;  %v7256_v31 = vpack.c.bf16 %v4775_v6, %v4774_v46  ;;  %v4747_v60 = vld [vmem:[%s9022_s18 + $0x4f8] sm:$0xff]  ;;  %v4778_v16 = vld [vmem:[%s9022_s18 + $0x5f0] sm:$0xff]  ;;  %v4797_v15 = vld [vmem:[%s9022_s18 + $0x688] sm:$0xff] }
0x15c9   :  { %7211 = vmatpush3.bf16.msra.mxu1 %v7210_v30  ;;  %7243 = vmatpush3.bf16.msra.mxu0 %v7242_v12  ;;  %v7222_v30 = vpack.c.bf16 %v4725_v29, %v4724_v3  ;;  %v7254_v12 = vpack.c.bf16 %v4757_v63, %v4756_v8  ;;  %v4779_v58 = vld [vmem:[%s9022_s18 + $0x5f8] sm:$0xff]  ;;  %v4762_v29 = vld [vmem:[%s9022_s18 + $0x570] sm:$0xff]  ;;  %v4796_v63 = vld [vmem:[%s9022_s18 + $0x680] sm:$0xff] }
0x15ca   :  { %7213 = vmatprep.subr.bf16.mxu1 %v7212_v21  ;;  %7245 = vmatprep.subr.bf16.mxu0 %v7244_v22  ;;  %v4758_v21 = vld [vmem:[%s9022_s18 + $0x550] sm:$0xff]  ;;  %v4759_v22 = vld [vmem:[%s9022_s18 + $0x558] sm:$0xff]  ;;  %v7264_v55 = vpack.c.bf16 %v4779_v58, %v4778_v16  ;;  %v4828_v43 = vld [vmem:[%s9022_s18 + $0x780] sm:$0xff]  ;;  %v7268_v17 = vpack.c.bf16 %v4797_v15, %v4796_v63 }
0x15cb   :  { %v7258_v36 = vpack.c.bf16 %v4759_v22, %v4758_v21  ;;  %v4731_v3 = vld [vmem:[%s9022_s18 + $0x478] sm:$0xff]  ;;  %v4829_v46 = vld [vmem:[%s9022_s18 + $0x788] sm:$0xff]  ;;  %v4780_v6 = vld [vmem:[%s9022_s18 + $0x600] sm:$0xff]  ;;  %v4315_v21 = vadd.f32 %v8686_v1, %v3889_v59  ;;  %v8865_v1 = vrot.slane %v8755_v40, %v8008_v9 }
0x15cc   :  { %v4763_v8 = vld [vmem:[%s9022_s18 + $0x578] sm:$0xff]  ;;  %v7300_v5 = vpack.c.bf16 %v4829_v46, %v4828_v43  ;;  %v4830_v27 = vld [vmem:[%s9022_s18 + $0x790] sm:$0xff]  ;;  %v4816_v63 = vld [vmem:[%s9022_s18 + $0x720] sm:$0xff] }
0x15cd   :  { %7215 = vmatpush3.bf16.msra.mxu1 %v7214_v37  ;;  %7247 = vmatpush3.bf16.msra.mxu0 %v7246_v11  ;;  %v4728_v37 = vld [vmem:[%s9022_s18 + $0x460] sm:$0xff]  ;;  %v4729_v11 = vld [vmem:[%s9022_s18 + $0x468] sm:$0xff]  ;;  %v4799_v0 = vld [vmem:[%s9022_s18 + $0x698] sm:$0xff] }
0x15ce   :  { %7217 = vmatprep.subr.bf16.mxu1 %v7216_v52  ;;  %7249 = vmatprep.subr.bf16.mxu0 %v7248_v19  ;;  %v4760_v52 = vld [vmem:[%s9022_s18 + $0x560] sm:$0xff]  ;;  %v4761_v19 = vld [vmem:[%s9022_s18 + $0x568] sm:$0xff]  ;;  %v7230_v49 = vpack.c.bf16 %v4729_v11, %v4728_v37  ;;  %v4831_v54 = vld [vmem:[%s9022_s18 + $0x798] sm:$0xff]  ;;  %v8861_v37 = vrot.slane %v8755_v40, %v7999_v2 }
0x15cf   :  { %v4782_v9 = vld [vmem:[%s9022_s18 + $0x610] sm:$0xff]  ;;  %v4815_v58 = vld [vmem:[%s9022_s18 + $0x718] sm:$0xff]  ;;  %v4817_v15 = vld [vmem:[%s9022_s18 + $0x728] sm:$0xff] }
0x15d0   :  { %v4814_v16 = vld [vmem:[%s9022_s18 + $0x710] sm:$0xff]  ;;  %v4803_v46 = vld [vmem:[%s9022_s18 + $0x6b8] sm:$0xff] }
0x15d1   :  { %7219 = vmatpush3.bf16.msra.mxu1 %v7218_v62  ;;  %7251 = vmatpush3.bf16.msra.mxu0 %v7250_v53  ;;  %v7262_v62 = vpack.c.bf16 %v4761_v19, %v4760_v52  ;;  %v4730_v53 = vld [vmem:[%s9022_s18 + $0x470] sm:$0xff] }
0x15d2   :  { %7221 = vmatprep.subr.bf16.mxu1 %v7220_v4  ;;  %7253 = vmatprep.subr.bf16.mxu0 %v7252_v45  ;;  %v3897_v4 = vrot.slane %v8755_v40, %v7977_v56  ;;  %v7232_v45 = vpack.c.bf16 %v4747_v60, %v4746_v38  ;;  %v7234_v56 = vpack.c.bf16 %v4731_v3, %v4730_v53  ;;  %v4784_v3 = vld [vmem:[%s9022_s18 + $0x620] sm:$0xff]  ;;  %v4802_v43 = vld [vmem:[%s9022_s18 + $0x6b0] sm:$0xff] }
0x15d3   :  { %v4471_v38 = vadd.f32 %v8724_v23, %v8861_v37  ;;  %v4548_v60 = vadd.f32 %v8726_v25, %v8865_v1  ;;  %v7306_v53 = vpack.c.bf16 %v4815_v58, %v4814_v16 }
0x15d4   :  { %v4392_v22 = vadd.f32 %v8688_v20, %v3897_v4  ;;  %v4398_v2 = vadd.f32 %v8704_v42, %v3897_v4  ;;  %v4801_v42 = vld [vmem:[%s9022_s18 + $0x6a8] sm:$0xff] }
0x15d5   :  { %7223 = vmatpush3.bf16.msra.mxu1 %v7222_v30  ;;  %7255 = vmatpush3.bf16.msra.mxu0 %v7254_v12  ;;  %v4781_v30 = vld [vmem:[%s9022_s18 + $0x608] sm:$0xff]  ;;  %v7266_v12 = vpack.c.bf16 %v4763_v8, %v4762_v29  ;;  %v4569_v4 = vmax.f32 %v4471_v38, 0.0  ;;  %v4790_v38 = vld [vmem:[%s9022_s18 + $0x650] sm:$0xff] }
0x15d6   :  { %7225 = vmatprep.subr.bf16.mxu1 %v7224_v7  ;;  %7257 = vmatprep.subr.bf16.mxu0 %v7256_v31  ;;  %v4813_v7 = vld [vmem:[%s9022_s18 + $0x708] sm:$0xff]  ;;  %v4798_v31 = vld [vmem:[%s9022_s18 + $0x690] sm:$0xff]  ;;  %v7270_v20 = vpack.c.bf16 %v4781_v30, %v4780_v6  ;;  %v4582_v23 = vmax.f32 %v4398_v2, 0.0  ;;  %v4835_v30 = vld [vmem:[%s9022_s18 + $0x7b8] sm:$0xff] }
0x15d7   :  { %v7302_v11 = vpack.c.bf16 %v4813_v7, %v4812_v18  ;;  %v4785_v29 = vld [vmem:[%s9022_s18 + $0x628] sm:$0xff]  ;;  %v4834_v6 = vld [vmem:[%s9022_s18 + $0x7b0] sm:$0xff]  ;;  %v4787_v18 = vld [vmem:[%s9022_s18 + $0x638] sm:$0xff]  ;;  %v7280_v7 = vpack.c.bf16 %v4803_v46, %v4802_v43 }
0x15d8   :  { %v4807_v2 = vld [vmem:[%s9022_s18 + $0x6d8] sm:$0xff]  ;;  %v4842_v43 = vld [vmem:[%s9022_s18 + $0x7f0] sm:$0xff] }
0x15d9   :  { %7227 = vmatpush3.bf16.msra.mxu1 %v7226_v57  ;;  %7259 = vmatpush3.bf16.msra.mxu0 %v7258_v36  ;;  %v4323_v57 = vadd.f32 %v8708_v50, %v8773_v33  ;;  %v4400_v36 = vadd.f32 %v8710_v61, %v8777_v47  ;;  %v7272_v50 = vpack.c.bf16 %v4799_v0, %v4798_v31  ;;  %v4566_v61 = vmax.f32 %v4392_v22, 0.0  ;;  %v4819_v22 = vld [vmem:[%s9022_s18 + $0x738] sm:$0xff]  ;;  %v4805_v0 = vld [vmem:[%s9022_s18 + $0x6c8] sm:$0xff] }
0x15da   :  { %7229 = vmatprep.subr.bf16.mxu1 %v7228_v32  ;;  %7261 = vmatprep.subr.bf16.mxu0 %v7260_v34  ;;  %v7304_v33 = vpack.c.bf16 %v4831_v54, %v4830_v27  ;;  %v4564_v32 = vmax.f32 %v4315_v21, 0.0  ;;  %v4321_v47 = vadd.f32 %v8702_v41, %v3889_v59  ;;  %v4783_v34 = vld [vmem:[%s9022_s18 + $0x618] sm:$0xff]  ;;  %v4800_v41 = vld [vmem:[%s9022_s18 + $0x6a0] sm:$0xff]  ;;  %v7312_v31 = vpack.c.bf16 %v4835_v30, %v4834_v6  ;;  %v4818_v21 = vld [vmem:[%s9022_s18 + $0x730] sm:$0xff] }
0x15db   :  { %v4581_v52 = vmax.f32 %v4323_v57, 0.0  ;;  %v4583_v19 = vmax.f32 %v4400_v36, 0.0  ;;  %v4832_v59 = vld [vmem:[%s9022_s18 + $0x7a0] sm:$0xff]  ;;  %v7274_v25 = vpack.c.bf16 %v4783_v34, %v4782_v9  ;;  %v4837_v54 = vld [vmem:[%s9022_s18 + $0x7c8] sm:$0xff]  ;;  %v7314_v36 = vpack.c.bf16 %v4819_v22, %v4818_v21  ;;  %v4838_v9 = vld [vmem:[%s9022_s18 + $0x7d0] sm:$0xff] }
0x15dc   :  { %v4836_v27 = vld [vmem:[%s9022_s18 + $0x7c0] sm:$0xff]  ;;  %v4839_v34 = vld [vmem:[%s9022_s18 + $0x7d8] sm:$0xff]  ;;  %v3905_v6 = vrot.slane %v8755_v40, %v8089_v26  ;;  %v4826_v21 = vld [vmem:[%s9022_s18 + $0x770] sm:$0xff] }
0x15dd   :  { %7231 = vmatpush3.bf16.msra.mxu1 %v7230_v49  ;;  %7263 = vmatpush3.bf16.msra.mxu0 %v7262_v62  ;;  %v4833_v49 = vld [vmem:[%s9022_s18 + $0x7a8] sm:$0xff]  ;;  %v4580_v62 = vmax.f32 %v4321_v47, 0.0  ;;  %v4806_v47 = vld [vmem:[%s9022_s18 + $0x6d0] sm:$0xff]  ;;  %v7320_v58 = vpack.c.bf16 %v4839_v34, %v4838_v9  ;;  %v4843_v46 = vld [vmem:[%s9022_s18 + $0x7f8] sm:$0xff] }
0x15de   :  { %7233 = vmatprep.subr.bf16.mxu1 %v7232_v45  ;;  %7265 = vmatprep.subr.bf16.mxu0 %v7264_v55  ;;  %v4571_v45 = vmax.f32 %v4548_v60, 0.0  ;;  %v7276_v55 = vpack.c.bf16 %v4801_v42, %v4800_v41  ;;  %v7308_v8 = vpack.c.bf16 %v4833_v49, %v4832_v59  ;;  %v4791_v60 = vld [vmem:[%s9022_s18 + $0x658] sm:$0xff]  ;;  %v7288_v16 = vpack.c.bf16 %v4807_v2, %v4806_v47  ;;  %v4822_v41 = vld [vmem:[%s9022_s18 + $0x750] sm:$0xff]  ;;  %v4808_v59 = vld [vmem:[%s9022_s18 + $0x6e0] sm:$0xff] }
0x15df   :  { %v4823_v42 = vld [vmem:[%s9022_s18 + $0x758] sm:$0xff]  ;;  %v4809_v49 = vld [vmem:[%s9022_s18 + $0x6e8] sm:$0xff]  ;;  %v4469_v26 = vadd.f32 %v8718_v13, %v3905_v6 }
0x15e0   :  { %v4827_v22 = vld [vmem:[%s9022_s18 + $0x778] sm:$0xff] }
0x15e1   :  { %7235 = vmatpush3.bf16.msra.mxu1 %v7234_v56  ;;  %7267 = vmatpush3.bf16.msra.mxu0 %v7266_v12  ;;  %v7278_v56 = vpack.c.bf16 %v4785_v29, %v4784_v3  ;;  %v7310_v12 = vpack.c.bf16 %v4817_v15, %v4816_v63  ;;  %v4792_v3 = vld [vmem:[%s9022_s18 + $0x660] sm:$0xff]  ;;  %v4793_v29 = vld [vmem:[%s9022_s18 + $0x668] sm:$0xff]  ;;  %v4810_v63 = vld [vmem:[%s9022_s18 + $0x6f0] sm:$0xff] }
0x15e2   :  { %7269 = vmatprep.subr.bf16.mxu1 %v7268_v17  ;;  %7301 = vmatprep.subr.bf16.mxu0 %v7300_v5  ;;  %v4786_v17 = vld [vmem:[%s9022_s18 + $0x630] sm:$0xff]  ;;  %v4804_v5 = vld [vmem:[%s9022_s18 + $0x6c0] sm:$0xff]  ;;  %v4811_v15 = vld [vmem:[%s9022_s18 + $0x6f8] sm:$0xff]  ;;  %v7294_v30 = vpack.c.bf16 %v4793_v29, %v4792_v3 }
0x15e3   :  { %v7282_v57 = vpack.c.bf16 %v4787_v18, %v4786_v17  ;;  %v3913_v17 = vrot.slane %v8755_v40, %v8098_v35  ;;  %v7296_v18 = vpack.c.bf16 %v4811_v15, %v4810_v63  ;;  %v4477_v35 = vadd.f32 %v8745_v44, %v8861_v37 }
0x15e4   :  { %5216 = vmatmul.mubr.f32.vlgmr.msra.gmra.mrb[74].mxu1 %v4564_v32  ;;  %5291 = vmatmul.mubr.f32.vlgmr.msra.gmra.mrb[78].mxu0 %v4566_v61  ;;  %v4820_v32 = vld [vmem:[%s9022_s18 + $0x740] sm:$0xff]  ;;  %v4821_v61 = vld [vmem:[%s9022_s18 + $0x748] sm:$0xff]  ;;  %v4554_v40 = vadd.f32 %v8747_v48, %v8865_v1 }
0x15e5   :  { %5220 = vmatprep.mubr.f32.mxu1 %v4581_v52  ;;  %5295 = vmatprep.mubr.f32.mxu0 %v4583_v19  ;;  %v7318_v19 = vpack.c.bf16 %v4821_v61, %v4820_v32  ;;  %v4585_v13 = vmax.f32 %v4477_v35, 0.0  ;;  %v5787_v1 = vld [vmem:[%s9024_s23] ss:$0 sm:$0xff] }
0x15e6   :  { %7271 = vmatpush3.bf16.msra.mxu1 %v7270_v20  ;;  %7303 = vmatpush3.bf16.msra.mxu0 %v7302_v11  ;;  %v4788_v20 = vld [vmem:[%s9022_s18 + $0x640] sm:$0xff]  ;;  %v4789_v11 = vld [vmem:[%s9022_s18 + $0x648] sm:$0xff] }
0x15e7   :  { %7273 = vmatprep.subr.bf16.mxu1 %v7272_v50  ;;  %7305 = vmatprep.subr.bf16.mxu0 %v7304_v33  ;;  %v7284_v50 = vpack.c.bf16 %v4805_v0, %v4804_v5  ;;  %v7316_v33 = vpack.c.bf16 %v4837_v54, %v4836_v27  ;;  %v7286_v52 = vpack.c.bf16 %v4789_v11, %v4788_v20  ;;  %v4568_v54 = vmax.f32 %v4469_v26, 0.0 }
0x15e8   :  { %5221 = vmatmul.mubr.f32.gmra.mrb[76].mxu1 %v4580_v62  ;;  %5296 = vmatmul.mubr.f32.gmra.mrb[80].mxu0 %v4582_v23  ;;  %v4840_v62 = vld [vmem:[%s9022_s18 + $0x7e0] sm:$0xff]  ;;  %v4841_v23 = vld [vmem:[%s9022_s18 + $0x7e8] sm:$0xff]  ;;  %v7330_v0 = vpack.c.bf16 %v4827_v22, %v4826_v21  ;;  %v4546_v27 = vadd.f32 %v8720_v10, %v3913_v17  ;;  %v4552_v20 = vadd.f32 %v8738_v14, %v3913_v17  ;;  %v4587_v11 = vmax.f32 %v4554_v40, 0.0 }
0x15e9   :  { %5365 = vmatprep.mubr.f32.mxu1 %v4569_v4  ;;  %5440 = vmatprep.mubr.f32.mxu0 %v4571_v45  ;;  %v7292_v4 = vpack.c.bf16 %v4809_v49, %v4808_v59  ;;  %v7324_v45 = vpack.c.bf16 %v4841_v23, %v4840_v62 }
0x15ea   :  { %7275 = vmatpush3.bf16.msra.mxu1 %v7274_v25  ;;  %7307 = vmatpush3.bf16.msra.mxu0 %v7306_v53  ;;  %v7290_v25 = vpack.c.bf16 %v4791_v60, %v4790_v38  ;;  %v7322_v53 = vpack.c.bf16 %v4823_v42, %v4822_v41  ;;  %v4586_v44 = vmax.f32 %v4552_v20, 0.0 }
0x15eb   :  { %7277 = vmatprep.subr.bf16.mxu1 %v7276_v55  ;;  %7309 = vmatprep.subr.bf16.mxu0 %v7308_v8  ;;  %v4824_v55 = vld [vmem:[%s9022_s18 + $0x760] sm:$0xff]  ;;  %v4825_v8 = vld [vmem:[%s9022_s18 + $0x768] sm:$0xff] }
0x15ee   :  { %7279 = vmatpush3.bf16.msra.mxu1 %v7278_v56  ;;  %7311 = vmatpush3.bf16.msra.mxu0 %v7310_v12  ;;  %v7326_v56 = vpack.c.bf16 %v4825_v8, %v4824_v55  ;;  %v4794_v12 = vld [vmem:[%s9022_s18 + $0x670] sm:$0xff] }
0x15ef   :  { %7281 = vmatprep.subr.bf16.mxu1 %v7280_v7  ;;  %7313 = vmatprep.subr.bf16.mxu0 %v7312_v31  ;;  %v7328_v7 = vpack.c.bf16 %v4843_v46, %v4842_v43  ;;  %v4795_v31 = vld [vmem:[%s9022_s18 + $0x678] sm:$0xff] }
0x15f0   :  { %v7298_v5 = vpack.c.bf16 %v4795_v31, %v4794_v12 }
0x15f2   :  { %7283 = vmatpush3.bf16.msra.mxu1 %v7282_v57  ;;  %7315 = vmatpush3.bf16.msra.mxu0 %v7314_v36  ;;  %v4570_v57 = vmax.f32 %v4546_v27, 0.0  ;;  %v4475_v36 = vadd.f32 %v8736_v39, %v3905_v6 }
0x15f3   :  { %7285 = vmatprep.subr.bf16.mxu1 %v7284_v50  ;;  %7317 = vmatprep.subr.bf16.mxu0 %v7316_v33 }
0x15f4   :  { %v4584_v10 = vmax.f32 %v4475_v36, 0.0 }
0x15f6   :  { %7287 = vmatpush3.bf16.msra.mxu1 %v7286_v52  ;;  %7319 = vmatpush3.bf16.msra.mxu0 %v7318_v19 }
0x15f7   :  { %7289 = vmatprep.subr.bf16.mxu1 %v7288_v16  ;;  %7321 = vmatprep.subr.bf16.mxu0 %v7320_v58 }
0x15fa   :  { %7291 = vmatpush3.bf16.msra.mxu1 %v7290_v25  ;;  %7323 = vmatpush3.bf16.msra.mxu0 %v7322_v53 }
0x15fb   :  { %7293 = vmatprep.subr.bf16.mxu1 %v7292_v4  ;;  %7325 = vmatprep.subr.bf16.mxu0 %v7324_v45 }
0x15fe   :  { %7295 = vmatpush3.bf16.msra.mxu1 %v7294_v30  ;;  %7327 = vmatpush3.bf16.msra.mxu0 %v7326_v56 }
0x15ff   :  { %7297 = vmatprep.subr.bf16.mxu1 %v7296_v18  ;;  %7329 = vmatprep.subr.bf16.mxu0 %v7328_v7 }
0x1602   :  { %7299 = vmatpush3.bf16.msra.mxu1 %v7298_v5  ;;  %7331 = vmatpush3.bf16.msra.mxu0 %v7330_v0 }
0x1605   :  { %5366 = vmatmul.mubr.f32.vlgmr.msra.gmra.mrb[78].mxu1 %v4568_v54  ;;  %5441 = vmatmul.mubr.f32.vlgmr.msra.gmra.mrb[82].mxu0 %v4570_v57 }
0x1606   :  { %5370 = vmatprep.mubr.f32.mxu1 %v4585_v13  ;;  %5445 = vmatprep.mubr.f32.mxu0 %v4587_v11 }
0x1609   :  { %5371 = vmatmul.mubr.f32.gmra.mrb[80].mxu1 %v4584_v10  ;;  %5446 = vmatmul.mubr.f32.gmra.mrb[84].mxu0 %v4586_v44 }
0x160a   :  { %6629 = vmatprep.mubr.msk.f32.mxu1 %vm7503_vm2, %v9002_v28 }
0x1676   :  { %v6200_v48 = vpop.f32.mrb[66].mxu1  ;;  %v6238_v37 = vpop.f32.mrb[70].mxu0 }
0x1677   :  { %v6201_v50 = vpop.f32.mrb[67].mxu1  ;;  %v6239_v39 = vpop.f32.mrb[71].mxu0 }
0x1678   :  { %v6202_v33 = vadd.f32 %v6201_v50, %v6200_v48  ;;  %v6240_v14 = vadd.f32 %v6239_v39, %v6238_v37 }
0x167a   :  { %v4918_v32 = vadd.f32 %v6202_v33, %v5787_v1  ;;  %v6203_v61 = vpop.f32.mrb[68].mxu1  ;;  %v6241_v47 = vpop.f32.mrb[72].mxu0 }
0x167b   :  { %v6204_v2 = vpop.f32.mrb[69].mxu1  ;;  %v6242_v9 = vpop.f32.mrb[73].mxu0 }
0x167c   :  { %v4993_v34 = vadd.f32 %v6240_v14, %v4918_v32  ;;  %v6205_v52 = vadd.f32 %v6204_v2, %v6203_v61  ;;  %v6243_v19 = vadd.f32 %v6242_v9, %v6241_v47 }
0x167e   :  { %v4923_v38 = vadd.f32 %v6205_v52, %v5787_v1 }
0x1680   :  { %v4998_v60 = vadd.f32 %v6243_v19, %v4923_v38 }
0x1696   :  { %v6276_v16 = vpop.f32.mrb[70].mxu1  ;;  %v6314_v58 = vpop.f32.mrb[74].mxu0 }
0x1697   :  { %v6277_v28 = vpop.f32.mrb[71].mxu1  ;;  %v6315_v41 = vpop.f32.mrb[75].mxu0 }
0x1698   :  { %v6278_v42 = vadd.f32 %v6277_v28, %v6276_v16  ;;  %v6316_v59 = vadd.f32 %v6315_v41, %v6314_v58 }
0x169a   :  { %v5068_v49 = vadd.f32 %v6278_v42, %v4993_v34  ;;  %v6279_v62 = vpop.f32.mrb[72].mxu1  ;;  %v6317_v23 = vpop.f32.mrb[76].mxu0 }
0x169b   :  { %v6280_v25 = vpop.f32.mrb[73].mxu1  ;;  %v6318_v53 = vpop.f32.mrb[77].mxu0 }
0x169c   :  { %v5143_v3 = vadd.f32 %v6316_v59, %v5068_v49  ;;  %v6281_v29 = vadd.f32 %v6280_v25, %v6279_v62  ;;  %v6319_v4 = vadd.f32 %v6318_v53, %v6317_v23  ;;  %v5788_v59 = vld [vmem:[%s9025_s26] ss:$0 sm:$0xff] }
0x169d   :  { %v5789_v62 = vld [vmem:[%s9026_s28] ss:$0 sm:$0xff] }
0x169e   :  { %v5073_v45 = vadd.f32 %v6281_v29, %v4998_v60 }
0x16a0   :  { %v5148_v55 = vadd.f32 %v6319_v4, %v5073_v45 }
0x16b7   :  { %v6352_v8 = vpop.f32.mrb[74].mxu1  ;;  %v6390_v63 = vpop.f32.mrb[78].mxu0 }
0x16b8   :  { %v6353_v15 = vpop.f32.mrb[75].mxu1  ;;  %v6391_v43 = vpop.f32.mrb[79].mxu0 }
0x16b9   :  { %v6354_v46 = vadd.f32 %v6353_v15, %v6352_v8  ;;  %v6392_v6 = vadd.f32 %v6391_v43, %v6390_v63 }
0x16bb   :  { %v5218_v30 = vadd.f32 %v6354_v46, %v5143_v3  ;;  %v6355_v56 = vpop.f32.mrb[76].mxu1  ;;  %v6393_v12 = vpop.f32.mrb[80].mxu0 }
0x16bc   :  { %v6356_v17 = vpop.f32.mrb[77].mxu1  ;;  %v6394_v18 = vpop.f32.mrb[81].mxu0 }
0x16bd   :  { %v5293_v7 = vadd.f32 %v6392_v6, %v5218_v30  ;;  %v6357_v31 = vadd.f32 %v6356_v17, %v6355_v56  ;;  %v6395_v21 = vadd.f32 %v6394_v18, %v6393_v12  ;;  %v5558_v18 = vld [vmem:[%s7711_s20] sm:$0xff] }
0x16bf   :  { %v5223_v22 = vadd.f32 %v6357_v31, %v5148_v55  ;;  %v5560_v31 = vld [vmem:[%s7711_s20 + $0x10] sm:$0xff] }
0x16c1   :  { %v5298_v5 = vadd.f32 %v6395_v21, %v5223_v22  ;;  %v7506_v21 = vmov 0.0|0.0  }
0x16c2   :  { %7332 = vmatprep.subr.bf16.mxu1 %v7506_v21 }
0x16d8   :  { %v6428_v0 = vpop.f32.mrb[78].mxu1  ;;  %v6466_v26 = vpop.f32.mrb[82].mxu0 }
0x16d9   :  { %v6429_v27 = vpop.f32.mrb[79].mxu1  ;;  %v6467_v35 = vpop.f32.mrb[83].mxu0 }
0x16da   :  { %v6430_v40 = vadd.f32 %v6429_v27, %v6428_v0  ;;  %v6468_v54 = vadd.f32 %v6467_v35, %v6466_v26 }
0x16dc   :  { %v5368_v57 = vadd.f32 %v6430_v40, %v5293_v7  ;;  %v6431_v36 = vpop.f32.mrb[80].mxu1  ;;  %v6469_v20 = vpop.f32.mrb[84].mxu0  ;;  %v5559_v7 = vld [vmem:[%s7711_s20 + $0x8] sm:$0xff] }
0x16dd   :  { %v6432_v13 = vpop.f32.mrb[81].mxu1  ;;  %v6470_v11 = vpop.f32.mrb[85].mxu0  ;;  %v7333_v22 = vpack.c.bf16 %v5559_v7, %v5558_v18 }
0x16de   :  { %v5443_v10 = vadd.f32 %v6468_v54, %v5368_v57  ;;  %v6433_v44 = vadd.f32 %v6432_v13, %v6431_v36  ;;  %v6471_v48 = vadd.f32 %v6470_v11, %v6469_v20  ;;  %v5790_v20 = vld [vmem:[%s9027_s1] ss:$0 sm:$0xff] }
0x16df   :  { %7334 = vmatpush3.bf16.msra.mxu1 %v7333_v22  ;;  %v5791_v11 = vld [vmem:[%s7706_s19] ss:$0 sm:$0xff]  ;;  %s7507_s19 = smov [#allocation2]  }
0x16e0   :  { %v5373_v37 = vadd.f32 %v6433_v44, %v5298_v5  ;;  %v5451_v1 = vadd.f32 %v5443_v10, %v8468_v51  ;;  %v5561_v5 = vld [vmem:[%s7711_s20 + $0x18] sm:$0xff]  ;;  %7335 = vmatprep.subr.bf16.mxu1 %v7506_v21  ;;  %s5653_s20 = sshll.u32 %s7507_s19, 4  ;;  %s5654_s20 = int_to_ptr.vmem [resolvable:$true] %s5653_s20 }
0x16e1   :  { %v7336_v0 = vpack.c.bf16 %v5561_v5, %v5560_v31  ;;  %s7437_s2 = scalar_lea.vmem %s5654_s20, 32  ;;  %p7442_p1 = scmp.lt.s32.totalorder %s5654_s20, %s5654_s20 }
0x16e2   :  { %v5448_v50 = vadd.f32 %v6471_v48, %v5373_v37  ;;  %v5453_v39 = vsel %vm275_vm1, %v5451_v1, 0.0  ;;  %p7438_p0 = scmp.ne.s32.totalorder %s5654_s20, %s7437_s2  ;;  %p7443_p2 = scmp.lt.s32.totalorder %s7437_s2, %s7437_s2 }
0x16e3   :  { %5454 = vadd.xlane.f32.xlu0 %v5453_v39  ;;  %7337 = vmatpush3.bf16.msra.mxu1 %v7336_v0 }
0x16e4   :  { %v5452_v33 = vadd.f32 %v5448_v50, %v8482_v24  ;;  %p7444_p3 = por %p7443_p2, %p7442_p1 }
0x16e6   :  { %v5456_v14 = vsel %vm275_vm1, %v5452_v33, 0.0  ;;  %p7445_p4 = pnand %p7444_p3, %p7438_p0 }
0x16e7   :  { %5457 = vadd.xlane.f32.xlu1 %v5456_v14 }
0x1770   :  { %v5455_v32 = vpop.xlane.xlu0 %5454 }
0x1771   :  { %v5459_v61 = vmul.f32 0.03125, %v5455_v32 }
0x1773   :  { %v5461_v47 = vsub.f32 %v5451_v1, %v5459_v61 }
0x1774   :  { %v5458_v2 = vpop.xlane.xlu1 %5457 }
0x1775   :  { %v5460_v9 = vmul.f32 0.03125, %v5458_v2  ;;  %v5463_v34 = vmul.f32 %v5461_v47, %v5461_v47 }
0x1777   :  { %v5462_v52 = vsub.f32 %v5452_v33, %v5460_v9  ;;  %v5465_v19 = vsel %vm275_vm1, %v5463_v34, 0.0 }
0x1778   :  { %5466 = vadd.xlane.f32.xlu0 %v5465_v19 }
0x1779   :  { %v5464_v51 = vmul.f32 %v5462_v52, %v5462_v52 }
0x177b   :  { %v5468_v38 = vsel %vm275_vm1, %v5464_v51, 0.0 }
0x177c   :  { %5469 = vadd.xlane.f32.xlu1 %v5468_v38 }
0x1805   :  { %v5467_v24 = vpop.xlane.xlu0 %5466 }
0x1806   :  { %v5471_v60 = vmul.f32 0.03125, %v5467_v24 }
0x1808   :  { %v5473_v16 = vadd.f32 1e-05, %v5471_v60 }
0x1809   :  { %v5470_v58 = vpop.xlane.xlu1 %5469 }
0x180a   :  { %7429 = vrsqrt.f32 %v5473_v16  ;;  %v5472_v28 = vmul.f32 0.03125, %v5470_v58 }
0x180c   :  { %v5474_v41 = vadd.f32 1e-05, %v5472_v28  ;;  %v5792_v28 = vld [vmem:[%s7716_s27] ss:$0 sm:$0xff] }
0x180e   :  { %7431 = vrsqrt.f32 %v5474_v41 }
0x1814   :  { %v7430_v42 = vpop.eup %7429 }
0x1815   :  { %v5477_v49 = vmul.f32 %v7430_v42, %v5461_v47 }
0x1817   :  { %v5486_v23 = vmul.f32 %v5788_v59, %v5477_v49 }
0x1818   :  { %v7432_v25 = vpop.eup %7431 }
0x1819   :  { %v5495_v53 = vadd.f32 %v5789_v62, %v5486_v23  ;;  %v5478_v3 = vmul.f32 %v7432_v25, %v5462_v52 }
0x181b   :  { %v5497_v29 = vsel %vm275_vm1, %v5495_v53, 0.0  ;;  %v5487_v4 = vmul.f32 %v5788_v59, %v5478_v3 }
0x181c   :  { %5498 = vadd.xlane.f32.xlu0 %v5497_v29 }
0x181d   :  { %v5496_v45 = vadd.f32 %v5789_v62, %v5487_v4 }
0x181f   :  { %v5500_v55 = vsel %vm275_vm1, %v5496_v45, 0.0 }
0x1820   :  { %5501 = vadd.xlane.f32.xlu1 %v5500_v55 }
0x18a9   :  { %v5499_v8 = vpop.xlane.xlu0 %5498 }
0x18aa   :  { %v5503_v63 = vmul.f32 0.03125, %v5499_v8 }
0x18ac   :  { %v5505_v15 = vsub.f32 %v5495_v53, %v5503_v63 }
0x18ad   :  { %v5502_v43 = vpop.xlane.xlu1 %5501 }
0x18ae   :  { %v5504_v46 = vmul.f32 0.03125, %v5502_v43  ;;  %v5507_v6 = vmul.f32 %v5505_v15, %v5505_v15 }
0x18b0   :  { %v5506_v30 = vsub.f32 %v5496_v45, %v5504_v46  ;;  %v5509_v56 = vsel %vm275_vm1, %v5507_v6, 0.0 }
0x18b1   :  { %5510 = vadd.xlane.f32.xlu0 %v5509_v56 }
0x18b2   :  { %v5508_v12 = vmul.f32 %v5506_v30, %v5506_v30 }
0x18b4   :  { %v5512_v17 = vsel %vm275_vm1, %v5508_v12, 0.0 }
0x18b5   :  { %5513 = vadd.xlane.f32.xlu1 %v5512_v17 }
0x193e   :  { %v5511_v26 = vpop.xlane.xlu0 %5510 }
0x193f   :  { %v5515_v27 = vmul.f32 0.03125, %v5511_v26 }
0x1941   :  { %v5517_v35 = vadd.f32 1e-05, %v5515_v27 }
0x1942   :  { %v5514_v40 = vpop.xlane.xlu1 %5513 }
0x1943   :  { %7433 = vrsqrt.f32 %v5517_v35  ;;  %v5516_v54 = vmul.f32 0.03125, %v5514_v40 }
0x1945   :  { %v5518_v57 = vadd.f32 1e-05, %v5516_v54 }
0x1947   :  { %7435 = vrsqrt.f32 %v5518_v57 }
0x194d   :  { %v7434_v36 = vpop.eup %7433 }
0x194e   :  { %v5521_v13 = vmul.f32 %v7434_v36, %v5505_v15 }
0x1950   :  { %v5530_v10 = vmul.f32 %v5790_v20, %v5521_v13 }
0x1951   :  { %v7436_v44 = vpop.eup %7435 }
0x1952   :  { %v5539_v48 = vadd.f32 %v5791_v11, %v5530_v10  ;;  %v5522_v37 = vmul.f32 %v7436_v44, %v5506_v30 }
0x1954   :  { %v5541_v1 = vsel %vm275_vm1, %v5539_v48, 0.0  ;;  %v5531_v50 = vmul.f32 %v5790_v20, %v5522_v37 }
0x1955   :  { %v5542_v39 = vrot.slane %v5541_v1, 4 }
0x1956   :  { %v5540_v33 = vadd.f32 %v5791_v11, %v5531_v50 }
0x1957   :  { %v5543_v14 = vadd.f32 %v5542_v39, %v5541_v1 }
0x1958   :  { %v5548_v32 = vsel %vm275_vm1, %v5540_v33, 0.0 }
0x1959   :  { %v5549_v61 = vrot.slane %v5548_v32, 4  ;;  %v5544_v47 = vrot.slane %v5543_v14, 2 }
0x195b   :  { %v5545_v2 = vadd.f32 %v5544_v47, %v5543_v14  ;;  %v5550_v9 = vadd.f32 %v5549_v61, %v5548_v32 }
0x195d   :  { %v5546_v34 = vrot.slane %v5545_v2, 1  ;;  %v5551_v52 = vrot.slane %v5550_v9, 2 }
0x195f   :  { %v5552_v19 = vadd.f32 %v5551_v52, %v5550_v9  ;;  %v5547_v51 = vadd.f32 %v5546_v34, %v5545_v2 }
0x1961   :  { %v5553_v38 = vrot.slane %v5552_v19, 1  ;;  %v5556_v60 = vmul.f32 0.125, %v5547_v51 }
0x1963   :  { %v5554_v24 = vadd.f32 %v5553_v38, %v5552_v19 }
0x1965   :  { %v5557_v16 = vmul.f32 0.125, %v5554_v24 }
0x1967   :  { %v5572_v58 = vsel %vm5571_vm4, %v5557_v16, %v5556_v60 }
0x1968   :  { %6630 = vmatmul.mubr.msk.f32.vlgmr.msra.gmra.mrb[82].mxu1 %vm275_vm1, %v5572_v58 }
0x1a3b   :  { %v5641_v41 = vpop.f32.mrb[82].mxu1 }
0x1a3c   :  { %v5642_v42 = vadd.f32 %v5792_v28, %v5641_v41  ;;  %v6631_v59 = vpop.f32.mrb[83].mxu1 }
0x1a3e   :  { %5646 = vst.msk [vmem:[#allocation2] sm:$0x3] %vm5645_vm5, %v5642_v42 }
0x1a3f   :  { %7448 = shalt.err (!%p7445_p4)
}
0x1a40   :  { %s7449_s0 = scalar_lea.hbm %s7721_s14, 32 }
0x1a41   :  { %p7450_p5 = scmp.ne.s32.totalorder %s7721_s14, %s7449_s0  ;;  %p7453_p6 = scmp.lt.u32.totalorder %s7449_s0, %s7721_s14 }
0x1a43   :  { %p7455_p7 = pnand %p7453_p6, %p7450_p5 }
0x1a45   :  { %7458 = shalt.err (!%p7455_p7)
}
0x1a46   :  { %5656 = dma.vmem_to_hbm [thread:$0]  %s5654_s20, 32, %s7721_s14, [#allocation3]  }
0x1a47   :  { %7459 = dma.done.wait [#allocation3], 32  }
0x1a48   :  { %7460 = vsyncadd [#allocation3], 4294967264 }
0x1a49   :  { %5660 = vsyncpa [#allocation3], 1 }

</bundles_post_ra>
